<compile_context>
chip_gen: v6e
topology: v6e:2x2x1
jax: 0.10.0
libtpu: 0.0.40
codegen_flags: <defaults>
</compile_context>

<pallas_src>
import functools

import numpy as np
import jax
import jax.numpy as jnp
from jax.experimental import pallas as pl
from jax.experimental.pallas import tpu as pltpu


_VMEM = pl.BlockSpec(memory_space=pltpu.MemorySpace.VMEM)


# ----------------------------- in-kernel helpers -----------------------------

def _shift_rows(v, d):
    """out[r] = v[(r + d) mod n] -- static cyclic shift along the row axis."""
    n = v.shape[0]
    s = d % n
    if s == 0:
        return v
    return jnp.concatenate([v[s:], v[:s]], axis=0)


# --------------------------------- the kernel --------------------------------

def _fused_kernel(x_ref, gamma_ref, beta_ref,
                  w1_ref, b1_ref, w2_ref, b2_ref, w3_ref, b3_ref,
                  m1_ref, m2_ref, m3_ref, s1_ref, s2_ref, perm_ref,
                  wih_ref, whh_ref, blstm_ref, wo_ref, bo_ref,
                  o_ref, *, B, T, H, L, K):
    pad = (K - 1) // 2

    # ---- BatchNorm1d (batch statistics, biased variance, eps=1e-5), in-reg ----
    x = x_ref[...]                                          # (B*T, F), rows b-major
    mean = jnp.mean(x, axis=0, keepdims=True)               # (1, F)
    var = jnp.mean((x - mean) ** 2, axis=0, keepdims=True)
    scale = gamma_ref[...] * jax.lax.rsqrt(var + 1e-5)      # (1, F)
    x = x * scale + (beta_ref[...] - mean * scale)

    def conv(v, w_ref, b_ref, mask_ref, relu):
        # v: (n, Cin), rows = (b, t) b-major.  Build the im2col patch entirely
        # in registers: per tap, cyclic row shift + 0/1 mask (== zero padding,
        # also blocks cross-sample leakage), then ONE MXU matmul over K*Cin.
        mask = mask_ref[...]                                # (n, K) of 0/1
        cols = []
        for k in range(K):                                  # static, K = 9
            cols.append(_shift_rows(v, k - pad) * mask[:, k:k + 1])
        patch = jnp.concatenate(cols, axis=1)               # (n, K*Cin)
        y = jnp.dot(patch, w_ref[...],
                    preferred_element_type=jnp.float32) + b_ref[...]
        return jnp.maximum(y, 0.0) if relu else y

    def pool2(v, sel_ref):
        # MaxPool1d(2,2): pairwise max of adjacent rows, then compact the even
        # rows with one 0/1 selection matmul (no strided stores / reshapes).
        m = jnp.maximum(v, _shift_rows(v, 1))               # m[2i] = max(v[2i], v[2i+1])
        return jnp.dot(sel_ref[...], m, preferred_element_type=jnp.float32)

    y = pool2(conv(x, w1_ref, b1_ref, m1_ref, True), s1_ref)    # (B*T/2, H)
    y = pool2(conv(y, w2_ref, b2_ref, m2_ref, True), s2_ref)    # (B*T/4, H)
    y = conv(y, w3_ref, b3_ref, m3_ref, False)                  # (B*T/4, H), b-major

    # Reorder rows b-major -> t-major (replaces the old XLA transpose glue).
    y = jnp.dot(perm_ref[...], y, preferred_element_type=jnp.float32)

    # ---- 3-layer LSTM (batch_first, zero initial state) + final Linear ----
    T2 = T // 4
    inp = y                                                 # (T2*B, H), t-major
    h = jnp.zeros((B, H), jnp.float32)
    for l in range(L):                                      # static, L = 3
        # Hoisted input projection: one matmul for the whole sequence.
        g_all = (jnp.dot(inp, wih_ref[l], preferred_element_type=jnp.float32)
                 + blstm_ref[l])                            # (T2*B, 4H)
        whh_l = whh_ref[l]                                  # (H, 4H), gate order i,f,g,o
        h = jnp.zeros((B, H), jnp.float32)
        c = jnp.zeros((B, H), jnp.float32)
        hs = []
        for t in range(T2):                                 # static, T2 = 4 (serial chain)
            g = (g_all[t * B:(t + 1) * B, :]
                 + jnp.dot(h, whh_l, preferred_element_type=jnp.float32))  # (B, 4H)
            i_g = jax.nn.sigmoid(g[:, 0 * H:1 * H])
            f_g = jax.nn.sigmoid(g[:, 1 * H:2 * H])
            c_g = jnp.tanh(g[:, 2 * H:3 * H])
            o_g = jax.nn.sigmoid(g[:, 3 * H:4 * H])
            c = f_g * c + i_g * c_g
            h = o_g * jnp.tanh(c)
            hs.append(h)                                    # sequence stays in registers
        inp = jnp.concatenate(hs, axis=0)                   # (T2*B, H) next layer input

    # Final Linear on the last timestep of the top layer (== out[:, -1]).
    o_ref[...] = (jnp.dot(h, wo_ref[...], preferred_element_type=jnp.float32)
                  + bo_ref[...]).astype(o_ref.dtype)


# ------------------------- trace-time constant builders ----------------------

def _conv_mask(n_rows, t_len, K, pad):
    # mask[r, k] = 1 iff tap k at row r stays inside its own sample (zero pad).
    t = np.arange(n_rows) % t_len
    tp = t[:, None] + (np.arange(K)[None, :] - pad)
    return ((tp >= 0) & (tp < t_len)).astype(np.float32)    # (n_rows, K)


def _pool_sel(n_rows):
    sel = np.zeros((n_rows // 2, n_rows), np.float32)
    sel[np.arange(n_rows // 2), 2 * np.arange(n_rows // 2)] = 1.0
    return sel


def _bm_to_tm_perm(B, T):
    # perm[t*B + b, b*T + t] = 1 : batch-major rows -> time-major rows.
    perm = np.zeros((B * T, B * T), np.float32)
    t = np.arange(T)
    for b in range(B):
        perm[t * B + b, b * T + t] = 1.0
    return perm


# ------------------------------ full forward ---------------------------------

def lstm_conv_forward(packed, x):
    # x: (B, T, input_size) -- same as the PyTorch module's input.
    B, T, F = x.shape
    H = packed["conv1_w"].shape[1]
    L = packed["lstm_wih"].shape[0]
    O = packed["lin_w"].shape[1]
    K = packed["conv1_w"].shape[0] // F
    pad = (K - 1) // 2
    assert T % 4 == 0, "two MaxPool(2) stages need T divisible by 4"

    x2d = x.reshape(B * T, F)          # rows (b, t) b-major; pure view, no transpose

    m1 = _conv_mask(B * T, T, K, pad)
    m2 = _conv_mask(B * T // 2, T // 2, K, pad)
    m3 = _conv_mask(B * T // 4, T // 4, K, pad)
    s1 = _pool_sel(B * T)
    s2 = _pool_sel(B * T // 2)
    perm = _bm_to_tm_perm(B, T // 4)

    kern = functools.partial(_fused_kernel, B=B, T=T, H=H, L=L, K=K)
    return pl.pallas_call(
        kern,
        out_shape=jax.ShapeDtypeStruct((B, O), jnp.float32),
        in_specs=[_VMEM] * 20,
        out_specs=_VMEM,
    )(x2d, packed["bn_gamma"], packed["bn_beta"],
      packed["conv1_w"], packed["conv1_b"],
      packed["conv2_w"], packed["conv2_b"],
      packed["conv3_w"], packed["conv3_b"],
      m1, m2, m3, s1, s2, perm,
      packed["lstm_wih"], packed["lstm_whh"], packed["lstm_bias"],
      packed["lin_w"], packed["lin_b"])


# ------------------------------ param prep -----------------------------------

def init_params(key, input_size, output_size, num_layers=3, hidden_size=32):
    # PyTorch-layout parameters (same layouts as the nn.Module's state_dict).
    H = hidden_size
    K = 9

    def u(k, shape, bound):
        return jax.random.uniform(k, shape, jnp.float32, -bound, bound)

    keys = iter(jax.random.split(key, 8 + 4 * num_layers))
    params = {
        "bn_gamma": jnp.ones((input_size,), jnp.float32),
        "bn_beta": jnp.zeros((input_size,), jnp.float32),
        "conv1_w": u(next(keys), (H, input_size, K), 1.0 / (input_size * K) ** 0.5),
        "conv1_b": u(next(keys), (H,), 1.0 / (input_size * K) ** 0.5),
        "conv2_w": u(next(keys), (H, H, K), 1.0 / (H * K) ** 0.5),
        "conv2_b": u(next(keys), (H,), 1.0 / (H * K) ** 0.5),
        "conv3_w": u(next(keys), (H, H, K), 1.0 / (H * K) ** 0.5),
        "conv3_b": u(next(keys), (H,), 1.0 / (H * K) ** 0.5),
        "lin_w": u(next(keys), (output_size, H), 1.0 / H ** 0.5),
        "lin_b": u(next(keys), (output_size,), 1.0 / H ** 0.5),
    }
    for l in range(num_layers):
        bound = 1.0 / H ** 0.5
        params[f"lstm_wih_{l}"] = u(next(keys), (4 * H, H), bound)
        params[f"lstm_whh_{l}"] = u(next(keys), (4 * H, H), bound)
        params[f"lstm_bih_{l}"] = u(next(keys), (4 * H,), bound)
        params[f"lstm_bhh_{l}"] = u(next(keys), (4 * H,), bound)
    return params


def prepare_params(p, num_layers, hidden_size):
    # One-time packing into kernel-friendly layouts (outside the hot path).
    H = hidden_size

    def conv_pack(w):  # (Cout, Cin, K) -> (K*Cin, Cout), rows k-major cin-minor
        Cout, Cin, K = w.shape
        return jnp.transpose(w, (2, 1, 0)).reshape(K * Cin, Cout)

    wih = jnp.stack([jnp.transpose(p[f"lstm_wih_{l}"]) for l in range(num_layers)])
    whh = jnp.stack([jnp.transpose(p[f"lstm_whh_{l}"]) for l in range(num_layers)])
    bias = jnp.stack([(p[f"lstm_bih_{l}"] + p[f"lstm_bhh_{l}"]).reshape(1, 4 * H)
                      for l in range(num_layers)])

    return {
        "bn_gamma": p["bn_gamma"].reshape(1, -1),
        "bn_beta": p["bn_beta"].reshape(1, -1),
        "conv1_w": conv_pack(p["conv1_w"]), "conv1_b": p["conv1_b"].reshape(1, -1),
        "conv2_w": conv_pack(p["conv2_w"]), "conv2_b": p["conv2_b"].reshape(1, -1),
        "conv3_w": conv_pack(p["conv3_w"]), "conv3_b": p["conv3_b"].reshape(1, -1),
        "lstm_wih": wih,                                     # (L, H, 4H), gate order i,f,g,o
        "lstm_whh": whh,                                     # (L, H, 4H)
        "lstm_bias": bias,                                   # (L, 1, 4H)
        "lin_w": jnp.transpose(p["lin_w"]),                  # (H, O)
        "lin_b": p["lin_b"].reshape(1, -1),                  # (1, O)
    }


# --------------------------------- main ---------------------------------------

if __name__ == "__main__":
    B, T, input_size = 2, 16, 4
    hidden_size, output_size, num_layers = 32, 5, 3

    key = jax.random.PRNGKey(0)
    pkey, xkey = jax.random.split(key)
    params = init_params(pkey, input_size, output_size, num_layers, hidden_size)
    packed = prepare_params(params, num_layers, hidden_size)
    x = jax.random.normal(xkey, (B, T, input_size), dtype=jnp.float32)

    fwd = jax.jit(lstm_conv_forward)
    y = fwd(packed, x)
    y = jax.block_until_ready(y)

    assert y.shape == (B, output_size), y.shape
    assert bool(jnp.all(jnp.isfinite(y)))
    print("KERNEL_OK")
</pallas_src>

<mosaic_0001>
module attributes {stable_mosaic.version = 11 : i64} {
  func.func @_fused_kernel(%arg0: memref<32x4xf32, #tpu.memory_space<vmem>>, %arg1: memref<1x4xf32, #tpu.memory_space<vmem>>, %arg2: memref<1x4xf32, #tpu.memory_space<vmem>>, %arg3: memref<36x32xf32, #tpu.memory_space<vmem>>, %arg4: memref<1x32xf32, #tpu.memory_space<vmem>>, %arg5: memref<288x32xf32, #tpu.memory_space<vmem>>, %arg6: memref<1x32xf32, #tpu.memory_space<vmem>>, %arg7: memref<288x32xf32, #tpu.memory_space<vmem>>, %arg8: memref<1x32xf32, #tpu.memory_space<vmem>>, %arg9: memref<32x9xf32, #tpu.memory_space<vmem>>, %arg10: memref<16x9xf32, #tpu.memory_space<vmem>>, %arg11: memref<8x9xf32, #tpu.memory_space<vmem>>, %arg12: memref<16x32xf32, #tpu.memory_space<vmem>>, %arg13: memref<8x16xf32, #tpu.memory_space<vmem>>, %arg14: memref<8x8xf32, #tpu.memory_space<vmem>>, %arg15: memref<3x32x128xf32, #tpu.memory_space<vmem>>, %arg16: memref<3x32x128xf32, #tpu.memory_space<vmem>>, %arg17: memref<3x1x128xf32, #tpu.memory_space<vmem>>, %arg18: memref<32x5xf32, #tpu.memory_space<vmem>>, %arg19: memref<1x5xf32, #tpu.memory_space<vmem>>, %arg20: memref<2x5xf32, #tpu.memory_space<vmem>>) attributes {dimension_semantics = [], scalar_prefetch = 0 : i64, scratch_operands = 0 : i64, tpu.core_type = #tpu.core_type<tc>} {
    %c0 = arith.constant 0 : index
    %c0_0 = arith.constant 0 : index
    %0 = vector.load %arg0[%c0, %c0_0] : memref<32x4xf32, #tpu.memory_space<vmem>>, vector<32x4xf32>
    %cst = arith.constant dense<0.000000e+00> : vector<4xf32>
    %1 = vector.multi_reduction <add>, %0, %cst [0] : vector<32x4xf32> to vector<4xf32>
    %2 = vector.shape_cast %1 : vector<4xf32> to vector<1x4xf32>
    %cst_1 = arith.constant 3.200000e+01 : f32
    %3 = vector.broadcast %cst_1 : f32 to vector<1x4xf32>
    %4 = arith.divf %2, %3 : vector<1x4xf32>
    %5 = vector.broadcast %4 : vector<1x4xf32> to vector<32x4xf32>
    %6 = arith.subf %0, %5 : vector<32x4xf32>
    %7 = arith.mulf %6, %6 : vector<32x4xf32>
    %cst_2 = arith.constant dense<0.000000e+00> : vector<4xf32>
    %8 = vector.multi_reduction <add>, %7, %cst_2 [0] : vector<32x4xf32> to vector<4xf32>
    %9 = vector.shape_cast %8 : vector<4xf32> to vector<1x4xf32>
    %cst_3 = arith.constant 3.200000e+01 : f32
    %10 = vector.broadcast %cst_3 : f32 to vector<1x4xf32>
    %11 = arith.divf %9, %10 : vector<1x4xf32>
    %c0_4 = arith.constant 0 : index
    %c0_5 = arith.constant 0 : index
    %12 = vector.load %arg1[%c0_4, %c0_5] : memref<1x4xf32, #tpu.memory_space<vmem>>, vector<1x4xf32>
    %cst_6 = arith.constant 9.99999974E-6 : f32
    %13 = vector.broadcast %cst_6 : f32 to vector<1x4xf32>
    %14 = arith.addf %11, %13 : vector<1x4xf32>
    %15 = math.rsqrt %14 : vector<1x4xf32>
    %16 = arith.mulf %12, %15 : vector<1x4xf32>
    %17 = vector.broadcast %16 : vector<1x4xf32> to vector<32x4xf32>
    %18 = arith.mulf %0, %17 : vector<32x4xf32>
    %c0_7 = arith.constant 0 : index
    %c0_8 = arith.constant 0 : index
    %19 = vector.load %arg2[%c0_7, %c0_8] : memref<1x4xf32, #tpu.memory_space<vmem>>, vector<1x4xf32>
    %20 = arith.mulf %4, %16 : vector<1x4xf32>
    %21 = arith.subf %19, %20 : vector<1x4xf32>
    %22 = vector.broadcast %21 : vector<1x4xf32> to vector<32x4xf32>
    %23 = arith.addf %18, %22 : vector<32x4xf32>
    %c0_9 = arith.constant 0 : index
    %c0_10 = arith.constant 0 : index
    %24 = vector.load %arg9[%c0_9, %c0_10] : memref<32x9xf32, #tpu.memory_space<vmem>>, vector<32x9xf32>
    %25 = vector.extract_strided_slice %23 {offsets = [28, 0], sizes = [4, 4], strides = [1, 1]} : vector<32x4xf32> to vector<4x4xf32>
    %26 = vector.extract_strided_slice %23 {offsets = [0, 0], sizes = [28, 4], strides = [1, 1]} : vector<32x4xf32> to vector<28x4xf32>
    %27 = tpu.concatenate %25, %26 in 0 : vector<4x4xf32>, vector<28x4xf32> -> vector<32x4xf32>
    %28 = vector.extract_strided_slice %24 {offsets = [0, 0], sizes = [32, 1], strides = [1, 1]} : vector<32x9xf32> to vector<32x1xf32>
    %29 = vector.broadcast %28 : vector<32x1xf32> to vector<32x4xf32>
    %30 = arith.mulf %27, %29 : vector<32x4xf32>
    %31 = vector.extract_strided_slice %23 {offsets = [29, 0], sizes = [3, 4], strides = [1, 1]} : vector<32x4xf32> to vector<3x4xf32>
    %32 = vector.extract_strided_slice %23 {offsets = [0, 0], sizes = [29, 4], strides = [1, 1]} : vector<32x4xf32> to vector<29x4xf32>
    %33 = tpu.concatenate %31, %32 in 0 : vector<3x4xf32>, vector<29x4xf32> -> vector<32x4xf32>
    %34 = vector.extract_strided_slice %24 {offsets = [0, 1], sizes = [32, 1], strides = [1, 1]} : vector<32x9xf32> to vector<32x1xf32>
    %35 = vector.broadcast %34 : vector<32x1xf32> to vector<32x4xf32>
    %36 = arith.mulf %33, %35 : vector<32x4xf32>
    %37 = vector.extract_strided_slice %23 {offsets = [30, 0], sizes = [2, 4], strides = [1, 1]} : vector<32x4xf32> to vector<2x4xf32>
    %38 = vector.extract_strided_slice %23 {offsets = [0, 0], sizes = [30, 4], strides = [1, 1]} : vector<32x4xf32> to vector<30x4xf32>
    %39 = tpu.concatenate %37, %38 in 0 : vector<2x4xf32>, vector<30x4xf32> -> vector<32x4xf32>
    %40 = vector.extract_strided_slice %24 {offsets = [0, 2], sizes = [32, 1], strides = [1, 1]} : vector<32x9xf32> to vector<32x1xf32>
    %41 = vector.broadcast %40 : vector<32x1xf32> to vector<32x4xf32>
    %42 = arith.mulf %39, %41 : vector<32x4xf32>
    %43 = vector.extract_strided_slice %23 {offsets = [31, 0], sizes = [1, 4], strides = [1, 1]} : vector<32x4xf32> to vector<1x4xf32>
    %44 = vector.extract_strided_slice %23 {offsets = [0, 0], sizes = [31, 4], strides = [1, 1]} : vector<32x4xf32> to vector<31x4xf32>
    %45 = tpu.concatenate %43, %44 in 0 : vector<1x4xf32>, vector<31x4xf32> -> vector<32x4xf32>
    %46 = vector.extract_strided_slice %24 {offsets = [0, 3], sizes = [32, 1], strides = [1, 1]} : vector<32x9xf32> to vector<32x1xf32>
    %47 = vector.broadcast %46 : vector<32x1xf32> to vector<32x4xf32>
    %48 = arith.mulf %45, %47 : vector<32x4xf32>
    %49 = vector.extract_strided_slice %24 {offsets = [0, 4], sizes = [32, 1], strides = [1, 1]} : vector<32x9xf32> to vector<32x1xf32>
    %50 = vector.broadcast %49 : vector<32x1xf32> to vector<32x4xf32>
    %51 = arith.mulf %23, %50 : vector<32x4xf32>
    %52 = vector.extract_strided_slice %23 {offsets = [1, 0], sizes = [31, 4], strides = [1, 1]} : vector<32x4xf32> to vector<31x4xf32>
    %53 = vector.extract_strided_slice %23 {offsets = [0, 0], sizes = [1, 4], strides = [1, 1]} : vector<32x4xf32> to vector<1x4xf32>
    %54 = tpu.concatenate %52, %53 in 0 : vector<31x4xf32>, vector<1x4xf32> -> vector<32x4xf32>
    %55 = vector.extract_strided_slice %24 {offsets = [0, 5], sizes = [32, 1], strides = [1, 1]} : vector<32x9xf32> to vector<32x1xf32>
    %56 = vector.broadcast %55 : vector<32x1xf32> to vector<32x4xf32>
    %57 = arith.mulf %54, %56 : vector<32x4xf32>
    %58 = vector.extract_strided_slice %23 {offsets = [2, 0], sizes = [30, 4], strides = [1, 1]} : vector<32x4xf32> to vector<30x4xf32>
    %59 = vector.extract_strided_slice %23 {offsets = [0, 0], sizes = [2, 4], strides = [1, 1]} : vector<32x4xf32> to vector<2x4xf32>
    %60 = tpu.concatenate %58, %59 in 0 : vector<30x4xf32>, vector<2x4xf32> -> vector<32x4xf32>
    %61 = vector.extract_strided_slice %24 {offsets = [0, 6], sizes = [32, 1], strides = [1, 1]} : vector<32x9xf32> to vector<32x1xf32>
    %62 = vector.broadcast %61 : vector<32x1xf32> to vector<32x4xf32>
    %63 = arith.mulf %60, %62 : vector<32x4xf32>
    %64 = vector.extract_strided_slice %23 {offsets = [3, 0], sizes = [29, 4], strides = [1, 1]} : vector<32x4xf32> to vector<29x4xf32>
    %65 = vector.extract_strided_slice %23 {offsets = [0, 0], sizes = [3, 4], strides = [1, 1]} : vector<32x4xf32> to vector<3x4xf32>
    %66 = tpu.concatenate %64, %65 in 0 : vector<29x4xf32>, vector<3x4xf32> -> vector<32x4xf32>
    %67 = vector.extract_strided_slice %24 {offsets = [0, 7], sizes = [32, 1], strides = [1, 1]} : vector<32x9xf32> to vector<32x1xf32>
    %68 = vector.broadcast %67 : vector<32x1xf32> to vector<32x4xf32>
    %69 = arith.mulf %66, %68 : vector<32x4xf32>
    %70 = vector.extract_strided_slice %23 {offsets = [4, 0], sizes = [28, 4], strides = [1, 1]} : vector<32x4xf32> to vector<28x4xf32>
    %71 = vector.extract_strided_slice %23 {offsets = [0, 0], sizes = [4, 4], strides = [1, 1]} : vector<32x4xf32> to vector<4x4xf32>
    %72 = tpu.concatenate %70, %71 in 0 : vector<28x4xf32>, vector<4x4xf32> -> vector<32x4xf32>
    %73 = vector.extract_strided_slice %24 {offsets = [0, 8], sizes = [32, 1], strides = [1, 1]} : vector<32x9xf32> to vector<32x1xf32>
    %74 = vector.broadcast %73 : vector<32x1xf32> to vector<32x4xf32>
    %75 = arith.mulf %72, %74 : vector<32x4xf32>
    %76 = tpu.concatenate %30, %36, %42, %48, %51, %57, %63, %69, %75 in 1 : vector<32x4xf32>, vector<32x4xf32>, vector<32x4xf32>, vector<32x4xf32>, vector<32x4xf32>, vector<32x4xf32>, vector<32x4xf32>, vector<32x4xf32>, vector<32x4xf32> -> vector<32x36xf32>
    %c0_11 = arith.constant 0 : index
    %c0_12 = arith.constant 0 : index
    %77 = vector.load %arg3[%c0_11, %c0_12] : memref<36x32xf32, #tpu.memory_space<vmem>>, vector<36x32xf32>
    %cst_13 = arith.constant dense<0.000000e+00> : vector<32x32xf32>
    %78 = tpu.matmul %76, %77, %cst_13 {dimension_numbers = #tpu.dot_dimension_numbers<[1], [0], [0], [1], [0, 0, 1, 1], [], []>} : vector<32x36xf32>, vector<36x32xf32>, vector<32x32xf32> -> vector<32x32xf32>
    %c0_14 = arith.constant 0 : index
    %c0_15 = arith.constant 0 : index
    %79 = vector.load %arg4[%c0_14, %c0_15] : memref<1x32xf32, #tpu.memory_space<vmem>>, vector<1x32xf32>
    %80 = vector.broadcast %79 : vector<1x32xf32> to vector<32x32xf32>
    %81 = arith.addf %78, %80 : vector<32x32xf32>
    %cst_16 = arith.constant 0.000000e+00 : f32
    %82 = vector.broadcast %cst_16 : f32 to vector<32x32xf32>
    %83 = arith.maximumf %81, %82 : vector<32x32xf32>
    %84 = vector.extract_strided_slice %83 {offsets = [1, 0], sizes = [31, 32], strides = [1, 1]} : vector<32x32xf32> to vector<31x32xf32>
    %85 = vector.extract_strided_slice %83 {offsets = [0, 0], sizes = [1, 32], strides = [1, 1]} : vector<32x32xf32> to vector<1x32xf32>
    %86 = tpu.concatenate %84, %85 in 0 : vector<31x32xf32>, vector<1x32xf32> -> vector<32x32xf32>
    %87 = arith.maximumf %83, %86 : vector<32x32xf32>
    %c0_17 = arith.constant 0 : index
    %c0_18 = arith.constant 0 : index
    %88 = vector.load %arg12[%c0_17, %c0_18] : memref<16x32xf32, #tpu.memory_space<vmem>>, vector<16x32xf32>
    %cst_19 = arith.constant dense<0.000000e+00> : vector<16x32xf32>
    %89 = tpu.matmul %88, %87, %cst_19 {dimension_numbers = #tpu.dot_dimension_numbers<[1], [0], [0], [1], [0, 0, 1, 1], [], []>} : vector<16x32xf32>, vector<32x32xf32>, vector<16x32xf32> -> vector<16x32xf32>
    %c0_20 = arith.constant 0 : index
    %c0_21 = arith.constant 0 : index
    %90 = vector.load %arg10[%c0_20, %c0_21] : memref<16x9xf32, #tpu.memory_space<vmem>>, vector<16x9xf32>
    %91 = vector.extract_strided_slice %89 {offsets = [12, 0], sizes = [4, 32], strides = [1, 1]} : vector<16x32xf32> to vector<4x32xf32>
    %92 = vector.extract_strided_slice %89 {offsets = [0, 0], sizes = [12, 32], strides = [1, 1]} : vector<16x32xf32> to vector<12x32xf32>
    %93 = tpu.concatenate %91, %92 in 0 : vector<4x32xf32>, vector<12x32xf32> -> vector<16x32xf32>
    %94 = vector.extract_strided_slice %90 {offsets = [0, 0], sizes = [16, 1], strides = [1, 1]} : vector<16x9xf32> to vector<16x1xf32>
    %95 = vector.broadcast %94 : vector<16x1xf32> to vector<16x32xf32>
    %96 = arith.mulf %93, %95 : vector<16x32xf32>
    %97 = vector.extract_strided_slice %89 {offsets = [13, 0], sizes = [3, 32], strides = [1, 1]} : vector<16x32xf32> to vector<3x32xf32>
    %98 = vector.extract_strided_slice %89 {offsets = [0, 0], sizes = [13, 32], strides = [1, 1]} : vector<16x32xf32> to vector<13x32xf32>
    %99 = tpu.concatenate %97, %98 in 0 : vector<3x32xf32>, vector<13x32xf32> -> vector<16x32xf32>
    %100 = vector.extract_strided_slice %90 {offsets = [0, 1], sizes = [16, 1], strides = [1, 1]} : vector<16x9xf32> to vector<16x1xf32>
    %101 = vector.broadcast %100 : vector<16x1xf32> to vector<16x32xf32>
    %102 = arith.mulf %99, %101 : vector<16x32xf32>
    %103 = vector.extract_strided_slice %89 {offsets = [14, 0], sizes = [2, 32], strides = [1, 1]} : vector<16x32xf32> to vector<2x32xf32>
    %104 = vector.extract_strided_slice %89 {offsets = [0, 0], sizes = [14, 32], strides = [1, 1]} : vector<16x32xf32> to vector<14x32xf32>
    %105 = tpu.concatenate %103, %104 in 0 : vector<2x32xf32>, vector<14x32xf32> -> vector<16x32xf32>
    %106 = vector.extract_strided_slice %90 {offsets = [0, 2], sizes = [16, 1], strides = [1, 1]} : vector<16x9xf32> to vector<16x1xf32>
    %107 = vector.broadcast %106 : vector<16x1xf32> to vector<16x32xf32>
    %108 = arith.mulf %105, %107 : vector<16x32xf32>
    %109 = vector.extract_strided_slice %89 {offsets = [15, 0], sizes = [1, 32], strides = [1, 1]} : vector<16x32xf32> to vector<1x32xf32>
    %110 = vector.extract_strided_slice %89 {offsets = [0, 0], sizes = [15, 32], strides = [1, 1]} : vector<16x32xf32> to vector<15x32xf32>
    %111 = tpu.concatenate %109, %110 in 0 : vector<1x32xf32>, vector<15x32xf32> -> vector<16x32xf32>
    %112 = vector.extract_strided_slice %90 {offsets = [0, 3], sizes = [16, 1], strides = [1, 1]} : vector<16x9xf32> to vector<16x1xf32>
    %113 = vector.broadcast %112 : vector<16x1xf32> to vector<16x32xf32>
    %114 = arith.mulf %111, %113 : vector<16x32xf32>
    %115 = vector.extract_strided_slice %90 {offsets = [0, 4], sizes = [16, 1], strides = [1, 1]} : vector<16x9xf32> to vector<16x1xf32>
    %116 = vector.broadcast %115 : vector<16x1xf32> to vector<16x32xf32>
    %117 = arith.mulf %89, %116 : vector<16x32xf32>
    %118 = vector.extract_strided_slice %89 {offsets = [1, 0], sizes = [15, 32], strides = [1, 1]} : vector<16x32xf32> to vector<15x32xf32>
    %119 = vector.extract_strided_slice %89 {offsets = [0, 0], sizes = [1, 32], strides = [1, 1]} : vector<16x32xf32> to vector<1x32xf32>
    %120 = tpu.concatenate %118, %119 in 0 : vector<15x32xf32>, vector<1x32xf32> -> vector<16x32xf32>
    %121 = vector.extract_strided_slice %90 {offsets = [0, 5], sizes = [16, 1], strides = [1, 1]} : vector<16x9xf32> to vector<16x1xf32>
    %122 = vector.broadcast %121 : vector<16x1xf32> to vector<16x32xf32>
    %123 = arith.mulf %120, %122 : vector<16x32xf32>
    %124 = vector.extract_strided_slice %89 {offsets = [2, 0], sizes = [14, 32], strides = [1, 1]} : vector<16x32xf32> to vector<14x32xf32>
    %125 = vector.extract_strided_slice %89 {offsets = [0, 0], sizes = [2, 32], strides = [1, 1]} : vector<16x32xf32> to vector<2x32xf32>
    %126 = tpu.concatenate %124, %125 in 0 : vector<14x32xf32>, vector<2x32xf32> -> vector<16x32xf32>
    %127 = vector.extract_strided_slice %90 {offsets = [0, 6], sizes = [16, 1], strides = [1, 1]} : vector<16x9xf32> to vector<16x1xf32>
    %128 = vector.broadcast %127 : vector<16x1xf32> to vector<16x32xf32>
    %129 = arith.mulf %126, %128 : vector<16x32xf32>
    %130 = vector.extract_strided_slice %89 {offsets = [3, 0], sizes = [13, 32], strides = [1, 1]} : vector<16x32xf32> to vector<13x32xf32>
    %131 = vector.extract_strided_slice %89 {offsets = [0, 0], sizes = [3, 32], strides = [1, 1]} : vector<16x32xf32> to vector<3x32xf32>
    %132 = tpu.concatenate %130, %131 in 0 : vector<13x32xf32>, vector<3x32xf32> -> vector<16x32xf32>
    %133 = vector.extract_strided_slice %90 {offsets = [0, 7], sizes = [16, 1], strides = [1, 1]} : vector<16x9xf32> to vector<16x1xf32>
    %134 = vector.broadcast %133 : vector<16x1xf32> to vector<16x32xf32>
    %135 = arith.mulf %132, %134 : vector<16x32xf32>
    %136 = vector.extract_strided_slice %89 {offsets = [4, 0], sizes = [12, 32], strides = [1, 1]} : vector<16x32xf32> to vector<12x32xf32>
    %137 = vector.extract_strided_slice %89 {offsets = [0, 0], sizes = [4, 32], strides = [1, 1]} : vector<16x32xf32> to vector<4x32xf32>
    %138 = tpu.concatenate %136, %137 in 0 : vector<12x32xf32>, vector<4x32xf32> -> vector<16x32xf32>
    %139 = vector.extract_strided_slice %90 {offsets = [0, 8], sizes = [16, 1], strides = [1, 1]} : vector<16x9xf32> to vector<16x1xf32>
    %140 = vector.broadcast %139 : vector<16x1xf32> to vector<16x32xf32>
    %141 = arith.mulf %138, %140 : vector<16x32xf32>
    %142 = tpu.concatenate %96, %102, %108, %114, %117, %123, %129, %135, %141 in 1 : vector<16x32xf32>, vector<16x32xf32>, vector<16x32xf32>, vector<16x32xf32>, vector<16x32xf32>, vector<16x32xf32>, vector<16x32xf32>, vector<16x32xf32>, vector<16x32xf32> -> vector<16x288xf32>
    %c0_22 = arith.constant 0 : index
    %c0_23 = arith.constant 0 : index
    %143 = vector.load %arg5[%c0_22, %c0_23] : memref<288x32xf32, #tpu.memory_space<vmem>>, vector<288x32xf32>
    %cst_24 = arith.constant dense<0.000000e+00> : vector<16x32xf32>
    %144 = tpu.matmul %142, %143, %cst_24 {dimension_numbers = #tpu.dot_dimension_numbers<[1], [0], [0], [1], [0, 0, 1, 1], [], []>} : vector<16x288xf32>, vector<288x32xf32>, vector<16x32xf32> -> vector<16x32xf32>
    %c0_25 = arith.constant 0 : index
    %c0_26 = arith.constant 0 : index
    %145 = vector.load %arg6[%c0_25, %c0_26] : memref<1x32xf32, #tpu.memory_space<vmem>>, vector<1x32xf32>
    %146 = vector.broadcast %145 : vector<1x32xf32> to vector<16x32xf32>
    %147 = arith.addf %144, %146 : vector<16x32xf32>
    %cst_27 = arith.constant 0.000000e+00 : f32
    %148 = vector.broadcast %cst_27 : f32 to vector<16x32xf32>
    %149 = arith.maximumf %147, %148 : vector<16x32xf32>
    %150 = vector.extract_strided_slice %149 {offsets = [1, 0], sizes = [15, 32], strides = [1, 1]} : vector<16x32xf32> to vector<15x32xf32>
    %151 = vector.extract_strided_slice %149 {offsets = [0, 0], sizes = [1, 32], strides = [1, 1]} : vector<16x32xf32> to vector<1x32xf32>
    %152 = tpu.concatenate %150, %151 in 0 : vector<15x32xf32>, vector<1x32xf32> -> vector<16x32xf32>
    %153 = arith.maximumf %149, %152 : vector<16x32xf32>
    %c0_28 = arith.constant 0 : index
    %c0_29 = arith.constant 0 : index
    %154 = vector.load %arg13[%c0_28, %c0_29] : memref<8x16xf32, #tpu.memory_space<vmem>>, vector<8x16xf32>
    %cst_30 = arith.constant dense<0.000000e+00> : vector<8x32xf32>
    %155 = tpu.matmul %154, %153, %cst_30 {dimension_numbers = #tpu.dot_dimension_numbers<[1], [0], [0], [1], [0, 0, 1, 1], [], []>} : vector<8x16xf32>, vector<16x32xf32>, vector<8x32xf32> -> vector<8x32xf32>
    %c0_31 = arith.constant 0 : index
    %c0_32 = arith.constant 0 : index
    %156 = vector.load %arg11[%c0_31, %c0_32] : memref<8x9xf32, #tpu.memory_space<vmem>>, vector<8x9xf32>
    %157 = vector.extract_strided_slice %155 {offsets = [4, 0], sizes = [4, 32], strides = [1, 1]} : vector<8x32xf32> to vector<4x32xf32>
    %158 = vector.extract_strided_slice %155 {offsets = [0, 0], sizes = [4, 32], strides = [1, 1]} : vector<8x32xf32> to vector<4x32xf32>
    %159 = tpu.concatenate %157, %158 in 0 : vector<4x32xf32>, vector<4x32xf32> -> vector<8x32xf32>
    %160 = vector.extract_strided_slice %156 {offsets = [0, 0], sizes = [8, 1], strides = [1, 1]} : vector<8x9xf32> to vector<8x1xf32>
    %161 = vector.broadcast %160 : vector<8x1xf32> to vector<8x32xf32>
    %162 = arith.mulf %159, %161 : vector<8x32xf32>
    %163 = vector.extract_strided_slice %155 {offsets = [5, 0], sizes = [3, 32], strides = [1, 1]} : vector<8x32xf32> to vector<3x32xf32>
    %164 = vector.extract_strided_slice %155 {offsets = [0, 0], sizes = [5, 32], strides = [1, 1]} : vector<8x32xf32> to vector<5x32xf32>
    %165 = tpu.concatenate %163, %164 in 0 : vector<3x32xf32>, vector<5x32xf32> -> vector<8x32xf32>
    %166 = vector.extract_strided_slice %156 {offsets = [0, 1], sizes = [8, 1], strides = [1, 1]} : vector<8x9xf32> to vector<8x1xf32>
    %167 = vector.broadcast %166 : vector<8x1xf32> to vector<8x32xf32>
    %168 = arith.mulf %165, %167 : vector<8x32xf32>
    %169 = vector.extract_strided_slice %155 {offsets = [6, 0], sizes = [2, 32], strides = [1, 1]} : vector<8x32xf32> to vector<2x32xf32>
    %170 = vector.extract_strided_slice %155 {offsets = [0, 0], sizes = [6, 32], strides = [1, 1]} : vector<8x32xf32> to vector<6x32xf32>
    %171 = tpu.concatenate %169, %170 in 0 : vector<2x32xf32>, vector<6x32xf32> -> vector<8x32xf32>
    %172 = vector.extract_strided_slice %156 {offsets = [0, 2], sizes = [8, 1], strides = [1, 1]} : vector<8x9xf32> to vector<8x1xf32>
    %173 = vector.broadcast %172 : vector<8x1xf32> to vector<8x32xf32>
    %174 = arith.mulf %171, %173 : vector<8x32xf32>
    %175 = vector.extract_strided_slice %155 {offsets = [7, 0], sizes = [1, 32], strides = [1, 1]} : vector<8x32xf32> to vector<1x32xf32>
    %176 = vector.extract_strided_slice %155 {offsets = [0, 0], sizes = [7, 32], strides = [1, 1]} : vector<8x32xf32> to vector<7x32xf32>
    %177 = tpu.concatenate %175, %176 in 0 : vector<1x32xf32>, vector<7x32xf32> -> vector<8x32xf32>
    %178 = vector.extract_strided_slice %156 {offsets = [0, 3], sizes = [8, 1], strides = [1, 1]} : vector<8x9xf32> to vector<8x1xf32>
    %179 = vector.broadcast %178 : vector<8x1xf32> to vector<8x32xf32>
    %180 = arith.mulf %177, %179 : vector<8x32xf32>
    %181 = vector.extract_strided_slice %156 {offsets = [0, 4], sizes = [8, 1], strides = [1, 1]} : vector<8x9xf32> to vector<8x1xf32>
    %182 = vector.broadcast %181 : vector<8x1xf32> to vector<8x32xf32>
    %183 = arith.mulf %155, %182 : vector<8x32xf32>
    %184 = vector.extract_strided_slice %155 {offsets = [1, 0], sizes = [7, 32], strides = [1, 1]} : vector<8x32xf32> to vector<7x32xf32>
    %185 = vector.extract_strided_slice %155 {offsets = [0, 0], sizes = [1, 32], strides = [1, 1]} : vector<8x32xf32> to vector<1x32xf32>
    %186 = tpu.concatenate %184, %185 in 0 : vector<7x32xf32>, vector<1x32xf32> -> vector<8x32xf32>
    %187 = vector.extract_strided_slice %156 {offsets = [0, 5], sizes = [8, 1], strides = [1, 1]} : vector<8x9xf32> to vector<8x1xf32>
    %188 = vector.broadcast %187 : vector<8x1xf32> to vector<8x32xf32>
    %189 = arith.mulf %186, %188 : vector<8x32xf32>
    %190 = vector.extract_strided_slice %155 {offsets = [2, 0], sizes = [6, 32], strides = [1, 1]} : vector<8x32xf32> to vector<6x32xf32>
    %191 = vector.extract_strided_slice %155 {offsets = [0, 0], sizes = [2, 32], strides = [1, 1]} : vector<8x32xf32> to vector<2x32xf32>
    %192 = tpu.concatenate %190, %191 in 0 : vector<6x32xf32>, vector<2x32xf32> -> vector<8x32xf32>
    %193 = vector.extract_strided_slice %156 {offsets = [0, 6], sizes = [8, 1], strides = [1, 1]} : vector<8x9xf32> to vector<8x1xf32>
    %194 = vector.broadcast %193 : vector<8x1xf32> to vector<8x32xf32>
    %195 = arith.mulf %192, %194 : vector<8x32xf32>
    %196 = vector.extract_strided_slice %155 {offsets = [3, 0], sizes = [5, 32], strides = [1, 1]} : vector<8x32xf32> to vector<5x32xf32>
    %197 = vector.extract_strided_slice %155 {offsets = [0, 0], sizes = [3, 32], strides = [1, 1]} : vector<8x32xf32> to vector<3x32xf32>
    %198 = tpu.concatenate %196, %197 in 0 : vector<5x32xf32>, vector<3x32xf32> -> vector<8x32xf32>
    %199 = vector.extract_strided_slice %156 {offsets = [0, 7], sizes = [8, 1], strides = [1, 1]} : vector<8x9xf32> to vector<8x1xf32>
    %200 = vector.broadcast %199 : vector<8x1xf32> to vector<8x32xf32>
    %201 = arith.mulf %198, %200 : vector<8x32xf32>
    %202 = vector.extract_strided_slice %155 {offsets = [4, 0], sizes = [4, 32], strides = [1, 1]} : vector<8x32xf32> to vector<4x32xf32>
    %203 = vector.extract_strided_slice %155 {offsets = [0, 0], sizes = [4, 32], strides = [1, 1]} : vector<8x32xf32> to vector<4x32xf32>
    %204 = tpu.concatenate %202, %203 in 0 : vector<4x32xf32>, vector<4x32xf32> -> vector<8x32xf32>
    %205 = vector.extract_strided_slice %156 {offsets = [0, 8], sizes = [8, 1], strides = [1, 1]} : vector<8x9xf32> to vector<8x1xf32>
    %206 = vector.broadcast %205 : vector<8x1xf32> to vector<8x32xf32>
    %207 = arith.mulf %204, %206 : vector<8x32xf32>
    %208 = tpu.concatenate %162, %168, %174, %180, %183, %189, %195, %201, %207 in 1 : vector<8x32xf32>, vector<8x32xf32>, vector<8x32xf32>, vector<8x32xf32>, vector<8x32xf32>, vector<8x32xf32>, vector<8x32xf32>, vector<8x32xf32>, vector<8x32xf32> -> vector<8x288xf32>
    %c0_33 = arith.constant 0 : index
    %c0_34 = arith.constant 0 : index
    %209 = vector.load %arg7[%c0_33, %c0_34] : memref<288x32xf32, #tpu.memory_space<vmem>>, vector<288x32xf32>
    %cst_35 = arith.constant dense<0.000000e+00> : vector<8x32xf32>
    %210 = tpu.matmul %208, %209, %cst_35 {dimension_numbers = #tpu.dot_dimension_numbers<[1], [0], [0], [1], [0, 0, 1, 1], [], []>} : vector<8x288xf32>, vector<288x32xf32>, vector<8x32xf32> -> vector<8x32xf32>
    %c0_36 = arith.constant 0 : index
    %c0_37 = arith.constant 0 : index
    %211 = vector.load %arg8[%c0_36, %c0_37] : memref<1x32xf32, #tpu.memory_space<vmem>>, vector<1x32xf32>
    %212 = vector.broadcast %211 : vector<1x32xf32> to vector<8x32xf32>
    %213 = arith.addf %210, %212 : vector<8x32xf32>
    %c0_38 = arith.constant 0 : index
    %c0_39 = arith.constant 0 : index
    %214 = vector.load %arg14[%c0_38, %c0_39] : memref<8x8xf32, #tpu.memory_space<vmem>>, vector<8x8xf32>
    %cst_40 = arith.constant dense<0.000000e+00> : vector<8x32xf32>
    %215 = tpu.matmul %214, %213, %cst_40 {dimension_numbers = #tpu.dot_dimension_numbers<[1], [0], [0], [1], [0, 0, 1, 1], [], []>} : vector<8x8xf32>, vector<8x32xf32>, vector<8x32xf32> -> vector<8x32xf32>
    %c0_41 = arith.constant 0 : index
    %c0_42 = arith.constant 0 : index
    %c0_43 = arith.constant 0 : index
    %216 = vector.load %arg15[%c0_41, %c0_42, %c0_43] : memref<3x32x128xf32, #tpu.memory_space<vmem>>, vector<1x32x128xf32>
    %217 = vector.shape_cast %216 : vector<1x32x128xf32> to vector<32x128xf32>
    %cst_44 = arith.constant dense<0.000000e+00> : vector<8x128xf32>
    %218 = tpu.matmul %215, %217, %cst_44 {dimension_numbers = #tpu.dot_dimension_numbers<[1], [0], [0], [1], [0, 0, 1, 1], [], []>} : vector<8x32xf32>, vector<32x128xf32>, vector<8x128xf32> -> vector<8x128xf32>
    %c0_45 = arith.constant 0 : index
    %c0_46 = arith.constant 0 : index
    %c0_47 = arith.constant 0 : index
    %219 = vector.load %arg17[%c0_45, %c0_46, %c0_47] : memref<3x1x128xf32, #tpu.memory_space<vmem>>, vector<1x1x128xf32>
    %220 = vector.shape_cast %219 : vector<1x1x128xf32> to vector<1x128xf32>
    %221 = vector.broadcast %220 : vector<1x128xf32> to vector<8x128xf32>
    %222 = arith.addf %218, %221 : vector<8x128xf32>
    %c0_48 = arith.constant 0 : index
    %c0_49 = arith.constant 0 : index
    %c0_50 = arith.constant 0 : index
    %223 = vector.load %arg16[%c0_48, %c0_49, %c0_50] : memref<3x32x128xf32, #tpu.memory_space<vmem>>, vector<1x32x128xf32>
    %224 = vector.shape_cast %223 : vector<1x32x128xf32> to vector<32x128xf32>
    %cst_51 = arith.constant 0.000000e+00 : f32
    %225 = vector.broadcast %cst_51 : f32 to vector<2x32xf32>
    %cst_52 = arith.constant 0.000000e+00 : f32
    %226 = vector.broadcast %cst_52 : f32 to vector<2x32xf32>
    %227 = vector.extract_strided_slice %222 {offsets = [0, 0], sizes = [2, 128], strides = [1, 1]} : vector<8x128xf32> to vector<2x128xf32>
    %cst_53 = arith.constant dense<0.000000e+00> : vector<2x128xf32>
    %228 = tpu.matmul %225, %224, %cst_53 {dimension_numbers = #tpu.dot_dimension_numbers<[1], [0], [0], [1], [0, 0, 1, 1], [], []>} : vector<2x32xf32>, vector<32x128xf32>, vector<2x128xf32> -> vector<2x128xf32>
    %229 = arith.addf %227, %228 : vector<2x128xf32>
    %230 = vector.extract_strided_slice %229 {offsets = [0, 0], sizes = [2, 32], strides = [1, 1]} : vector<2x128xf32> to vector<2x32xf32>
    %231 = arith.negf %230 : vector<2x32xf32>
    %232 = math.exp %231 : vector<2x32xf32>
    %cst_54 = arith.constant 1.000000e+00 : f32
    %233 = vector.broadcast %cst_54 : f32 to vector<2x32xf32>
    %234 = arith.addf %233, %232 : vector<2x32xf32>
    %235 = arith.divf %233, %234 : vector<2x32xf32>
    %236 = vector.extract_strided_slice %229 {offsets = [0, 32], sizes = [2, 32], strides = [1, 1]} : vector<2x128xf32> to vector<2x32xf32>
    %237 = arith.negf %236 : vector<2x32xf32>
    %238 = math.exp %237 : vector<2x32xf32>
    %cst_55 = arith.constant 1.000000e+00 : f32
    %239 = vector.broadcast %cst_55 : f32 to vector<2x32xf32>
    %240 = arith.addf %239, %238 : vector<2x32xf32>
    %241 = arith.divf %239, %240 : vector<2x32xf32>
    %242 = vector.extract_strided_slice %229 {offsets = [0, 64], sizes = [2, 32], strides = [1, 1]} : vector<2x128xf32> to vector<2x32xf32>
    %243 = math.tanh %242 : vector<2x32xf32>
    %244 = vector.extract_strided_slice %229 {offsets = [0, 96], sizes = [2, 32], strides = [1, 1]} : vector<2x128xf32> to vector<2x32xf32>
    %245 = arith.negf %244 : vector<2x32xf32>
    %246 = math.exp %245 : vector<2x32xf32>
    %cst_56 = arith.constant 1.000000e+00 : f32
    %247 = vector.broadcast %cst_56 : f32 to vector<2x32xf32>
    %248 = arith.addf %247, %246 : vector<2x32xf32>
    %249 = arith.divf %247, %248 : vector<2x32xf32>
    %250 = arith.mulf %241, %226 : vector<2x32xf32>
    %251 = arith.mulf %235, %243 : vector<2x32xf32>
    %252 = arith.addf %250, %251 : vector<2x32xf32>
    %253 = math.tanh %252 : vector<2x32xf32>
    %254 = arith.mulf %249, %253 : vector<2x32xf32>
    %255 = vector.extract_strided_slice %222 {offsets = [2, 0], sizes = [2, 128], strides = [1, 1]} : vector<8x128xf32> to vector<2x128xf32>
    %cst_57 = arith.constant dense<0.000000e+00> : vector<2x128xf32>
    %256 = tpu.matmul %254, %224, %cst_57 {dimension_numbers = #tpu.dot_dimension_numbers<[1], [0], [0], [1], [0, 0, 1, 1], [], []>} : vector<2x32xf32>, vector<32x128xf32>, vector<2x128xf32> -> vector<2x128xf32>
    %257 = arith.addf %255, %256 : vector<2x128xf32>
    %258 = vector.extract_strided_slice %257 {offsets = [0, 0], sizes = [2, 32], strides = [1, 1]} : vector<2x128xf32> to vector<2x32xf32>
    %259 = arith.negf %258 : vector<2x32xf32>
    %260 = math.exp %259 : vector<2x32xf32>
    %cst_58 = arith.constant 1.000000e+00 : f32
    %261 = vector.broadcast %cst_58 : f32 to vector<2x32xf32>
    %262 = arith.addf %261, %260 : vector<2x32xf32>
    %263 = arith.divf %261, %262 : vector<2x32xf32>
    %264 = vector.extract_strided_slice %257 {offsets = [0, 32], sizes = [2, 32], strides = [1, 1]} : vector<2x128xf32> to vector<2x32xf32>
    %265 = arith.negf %264 : vector<2x32xf32>
    %266 = math.exp %265 : vector<2x32xf32>
    %cst_59 = arith.constant 1.000000e+00 : f32
    %267 = vector.broadcast %cst_59 : f32 to vector<2x32xf32>
    %268 = arith.addf %267, %266 : vector<2x32xf32>
    %269 = arith.divf %267, %268 : vector<2x32xf32>
    %270 = vector.extract_strided_slice %257 {offsets = [0, 64], sizes = [2, 32], strides = [1, 1]} : vector<2x128xf32> to vector<2x32xf32>
    %271 = math.tanh %270 : vector<2x32xf32>
    %272 = vector.extract_strided_slice %257 {offsets = [0, 96], sizes = [2, 32], strides = [1, 1]} : vector<2x128xf32> to vector<2x32xf32>
    %273 = arith.negf %272 : vector<2x32xf32>
    %274 = math.exp %273 : vector<2x32xf32>
    %cst_60 = arith.constant 1.000000e+00 : f32
    %275 = vector.broadcast %cst_60 : f32 to vector<2x32xf32>
    %276 = arith.addf %275, %274 : vector<2x32xf32>
    %277 = arith.divf %275, %276 : vector<2x32xf32>
    %278 = arith.mulf %269, %252 : vector<2x32xf32>
    %279 = arith.mulf %263, %271 : vector<2x32xf32>
    %280 = arith.addf %278, %279 : vector<2x32xf32>
    %281 = math.tanh %280 : vector<2x32xf32>
    %282 = arith.mulf %277, %281 : vector<2x32xf32>
    %283 = vector.extract_strided_slice %222 {offsets = [4, 0], sizes = [2, 128], strides = [1, 1]} : vector<8x128xf32> to vector<2x128xf32>
    %cst_61 = arith.constant dense<0.000000e+00> : vector<2x128xf32>
    %284 = tpu.matmul %282, %224, %cst_61 {dimension_numbers = #tpu.dot_dimension_numbers<[1], [0], [0], [1], [0, 0, 1, 1], [], []>} : vector<2x32xf32>, vector<32x128xf32>, vector<2x128xf32> -> vector<2x128xf32>
    %285 = arith.addf %283, %284 : vector<2x128xf32>
    %286 = vector.extract_strided_slice %285 {offsets = [0, 0], sizes = [2, 32], strides = [1, 1]} : vector<2x128xf32> to vector<2x32xf32>
    %287 = arith.negf %286 : vector<2x32xf32>
    %288 = math.exp %287 : vector<2x32xf32>
    %cst_62 = arith.constant 1.000000e+00 : f32
    %289 = vector.broadcast %cst_62 : f32 to vector<2x32xf32>
    %290 = arith.addf %289, %288 : vector<2x32xf32>
    %291 = arith.divf %289, %290 : vector<2x32xf32>
    %292 = vector.extract_strided_slice %285 {offsets = [0, 32], sizes = [2, 32], strides = [1, 1]} : vector<2x128xf32> to vector<2x32xf32>
    %293 = arith.negf %292 : vector<2x32xf32>
    %294 = math.exp %293 : vector<2x32xf32>
    %cst_63 = arith.constant 1.000000e+00 : f32
    %295 = vector.broadcast %cst_63 : f32 to vector<2x32xf32>
    %296 = arith.addf %295, %294 : vector<2x32xf32>
    %297 = arith.divf %295, %296 : vector<2x32xf32>
    %298 = vector.extract_strided_slice %285 {offsets = [0, 64], sizes = [2, 32], strides = [1, 1]} : vector<2x128xf32> to vector<2x32xf32>
    %299 = math.tanh %298 : vector<2x32xf32>
    %300 = vector.extract_strided_slice %285 {offsets = [0, 96], sizes = [2, 32], strides = [1, 1]} : vector<2x128xf32> to vector<2x32xf32>
    %301 = arith.negf %300 : vector<2x32xf32>
    %302 = math.exp %301 : vector<2x32xf32>
    %cst_64 = arith.constant 1.000000e+00 : f32
    %303 = vector.broadcast %cst_64 : f32 to vector<2x32xf32>
    %304 = arith.addf %303, %302 : vector<2x32xf32>
    %305 = arith.divf %303, %304 : vector<2x32xf32>
    %306 = arith.mulf %297, %280 : vector<2x32xf32>
    %307 = arith.mulf %291, %299 : vector<2x32xf32>
    %308 = arith.addf %306, %307 : vector<2x32xf32>
    %309 = math.tanh %308 : vector<2x32xf32>
    %310 = arith.mulf %305, %309 : vector<2x32xf32>
    %311 = vector.extract_strided_slice %222 {offsets = [6, 0], sizes = [2, 128], strides = [1, 1]} : vector<8x128xf32> to vector<2x128xf32>
    %cst_65 = arith.constant dense<0.000000e+00> : vector<2x128xf32>
    %312 = tpu.matmul %310, %224, %cst_65 {dimension_numbers = #tpu.dot_dimension_numbers<[1], [0], [0], [1], [0, 0, 1, 1], [], []>} : vector<2x32xf32>, vector<32x128xf32>, vector<2x128xf32> -> vector<2x128xf32>
    %313 = arith.addf %311, %312 : vector<2x128xf32>
    %314 = vector.extract_strided_slice %313 {offsets = [0, 0], sizes = [2, 32], strides = [1, 1]} : vector<2x128xf32> to vector<2x32xf32>
    %315 = arith.negf %314 : vector<2x32xf32>
    %316 = math.exp %315 : vector<2x32xf32>
    %cst_66 = arith.constant 1.000000e+00 : f32
    %317 = vector.broadcast %cst_66 : f32 to vector<2x32xf32>
    %318 = arith.addf %317, %316 : vector<2x32xf32>
    %319 = arith.divf %317, %318 : vector<2x32xf32>
    %320 = vector.extract_strided_slice %313 {offsets = [0, 32], sizes = [2, 32], strides = [1, 1]} : vector<2x128xf32> to vector<2x32xf32>
    %321 = arith.negf %320 : vector<2x32xf32>
    %322 = math.exp %321 : vector<2x32xf32>
    %cst_67 = arith.constant 1.000000e+00 : f32
    %323 = vector.broadcast %cst_67 : f32 to vector<2x32xf32>
    %324 = arith.addf %323, %322 : vector<2x32xf32>
    %325 = arith.divf %323, %324 : vector<2x32xf32>
    %326 = vector.extract_strided_slice %313 {offsets = [0, 64], sizes = [2, 32], strides = [1, 1]} : vector<2x128xf32> to vector<2x32xf32>
    %327 = math.tanh %326 : vector<2x32xf32>
    %328 = vector.extract_strided_slice %313 {offsets = [0, 96], sizes = [2, 32], strides = [1, 1]} : vector<2x128xf32> to vector<2x32xf32>
    %329 = arith.negf %328 : vector<2x32xf32>
    %330 = math.exp %329 : vector<2x32xf32>
    %cst_68 = arith.constant 1.000000e+00 : f32
    %331 = vector.broadcast %cst_68 : f32 to vector<2x32xf32>
    %332 = arith.addf %331, %330 : vector<2x32xf32>
    %333 = arith.divf %331, %332 : vector<2x32xf32>
    %334 = arith.mulf %325, %308 : vector<2x32xf32>
    %335 = arith.mulf %319, %327 : vector<2x32xf32>
    %336 = arith.addf %334, %335 : vector<2x32xf32>
    %337 = math.tanh %336 : vector<2x32xf32>
    %338 = arith.mulf %333, %337 : vector<2x32xf32>
    %339 = tpu.concatenate %254, %282, %310, %338 in 0 : vector<2x32xf32>, vector<2x32xf32>, vector<2x32xf32>, vector<2x32xf32> -> vector<8x32xf32>
    %c1 = arith.constant 1 : index
    %c0_69 = arith.constant 0 : index
    %c0_70 = arith.constant 0 : index
    %340 = vector.load %arg15[%c1, %c0_69, %c0_70] : memref<3x32x128xf32, #tpu.memory_space<vmem>>, vector<1x32x128xf32>
    %341 = vector.shape_cast %340 : vector<1x32x128xf32> to vector<32x128xf32>
    %cst_71 = arith.constant dense<0.000000e+00> : vector<8x128xf32>
    %342 = tpu.matmul %339, %341, %cst_71 {dimension_numbers = #tpu.dot_dimension_numbers<[1], [0], [0], [1], [0, 0, 1, 1], [], []>} : vector<8x32xf32>, vector<32x128xf32>, vector<8x128xf32> -> vector<8x128xf32>
    %c1_72 = arith.constant 1 : index
    %c0_73 = arith.constant 0 : index
    %c0_74 = arith.constant 0 : index
    %343 = vector.load %arg17[%c1_72, %c0_73, %c0_74] : memref<3x1x128xf32, #tpu.memory_space<vmem>>, vector<1x1x128xf32>
    %344 = vector.shape_cast %343 : vector<1x1x128xf32> to vector<1x128xf32>
    %345 = vector.broadcast %344 : vector<1x128xf32> to vector<8x128xf32>
    %346 = arith.addf %342, %345 : vector<8x128xf32>
    %c1_75 = arith.constant 1 : index
    %c0_76 = arith.constant 0 : index
    %c0_77 = arith.constant 0 : index
    %347 = vector.load %arg16[%c1_75, %c0_76, %c0_77] : memref<3x32x128xf32, #tpu.memory_space<vmem>>, vector<1x32x128xf32>
    %348 = vector.shape_cast %347 : vector<1x32x128xf32> to vector<32x128xf32>
    %cst_78 = arith.constant 0.000000e+00 : f32
    %349 = vector.broadcast %cst_78 : f32 to vector<2x32xf32>
    %cst_79 = arith.constant 0.000000e+00 : f32
    %350 = vector.broadcast %cst_79 : f32 to vector<2x32xf32>
    %351 = vector.extract_strided_slice %346 {offsets = [0, 0], sizes = [2, 128], strides = [1, 1]} : vector<8x128xf32> to vector<2x128xf32>
    %cst_80 = arith.constant dense<0.000000e+00> : vector<2x128xf32>
    %352 = tpu.matmul %349, %348, %cst_80 {dimension_numbers = #tpu.dot_dimension_numbers<[1], [0], [0], [1], [0, 0, 1, 1], [], []>} : vector<2x32xf32>, vector<32x128xf32>, vector<2x128xf32> -> vector<2x128xf32>
    %353 = arith.addf %351, %352 : vector<2x128xf32>
    %354 = vector.extract_strided_slice %353 {offsets = [0, 0], sizes = [2, 32], strides = [1, 1]} : vector<2x128xf32> to vector<2x32xf32>
    %355 = arith.negf %354 : vector<2x32xf32>
    %356 = math.exp %355 : vector<2x32xf32>
    %cst_81 = arith.constant 1.000000e+00 : f32
    %357 = vector.broadcast %cst_81 : f32 to vector<2x32xf32>
    %358 = arith.addf %357, %356 : vector<2x32xf32>
    %359 = arith.divf %357, %358 : vector<2x32xf32>
    %360 = vector.extract_strided_slice %353 {offsets = [0, 32], sizes = [2, 32], strides = [1, 1]} : vector<2x128xf32> to vector<2x32xf32>
    %361 = arith.negf %360 : vector<2x32xf32>
    %362 = math.exp %361 : vector<2x32xf32>
    %cst_82 = arith.constant 1.000000e+00 : f32
    %363 = vector.broadcast %cst_82 : f32 to vector<2x32xf32>
    %364 = arith.addf %363, %362 : vector<2x32xf32>
    %365 = arith.divf %363, %364 : vector<2x32xf32>
    %366 = vector.extract_strided_slice %353 {offsets = [0, 64], sizes = [2, 32], strides = [1, 1]} : vector<2x128xf32> to vector<2x32xf32>
    %367 = math.tanh %366 : vector<2x32xf32>
    %368 = vector.extract_strided_slice %353 {offsets = [0, 96], sizes = [2, 32], strides = [1, 1]} : vector<2x128xf32> to vector<2x32xf32>
    %369 = arith.negf %368 : vector<2x32xf32>
    %370 = math.exp %369 : vector<2x32xf32>
    %cst_83 = arith.constant 1.000000e+00 : f32
    %371 = vector.broadcast %cst_83 : f32 to vector<2x32xf32>
    %372 = arith.addf %371, %370 : vector<2x32xf32>
    %373 = arith.divf %371, %372 : vector<2x32xf32>
    %374 = arith.mulf %365, %350 : vector<2x32xf32>
    %375 = arith.mulf %359, %367 : vector<2x32xf32>
    %376 = arith.addf %374, %375 : vector<2x32xf32>
    %377 = math.tanh %376 : vector<2x32xf32>
    %378 = arith.mulf %373, %377 : vector<2x32xf32>
    %379 = vector.extract_strided_slice %346 {offsets = [2, 0], sizes = [2, 128], strides = [1, 1]} : vector<8x128xf32> to vector<2x128xf32>
    %cst_84 = arith.constant dense<0.000000e+00> : vector<2x128xf32>
    %380 = tpu.matmul %378, %348, %cst_84 {dimension_numbers = #tpu.dot_dimension_numbers<[1], [0], [0], [1], [0, 0, 1, 1], [], []>} : vector<2x32xf32>, vector<32x128xf32>, vector<2x128xf32> -> vector<2x128xf32>
    %381 = arith.addf %379, %380 : vector<2x128xf32>
    %382 = vector.extract_strided_slice %381 {offsets = [0, 0], sizes = [2, 32], strides = [1, 1]} : vector<2x128xf32> to vector<2x32xf32>
    %383 = arith.negf %382 : vector<2x32xf32>
    %384 = math.exp %383 : vector<2x32xf32>
    %cst_85 = arith.constant 1.000000e+00 : f32
    %385 = vector.broadcast %cst_85 : f32 to vector<2x32xf32>
    %386 = arith.addf %385, %384 : vector<2x32xf32>
    %387 = arith.divf %385, %386 : vector<2x32xf32>
    %388 = vector.extract_strided_slice %381 {offsets = [0, 32], sizes = [2, 32], strides = [1, 1]} : vector<2x128xf32> to vector<2x32xf32>
    %389 = arith.negf %388 : vector<2x32xf32>
    %390 = math.exp %389 : vector<2x32xf32>
    %cst_86 = arith.constant 1.000000e+00 : f32
    %391 = vector.broadcast %cst_86 : f32 to vector<2x32xf32>
    %392 = arith.addf %391, %390 : vector<2x32xf32>
    %393 = arith.divf %391, %392 : vector<2x32xf32>
    %394 = vector.extract_strided_slice %381 {offsets = [0, 64], sizes = [2, 32], strides = [1, 1]} : vector<2x128xf32> to vector<2x32xf32>
    %395 = math.tanh %394 : vector<2x32xf32>
    %396 = vector.extract_strided_slice %381 {offsets = [0, 96], sizes = [2, 32], strides = [1, 1]} : vector<2x128xf32> to vector<2x32xf32>
    %397 = arith.negf %396 : vector<2x32xf32>
    %398 = math.exp %397 : vector<2x32xf32>
    %cst_87 = arith.constant 1.000000e+00 : f32
    %399 = vector.broadcast %cst_87 : f32 to vector<2x32xf32>
    %400 = arith.addf %399, %398 : vector<2x32xf32>
    %401 = arith.divf %399, %400 : vector<2x32xf32>
    %402 = arith.mulf %393, %376 : vector<2x32xf32>
    %403 = arith.mulf %387, %395 : vector<2x32xf32>
    %404 = arith.addf %402, %403 : vector<2x32xf32>
    %405 = math.tanh %404 : vector<2x32xf32>
    %406 = arith.mulf %401, %405 : vector<2x32xf32>
    %407 = vector.extract_strided_slice %346 {offsets = [4, 0], sizes = [2, 128], strides = [1, 1]} : vector<8x128xf32> to vector<2x128xf32>
    %cst_88 = arith.constant dense<0.000000e+00> : vector<2x128xf32>
    %408 = tpu.matmul %406, %348, %cst_88 {dimension_numbers = #tpu.dot_dimension_numbers<[1], [0], [0], [1], [0, 0, 1, 1], [], []>} : vector<2x32xf32>, vector<32x128xf32>, vector<2x128xf32> -> vector<2x128xf32>
    %409 = arith.addf %407, %408 : vector<2x128xf32>
    %410 = vector.extract_strided_slice %409 {offsets = [0, 0], sizes = [2, 32], strides = [1, 1]} : vector<2x128xf32> to vector<2x32xf32>
    %411 = arith.negf %410 : vector<2x32xf32>
    %412 = math.exp %411 : vector<2x32xf32>
    %cst_89 = arith.constant 1.000000e+00 : f32
    %413 = vector.broadcast %cst_89 : f32 to vector<2x32xf32>
    %414 = arith.addf %413, %412 : vector<2x32xf32>
    %415 = arith.divf %413, %414 : vector<2x32xf32>
    %416 = vector.extract_strided_slice %409 {offsets = [0, 32], sizes = [2, 32], strides = [1, 1]} : vector<2x128xf32> to vector<2x32xf32>
    %417 = arith.negf %416 : vector<2x32xf32>
    %418 = math.exp %417 : vector<2x32xf32>
    %cst_90 = arith.constant 1.000000e+00 : f32
    %419 = vector.broadcast %cst_90 : f32 to vector<2x32xf32>
    %420 = arith.addf %419, %418 : vector<2x32xf32>
    %421 = arith.divf %419, %420 : vector<2x32xf32>
    %422 = vector.extract_strided_slice %409 {offsets = [0, 64], sizes = [2, 32], strides = [1, 1]} : vector<2x128xf32> to vector<2x32xf32>
    %423 = math.tanh %422 : vector<2x32xf32>
    %424 = vector.extract_strided_slice %409 {offsets = [0, 96], sizes = [2, 32], strides = [1, 1]} : vector<2x128xf32> to vector<2x32xf32>
    %425 = arith.negf %424 : vector<2x32xf32>
    %426 = math.exp %425 : vector<2x32xf32>
    %cst_91 = arith.constant 1.000000e+00 : f32
    %427 = vector.broadcast %cst_91 : f32 to vector<2x32xf32>
    %428 = arith.addf %427, %426 : vector<2x32xf32>
    %429 = arith.divf %427, %428 : vector<2x32xf32>
    %430 = arith.mulf %421, %404 : vector<2x32xf32>
    %431 = arith.mulf %415, %423 : vector<2x32xf32>
    %432 = arith.addf %430, %431 : vector<2x32xf32>
    %433 = math.tanh %432 : vector<2x32xf32>
    %434 = arith.mulf %429, %433 : vector<2x32xf32>
    %435 = vector.extract_strided_slice %346 {offsets = [6, 0], sizes = [2, 128], strides = [1, 1]} : vector<8x128xf32> to vector<2x128xf32>
    %cst_92 = arith.constant dense<0.000000e+00> : vector<2x128xf32>
    %436 = tpu.matmul %434, %348, %cst_92 {dimension_numbers = #tpu.dot_dimension_numbers<[1], [0], [0], [1], [0, 0, 1, 1], [], []>} : vector<2x32xf32>, vector<32x128xf32>, vector<2x128xf32> -> vector<2x128xf32>
    %437 = arith.addf %435, %436 : vector<2x128xf32>
    %438 = vector.extract_strided_slice %437 {offsets = [0, 0], sizes = [2, 32], strides = [1, 1]} : vector<2x128xf32> to vector<2x32xf32>
    %439 = arith.negf %438 : vector<2x32xf32>
    %440 = math.exp %439 : vector<2x32xf32>
    %cst_93 = arith.constant 1.000000e+00 : f32
    %441 = vector.broadcast %cst_93 : f32 to vector<2x32xf32>
    %442 = arith.addf %441, %440 : vector<2x32xf32>
    %443 = arith.divf %441, %442 : vector<2x32xf32>
    %444 = vector.extract_strided_slice %437 {offsets = [0, 32], sizes = [2, 32], strides = [1, 1]} : vector<2x128xf32> to vector<2x32xf32>
    %445 = arith.negf %444 : vector<2x32xf32>
    %446 = math.exp %445 : vector<2x32xf32>
    %cst_94 = arith.constant 1.000000e+00 : f32
    %447 = vector.broadcast %cst_94 : f32 to vector<2x32xf32>
    %448 = arith.addf %447, %446 : vector<2x32xf32>
    %449 = arith.divf %447, %448 : vector<2x32xf32>
    %450 = vector.extract_strided_slice %437 {offsets = [0, 64], sizes = [2, 32], strides = [1, 1]} : vector<2x128xf32> to vector<2x32xf32>
    %451 = math.tanh %450 : vector<2x32xf32>
    %452 = vector.extract_strided_slice %437 {offsets = [0, 96], sizes = [2, 32], strides = [1, 1]} : vector<2x128xf32> to vector<2x32xf32>
    %453 = arith.negf %452 : vector<2x32xf32>
    %454 = math.exp %453 : vector<2x32xf32>
    %cst_95 = arith.constant 1.000000e+00 : f32
    %455 = vector.broadcast %cst_95 : f32 to vector<2x32xf32>
    %456 = arith.addf %455, %454 : vector<2x32xf32>
    %457 = arith.divf %455, %456 : vector<2x32xf32>
    %458 = arith.mulf %449, %432 : vector<2x32xf32>
    %459 = arith.mulf %443, %451 : vector<2x32xf32>
    %460 = arith.addf %458, %459 : vector<2x32xf32>
    %461 = math.tanh %460 : vector<2x32xf32>
    %462 = arith.mulf %457, %461 : vector<2x32xf32>
    %463 = tpu.concatenate %378, %406, %434, %462 in 0 : vector<2x32xf32>, vector<2x32xf32>, vector<2x32xf32>, vector<2x32xf32> -> vector<8x32xf32>
    %c2 = arith.constant 2 : index
    %c0_96 = arith.constant 0 : index
    %c0_97 = arith.constant 0 : index
    %464 = vector.load %arg15[%c2, %c0_96, %c0_97] : memref<3x32x128xf32, #tpu.memory_space<vmem>>, vector<1x32x128xf32>
    %465 = vector.shape_cast %464 : vector<1x32x128xf32> to vector<32x128xf32>
    %cst_98 = arith.constant dense<0.000000e+00> : vector<8x128xf32>
    %466 = tpu.matmul %463, %465, %cst_98 {dimension_numbers = #tpu.dot_dimension_numbers<[1], [0], [0], [1], [0, 0, 1, 1], [], []>} : vector<8x32xf32>, vector<32x128xf32>, vector<8x128xf32> -> vector<8x128xf32>
    %c2_99 = arith.constant 2 : index
    %c0_100 = arith.constant 0 : index
    %c0_101 = arith.constant 0 : index
    %467 = vector.load %arg17[%c2_99, %c0_100, %c0_101] : memref<3x1x128xf32, #tpu.memory_space<vmem>>, vector<1x1x128xf32>
    %468 = vector.shape_cast %467 : vector<1x1x128xf32> to vector<1x128xf32>
    %469 = vector.broadcast %468 : vector<1x128xf32> to vector<8x128xf32>
    %470 = arith.addf %466, %469 : vector<8x128xf32>
    %c2_102 = arith.constant 2 : index
    %c0_103 = arith.constant 0 : index
    %c0_104 = arith.constant 0 : index
    %471 = vector.load %arg16[%c2_102, %c0_103, %c0_104] : memref<3x32x128xf32, #tpu.memory_space<vmem>>, vector<1x32x128xf32>
    %472 = vector.shape_cast %471 : vector<1x32x128xf32> to vector<32x128xf32>
    %cst_105 = arith.constant 0.000000e+00 : f32
    %473 = vector.broadcast %cst_105 : f32 to vector<2x32xf32>
    %cst_106 = arith.constant 0.000000e+00 : f32
    %474 = vector.broadcast %cst_106 : f32 to vector<2x32xf32>
    %475 = vector.extract_strided_slice %470 {offsets = [0, 0], sizes = [2, 128], strides = [1, 1]} : vector<8x128xf32> to vector<2x128xf32>
    %cst_107 = arith.constant dense<0.000000e+00> : vector<2x128xf32>
    %476 = tpu.matmul %473, %472, %cst_107 {dimension_numbers = #tpu.dot_dimension_numbers<[1], [0], [0], [1], [0, 0, 1, 1], [], []>} : vector<2x32xf32>, vector<32x128xf32>, vector<2x128xf32> -> vector<2x128xf32>
    %477 = arith.addf %475, %476 : vector<2x128xf32>
    %478 = vector.extract_strided_slice %477 {offsets = [0, 0], sizes = [2, 32], strides = [1, 1]} : vector<2x128xf32> to vector<2x32xf32>
    %479 = arith.negf %478 : vector<2x32xf32>
    %480 = math.exp %479 : vector<2x32xf32>
    %cst_108 = arith.constant 1.000000e+00 : f32
    %481 = vector.broadcast %cst_108 : f32 to vector<2x32xf32>
    %482 = arith.addf %481, %480 : vector<2x32xf32>
    %483 = arith.divf %481, %482 : vector<2x32xf32>
    %484 = vector.extract_strided_slice %477 {offsets = [0, 32], sizes = [2, 32], strides = [1, 1]} : vector<2x128xf32> to vector<2x32xf32>
    %485 = arith.negf %484 : vector<2x32xf32>
    %486 = math.exp %485 : vector<2x32xf32>
    %cst_109 = arith.constant 1.000000e+00 : f32
    %487 = vector.broadcast %cst_109 : f32 to vector<2x32xf32>
    %488 = arith.addf %487, %486 : vector<2x32xf32>
    %489 = arith.divf %487, %488 : vector<2x32xf32>
    %490 = vector.extract_strided_slice %477 {offsets = [0, 64], sizes = [2, 32], strides = [1, 1]} : vector<2x128xf32> to vector<2x32xf32>
    %491 = math.tanh %490 : vector<2x32xf32>
    %492 = vector.extract_strided_slice %477 {offsets = [0, 96], sizes = [2, 32], strides = [1, 1]} : vector<2x128xf32> to vector<2x32xf32>
    %493 = arith.negf %492 : vector<2x32xf32>
    %494 = math.exp %493 : vector<2x32xf32>
    %cst_110 = arith.constant 1.000000e+00 : f32
    %495 = vector.broadcast %cst_110 : f32 to vector<2x32xf32>
    %496 = arith.addf %495, %494 : vector<2x32xf32>
    %497 = arith.divf %495, %496 : vector<2x32xf32>
    %498 = arith.mulf %489, %474 : vector<2x32xf32>
    %499 = arith.mulf %483, %491 : vector<2x32xf32>
    %500 = arith.addf %498, %499 : vector<2x32xf32>
    %501 = math.tanh %500 : vector<2x32xf32>
    %502 = arith.mulf %497, %501 : vector<2x32xf32>
    %503 = vector.extract_strided_slice %470 {offsets = [2, 0], sizes = [2, 128], strides = [1, 1]} : vector<8x128xf32> to vector<2x128xf32>
    %cst_111 = arith.constant dense<0.000000e+00> : vector<2x128xf32>
    %504 = tpu.matmul %502, %472, %cst_111 {dimension_numbers = #tpu.dot_dimension_numbers<[1], [0], [0], [1], [0, 0, 1, 1], [], []>} : vector<2x32xf32>, vector<32x128xf32>, vector<2x128xf32> -> vector<2x128xf32>
    %505 = arith.addf %503, %504 : vector<2x128xf32>
    %506 = vector.extract_strided_slice %505 {offsets = [0, 0], sizes = [2, 32], strides = [1, 1]} : vector<2x128xf32> to vector<2x32xf32>
    %507 = arith.negf %506 : vector<2x32xf32>
    %508 = math.exp %507 : vector<2x32xf32>
    %cst_112 = arith.constant 1.000000e+00 : f32
    %509 = vector.broadcast %cst_112 : f32 to vector<2x32xf32>
    %510 = arith.addf %509, %508 : vector<2x32xf32>
    %511 = arith.divf %509, %510 : vector<2x32xf32>
    %512 = vector.extract_strided_slice %505 {offsets = [0, 32], sizes = [2, 32], strides = [1, 1]} : vector<2x128xf32> to vector<2x32xf32>
    %513 = arith.negf %512 : vector<2x32xf32>
    %514 = math.exp %513 : vector<2x32xf32>
    %cst_113 = arith.constant 1.000000e+00 : f32
    %515 = vector.broadcast %cst_113 : f32 to vector<2x32xf32>
    %516 = arith.addf %515, %514 : vector<2x32xf32>
    %517 = arith.divf %515, %516 : vector<2x32xf32>
    %518 = vector.extract_strided_slice %505 {offsets = [0, 64], sizes = [2, 32], strides = [1, 1]} : vector<2x128xf32> to vector<2x32xf32>
    %519 = math.tanh %518 : vector<2x32xf32>
    %520 = vector.extract_strided_slice %505 {offsets = [0, 96], sizes = [2, 32], strides = [1, 1]} : vector<2x128xf32> to vector<2x32xf32>
    %521 = arith.negf %520 : vector<2x32xf32>
    %522 = math.exp %521 : vector<2x32xf32>
    %cst_114 = arith.constant 1.000000e+00 : f32
    %523 = vector.broadcast %cst_114 : f32 to vector<2x32xf32>
    %524 = arith.addf %523, %522 : vector<2x32xf32>
    %525 = arith.divf %523, %524 : vector<2x32xf32>
    %526 = arith.mulf %517, %500 : vector<2x32xf32>
    %527 = arith.mulf %511, %519 : vector<2x32xf32>
    %528 = arith.addf %526, %527 : vector<2x32xf32>
    %529 = math.tanh %528 : vector<2x32xf32>
    %530 = arith.mulf %525, %529 : vector<2x32xf32>
    %531 = vector.extract_strided_slice %470 {offsets = [4, 0], sizes = [2, 128], strides = [1, 1]} : vector<8x128xf32> to vector<2x128xf32>
    %cst_115 = arith.constant dense<0.000000e+00> : vector<2x128xf32>
    %532 = tpu.matmul %530, %472, %cst_115 {dimension_numbers = #tpu.dot_dimension_numbers<[1], [0], [0], [1], [0, 0, 1, 1], [], []>} : vector<2x32xf32>, vector<32x128xf32>, vector<2x128xf32> -> vector<2x128xf32>
    %533 = arith.addf %531, %532 : vector<2x128xf32>
    %534 = vector.extract_strided_slice %533 {offsets = [0, 0], sizes = [2, 32], strides = [1, 1]} : vector<2x128xf32> to vector<2x32xf32>
    %535 = arith.negf %534 : vector<2x32xf32>
    %536 = math.exp %535 : vector<2x32xf32>
    %cst_116 = arith.constant 1.000000e+00 : f32
    %537 = vector.broadcast %cst_116 : f32 to vector<2x32xf32>
    %538 = arith.addf %537, %536 : vector<2x32xf32>
    %539 = arith.divf %537, %538 : vector<2x32xf32>
    %540 = vector.extract_strided_slice %533 {offsets = [0, 32], sizes = [2, 32], strides = [1, 1]} : vector<2x128xf32> to vector<2x32xf32>
    %541 = arith.negf %540 : vector<2x32xf32>
    %542 = math.exp %541 : vector<2x32xf32>
    %cst_117 = arith.constant 1.000000e+00 : f32
    %543 = vector.broadcast %cst_117 : f32 to vector<2x32xf32>
    %544 = arith.addf %543, %542 : vector<2x32xf32>
    %545 = arith.divf %543, %544 : vector<2x32xf32>
    %546 = vector.extract_strided_slice %533 {offsets = [0, 64], sizes = [2, 32], strides = [1, 1]} : vector<2x128xf32> to vector<2x32xf32>
    %547 = math.tanh %546 : vector<2x32xf32>
    %548 = vector.extract_strided_slice %533 {offsets = [0, 96], sizes = [2, 32], strides = [1, 1]} : vector<2x128xf32> to vector<2x32xf32>
    %549 = arith.negf %548 : vector<2x32xf32>
    %550 = math.exp %549 : vector<2x32xf32>
    %cst_118 = arith.constant 1.000000e+00 : f32
    %551 = vector.broadcast %cst_118 : f32 to vector<2x32xf32>
    %552 = arith.addf %551, %550 : vector<2x32xf32>
    %553 = arith.divf %551, %552 : vector<2x32xf32>
    %554 = arith.mulf %545, %528 : vector<2x32xf32>
    %555 = arith.mulf %539, %547 : vector<2x32xf32>
    %556 = arith.addf %554, %555 : vector<2x32xf32>
    %557 = math.tanh %556 : vector<2x32xf32>
    %558 = arith.mulf %553, %557 : vector<2x32xf32>
    %559 = vector.extract_strided_slice %470 {offsets = [6, 0], sizes = [2, 128], strides = [1, 1]} : vector<8x128xf32> to vector<2x128xf32>
    %cst_119 = arith.constant dense<0.000000e+00> : vector<2x128xf32>
    %560 = tpu.matmul %558, %472, %cst_119 {dimension_numbers = #tpu.dot_dimension_numbers<[1], [0], [0], [1], [0, 0, 1, 1], [], []>} : vector<2x32xf32>, vector<32x128xf32>, vector<2x128xf32> -> vector<2x128xf32>
    %561 = arith.addf %559, %560 : vector<2x128xf32>
    %562 = vector.extract_strided_slice %561 {offsets = [0, 0], sizes = [2, 32], strides = [1, 1]} : vector<2x128xf32> to vector<2x32xf32>
    %563 = arith.negf %562 : vector<2x32xf32>
    %564 = math.exp %563 : vector<2x32xf32>
    %cst_120 = arith.constant 1.000000e+00 : f32
    %565 = vector.broadcast %cst_120 : f32 to vector<2x32xf32>
    %566 = arith.addf %565, %564 : vector<2x32xf32>
    %567 = arith.divf %565, %566 : vector<2x32xf32>
    %568 = vector.extract_strided_slice %561 {offsets = [0, 32], sizes = [2, 32], strides = [1, 1]} : vector<2x128xf32> to vector<2x32xf32>
    %569 = arith.negf %568 : vector<2x32xf32>
    %570 = math.exp %569 : vector<2x32xf32>
    %cst_121 = arith.constant 1.000000e+00 : f32
    %571 = vector.broadcast %cst_121 : f32 to vector<2x32xf32>
    %572 = arith.addf %571, %570 : vector<2x32xf32>
    %573 = arith.divf %571, %572 : vector<2x32xf32>
    %574 = vector.extract_strided_slice %561 {offsets = [0, 64], sizes = [2, 32], strides = [1, 1]} : vector<2x128xf32> to vector<2x32xf32>
    %575 = math.tanh %574 : vector<2x32xf32>
    %576 = vector.extract_strided_slice %561 {offsets = [0, 96], sizes = [2, 32], strides = [1, 1]} : vector<2x128xf32> to vector<2x32xf32>
    %577 = arith.negf %576 : vector<2x32xf32>
    %578 = math.exp %577 : vector<2x32xf32>
    %cst_122 = arith.constant 1.000000e+00 : f32
    %579 = vector.broadcast %cst_122 : f32 to vector<2x32xf32>
    %580 = arith.addf %579, %578 : vector<2x32xf32>
    %581 = arith.divf %579, %580 : vector<2x32xf32>
    %582 = arith.mulf %573, %556 : vector<2x32xf32>
    %583 = arith.mulf %567, %575 : vector<2x32xf32>
    %584 = arith.addf %582, %583 : vector<2x32xf32>
    %585 = math.tanh %584 : vector<2x32xf32>
    %586 = arith.mulf %581, %585 : vector<2x32xf32>
    %c0_123 = arith.constant 0 : index
    %c0_124 = arith.constant 0 : index
    %587 = vector.load %arg18[%c0_123, %c0_124] : memref<32x5xf32, #tpu.memory_space<vmem>>, vector<32x5xf32>
    %cst_125 = arith.constant dense<0.000000e+00> : vector<2x5xf32>
    %588 = tpu.matmul %586, %587, %cst_125 {dimension_numbers = #tpu.dot_dimension_numbers<[1], [0], [0], [1], [0, 0, 1, 1], [], []>} : vector<2x32xf32>, vector<32x5xf32>, vector<2x5xf32> -> vector<2x5xf32>
    %c0_126 = arith.constant 0 : index
    %c0_127 = arith.constant 0 : index
    %589 = vector.load %arg19[%c0_126, %c0_127] : memref<1x5xf32, #tpu.memory_space<vmem>>, vector<1x5xf32>
    %590 = vector.broadcast %589 : vector<1x5xf32> to vector<2x5xf32>
    %591 = arith.addf %588, %590 : vector<2x5xf32>
    %c0_128 = arith.constant 0 : index
    %c0_129 = arith.constant 0 : index
    %592 = vector.load %arg20[%c0_128, %c0_129] : memref<2x5xf32, #tpu.memory_space<vmem>>, vector<2x5xf32>
    tpu.vector_store %arg20[%c0_128, %c0_129], %591 {strides = array<i32>} : memref<2x5xf32, #tpu.memory_space<vmem>>, vector<2x5xf32>,
    return
  }
}

</mosaic_0001>

<bundles_post_ra>
// kernel: lstm_conv_forward.1
= control target key start
LH: loop header
LB: loop body
LE: loop exit
PB: predicated region body
PF: predicated region fallthrough
CT: control target
= control target key end

     0   :  { %s5271_s0 = inlined_call_operand.vmem [shape: f32[32,4], index: 0, kind: input, shape index: {}]   ;;  %s5272_s1 = inlined_call_operand.vmem [shape: f32[1,4], index: 1, kind: input, shape index: {}]   ;;  %s5273_s2 = inlined_call_operand.vmem [shape: f32[1,4], index: 2, kind: input, shape index: {}]   ;;  %s5274_s3 = inlined_call_operand.vmem [shape: f32[36,32], index: 3, kind: input, shape index: {}]   ;;  %s5275_s4 = inlined_call_operand.vmem [shape: f32[1,32], index: 4, kind: input, shape index: {}]   ;;  %s5276_s5 = inlined_call_operand.vmem [shape: f32[288,32], index: 5, kind: input, shape index: {}]   ;;  %s5277_s6 = inlined_call_operand.vmem [shape: f32[1,32], index: 6, kind: input, shape index: {}]   ;;  %s5278_s7 = inlined_call_operand.vmem [shape: f32[288,32], index: 7, kind: input, shape index: {}]   ;;  %s5279_s8 = inlined_call_operand.vmem [shape: f32[1,32], index: 8, kind: input, shape index: {}]   ;;  %s5280_s9 = inlined_call_operand.vmem [shape: f32[32,9], index: 9, kind: input, shape index: {}]   ;;  %s5281_s10 = inlined_call_operand.vmem [shape: f32[16,9], index: 10, kind: input, shape index: {}]   ;;  %s5282_s11 = inlined_call_operand.vmem [shape: f32[8,9], index: 11, kind: input, shape index: {}]   ;;  %s5283_s12 = inlined_call_operand.vmem [shape: f32[16,32], index: 12, kind: input, shape index: {}]   ;;  %s5284_s13 = inlined_call_operand.vmem [shape: f32[8,16], index: 13, kind: input, shape index: {}]   ;;  %s5285_s14 = inlined_call_operand.vmem [shape: f32[8,8], index: 14, kind: input, shape index: {}]   ;;  %s5286_s15 = inlined_call_operand.vmem [shape: f32[3,32,128], index: 15, kind: input, shape index: {}]   ;;  %s5287_s16 = inlined_call_operand.vmem [shape: f32[3,32,128], index: 16, kind: input, shape index: {}]   ;;  %s5288_s17 = inlined_call_operand.vmem [shape: f32[3,1,128], index: 17, kind: input, shape index: {}]   ;;  %s5289_s18 = inlined_call_operand.vmem [shape: f32[32,5], index: 18, kind: input, shape index: {}]   ;;  %s5290_s19 = inlined_call_operand.vmem [shape: f32[1,5], index: 19, kind: input, shape index: {}]   ;;  %s5291_s20 = inlined_call_operand.hbm [shape: f32[2,5], index: 20, kind: output, shape index: {}]  }
   0x1   :  { %5294 = sst [smem:[#allocation5_spill]] %s5271_s0 }
   0x2   :  { %5295 = sst [smem:[#allocation6_spill]] %s5272_s1 }
   0x3   :  { %5296 = sst [smem:[#allocation7_spill]] %s5273_s2 }
   0x4   :  { %5297 = sst [smem:[#allocation8_spill]] %s5274_s3 }
   0x5   :  { %5298 = sst [smem:[#allocation9_spill]] %s5275_s4 }
   0x6   :  { %v4143_v0 = vld [vmem:[%s5280_s9] sm:$0xff]  ;;  %v4013_v1 = vmov 2   ;;  %v4014_v2 = vmov 1   ;;  %s5299_s2 = sld [smem:[#allocation5_spill]]  ;;  %v4167_v6 = vld [vmem:[%s5280_s9 + $0x8] sm:$0xff]  ;;  %vm70_vm0 = vcmask 31744  }
   0x7   :  { %3802 = vset.pattern.permute.xlu1 %v4013_v1  ;;  %3801 = vset.pattern.permute.xlu0 %v4014_v2 }
   0x8   :  { %230 = vperm.xlu1 %3802, %v4143_v0   ;;  %196 = vperm.xlu0 %3801, %v4143_v0  }
   0xc   :  { %v4150_v3 = vld [vmem:[%s5299_s2] sm:$0xff]  ;;  %v4157_v4 = vld [vmem:[%s5299_s2 + $0x8] sm:$0xff]  ;;  %v4162_v5 = vld [vmem:[%s5299_s2 + $0x10] sm:$0xff] }
   0xd   :  { %v4172_v7 = vld [vmem:[%s5299_s2 + $0x18] sm:$0xff]  ;;  %v71_v8 = vsel %vm70_vm0, %v4150_v3, 0.0  ;;  %v72_v9 = vsel %vm70_vm0, %v4157_v4, 0.0  ;;  %v74_v10 = vsel %vm70_vm0, %v4162_v5, 0.0 }
   0xe   :  { %v73_v11 = vadd.f32 %v72_v9, %v71_v8 }
   0xf   :  { %25 = vsyncpa [#allocation3], 0  ;;  %234 = vperm.xlu1 %3802, %v4167_v6   ;;  %200 = vperm.xlu0 %3801, %v4167_v6   ;;  %v76_v12 = vsel %vm70_vm0, %v4172_v7, 0.0  ;;  %v4187_v13 = vld [vmem:[%s5280_s9 + $0x10] sm:$0xff]  ;;  %v4015_v16 = vmov 3   ;;  %v4195_v17 = vld [vmem:[%s5280_s9 + $0x18] sm:$0xff]  ;;  %v113_v54 = vlaneseq }
  0x10   :  { %v75_v14 = vadd.f32 %v74_v10, %v73_v11  ;;  %v4016_v20 = vmov 4   ;;  %v4017_v25 = vmov 5   ;;  %v4018_v32 = vmov 6   ;;  %s5300_s24 = sld [smem:[#allocation6_spill]]  ;;  %s4022_s26 = smov 4  }
  0x11   :  { %v4019_v42 = vmov 7   ;;  %v4020_v45 = vmov 0   ;;  %v4021_v47 = vmov 8   ;;  %v114_v58 = vshrl.u32 %v113_v54, 7  ;;  %s5301_s3 = sld [smem:[#allocation7_spill]]  ;;  %s4023_s27 = smov 8  }
  0x12   :  { %v77_v15 = vadd.f32 %v76_v12, %v75_v14  ;;  %vm183_vm1 = vcmask 1042432   ;;  %vm217_vm2 = vcmask 1041408   ;;  %vm251_vm3 = vcmask 1040384   ;;  %s4024_s28 = smov 12   ;;  %s4025_s4 = smov 16  }
  0x13   :  { %3803 = vset.pattern.permute.xlu1 %v4015_v16  ;;  %204 = vperm.xlu0 %3801, %v4187_v13   ;;  %v115_v59 = vsub.s32 0, %v114_v58  ;;  %vm303_vm4 = vcmask 1046528   ;;  %s4026_s29 = smov 20   ;;  %vm337_vm5 = vcmask 1045504   ;;  %s4027_s30 = smov 24   ;;  %vm371_vm6 = vcmask 1044480  }
  0x14   :  { %268 = vperm.xlu1 %3803, %v4167_v6   ;;  %v78_v18 = vrot.slane %v77_v15, 4  ;;  %vm145_vm7 = vcmask 1043456   ;;  %s5302_s1 = sld [smem:[#allocation8_spill]]  ;;  %s4028_s23 = smov 28   ;;  %vm557_vm8 = vcmask 64512   ;;  %vm567_vm9 = vcmask 130048  }
  0x15   :  { %vm562_vm10 = vcmask 97280   ;;  %vm572_vm11 = vcmask 162816   ;;  %vm577_vm12 = vcmask 195584   ;;  %vm582_vm13 = vcmask 228352   ;;  %s5303_s9 = sld [smem:[#allocation9_spill]] }
  0x16   :  { %v79_v19 = vadd.f32 %v78_v18, %v77_v15  ;;  %v108_v56 = vld [vmem:[%s5300_s24] sm:$0x1]  ;;  %vm587_vm14 = vcmask 261120   ;;  %vm604_vm15 = vcmask 293888  }
  0x17   :  { %208 = vperm.xlu0 %3801, %v4195_v17   ;;  %v122_v61 = vld [vmem:[%s5301_s3] sm:$0x1] }
  0x18   :  { %3804 = vset.pattern.permute.xlu1 %v4016_v20  ;;  %v80_v21 = vrot.slane %v79_v19, 2 }
  0x19   :  { %284 = vperm.xlu1 %3804, %v4143_v0  }
  0x1a   :  { %v81_v22 = vadd.f32 %v80_v21, %v79_v19 }
  0x1b   :  { %3806 = vset.pattern.permute.xlu0 %v4015_v16 }
  0x1c   :  { %264 = vperm.xlu0 %3806, %v4143_v0   ;;  %v82_v23 = vrot.slane %v81_v22, 1 }
  0x1d   :  { %288 = vperm.xlu1 %3804, %v4167_v6  }
  0x1e   :  { %v83_v24 = vadd.f32 %v82_v23, %v81_v22 }
  0x20   :  { %272 = vperm.xlu0 %3806, %v4187_v13   ;;  %v4205_v26 = vmul.f32 0.03125, %v83_v24 }
  0x21   :  { %3805 = vset.pattern.permute.xlu1 %v4017_v25 }
  0x22   :  { %318 = vperm.xlu1 %3805, %v4143_v0   ;;  %v86_v27 = vsub.f32 %v4150_v3, %v4205_v26  ;;  %v87_v28 = vsub.f32 %v4157_v4, %v4205_v26  ;;  %v88_v29 = vsub.f32 %v4162_v5, %v4205_v26  ;;  %v89_v33 = vsub.f32 %v4172_v7, %v4205_v26 }
  0x24   :  { %276 = vperm.xlu0 %3806, %v4195_v17   ;;  %v90_v30 = vmul.f32 %v86_v27, %v86_v27  ;;  %v91_v31 = vmul.f32 %v87_v28, %v87_v28  ;;  %v92_v34 = vmul.f32 %v88_v29, %v88_v29  ;;  %v93_v38 = vmul.f32 %v89_v33, %v89_v33 }
  0x26   :  { %3807 = vset.pattern.permute.xlu1 %v4013_v1  ;;  %v94_v35 = vsel %vm70_vm0, %v90_v30, 0.0  ;;  %v95_v36 = vsel %vm70_vm0, %v91_v31, 0.0  ;;  %v97_v39 = vsel %vm70_vm0, %v92_v34, 0.0  ;;  %v99_v41 = vsel %vm70_vm0, %v93_v38, 0.0 }
  0x27   :  { %238 = vperm.xlu1 %3807, %v4187_v13   ;;  %v96_v37 = vadd.f32 %v95_v36, %v94_v35 }
  0x28   :  { %3812 = vset.pattern.permute.xlu0 %v4017_v25 }
  0x29   :  { %322 = vperm.xlu0 %3812, %v4167_v6   ;;  %v98_v40 = vadd.f32 %v97_v39, %v96_v37 }
  0x2b   :  { %3808 = vset.pattern.permute.xlu1 %v4018_v32  ;;  %v100_v43 = vadd.f32 %v99_v41, %v98_v40 }
  0x2c   :  { %352 = vperm.xlu1 %3808, %v4143_v0  }
  0x2d   :  { %326 = vperm.xlu0 %3812, %v4187_v13   ;;  %v101_v44 = vrot.slane %v100_v43, 4 }
  0x2f   :  { %v102_v46 = vadd.f32 %v101_v44, %v100_v43 }
  0x30   :  { %3809 = vset.pattern.permute.xlu1 %v4013_v1 }
  0x31   :  { %242 = vperm.xlu1 %3809, %v4195_v17   ;;  %3818 = vset.pattern.permute.xlu0 %v4018_v32  ;;  %v103_v48 = vrot.slane %v102_v46, 2 }
  0x32   :  { %360 = vperm.xlu0 %3818, %v4187_v13  }
  0x33   :  { %v104_v49 = vadd.f32 %v103_v48, %v102_v46 }
  0x35   :  { %3810 = vset.pattern.permute.xlu1 %v4018_v32  ;;  %v105_v50 = vrot.slane %v104_v49, 1 }
  0x36   :  { %356 = vperm.xlu1 %3810, %v4167_v6   ;;  %3819 = vset.pattern.permute.xlu0 %v4019_v42 }
  0x37   :  { %390 = vperm.xlu0 %3819, %v4167_v6   ;;  %v106_v51 = vadd.f32 %v105_v50, %v104_v49 }
  0x39   :  { %v107_v52 = vmul.f32 0.03125, %v106_v51 }
  0x3a   :  { %3811 = vset.pattern.permute.xlu1 %v4019_v42 }
  0x3b   :  { %386 = vperm.xlu1 %3811, %v4143_v0   ;;  %398 = vperm.xlu0 %3819, %v4195_v17   ;;  %v109_v53 = vadd.f32 1e-05, %v107_v52 }
  0x3d   :  { %3893 = vrsqrt.f32 %v109_v53 }
  0x3f   :  { %3813 = vset.pattern.permute.xlu1 %v4016_v20  ;;  %3823 = vset.pattern.permute.xlu0 %v4020_v45 }
  0x40   :  { %292 = vperm.xlu1 %3813, %v4187_v13   ;;  %159 = vperm.xlu0 %3823, %v4143_v0  }
  0x44   :  { %3814 = vset.pattern.permute.xlu1 %v4021_v47  ;;  %174 = vperm.xlu0 %3823, %v4195_v17  }
  0x45   :  { %406 = vperm.xlu1 %3814, %v4143_v0  }
  0x48   :  { %3826 = vset.pattern.permute.xlu0 %v4014_v2 }
  0x49   :  { %3815 = vset.pattern.permute.xlu1 %v4016_v20 }
  0x4a   :  { %296 = vperm.xlu1 %3815, %v4195_v17   ;;  %v3894_v55 = vpop.eup %3893 }
  0x4b   :  { %v111_v57 = vmul.f32 %v3894_v55, %v108_v56 }
  0x4d   :  { %v123_v60 = vmul.f32 %v111_v57, %v4205_v26  ;;  %v116_v62 = vrot.slane %v111_v57, %v115_v59 }
  0x4e   :  { %3816 = vset.pattern.permute.xlu1 %v4021_v47 }
  0x4f   :  { %410 = vperm.xlu1 %3816, %v4167_v6   ;;  %v124_v63 = vsub.f32 %v122_v61, %v123_v60  ;;  %v118_v0 = vmul.f32 %v116_v62, %v4150_v3  ;;  %v121_v8 = vmul.f32 %v116_v62, %v4172_v7  ;;  %v119_v11 = vmul.f32 %v116_v62, %v4157_v4 }
  0x50   :  { %v120_v19 = vmul.f32 %v116_v62, %v4162_v5 }
  0x53   :  { %3817 = vset.pattern.permute.xlu1 %v4017_v25 }
  0x54   :  { %330 = vperm.xlu1 %3817, %v4195_v17  }
  0x58   :  { %3820 = vset.pattern.permute.xlu1 %v4018_v32 }
  0x59   :  { %364 = vperm.xlu1 %3820, %v4195_v17  }
  0x5d   :  { %3821 = vset.pattern.permute.xlu1 %v4019_v42 }
  0x5e   :  { %394 = vperm.xlu1 %3821, %v4187_v13  }
  0x62   :  { %3822 = vset.pattern.permute.xlu1 %v4021_v47 }
  0x63   :  { %414 = vperm.xlu1 %3822, %v4187_v13  }
  0x67   :  { %418 = vperm.xlu1 %3822, %v4195_v17  }
  0x6b   :  { %3824 = vset.pattern.permute.xlu1 %v4020_v45 }
  0x6c   :  { %164 = vperm.xlu1 %3824, %v4167_v6   ;;  %v129_v6 = vrot.slane %v124_v63, %v115_v59 }
  0x6e   :  { %v4273_v9 = vadd.f32 %v129_v6, %v118_v0  ;;  %v4275_v10 = vadd.f32 %v129_v6, %v121_v8  ;;  %v4280_v14 = vadd.f32 %v129_v6, %v119_v11  ;;  %v4295_v28 = vadd.f32 %v129_v6, %v120_v19 }
  0x70   :  { %169 = vperm.xlu1 %3824, %v4187_v13   ;;  %v181_v12 = vrot.slane %v4275_v10, 5  ;;  %v184_v13 = vrot.slane %v4273_v9, 5  ;;  %v215_v15 = vrot.slane %v4275_v10, 6  ;;  %v218_v3 = vrot.slane %v4273_v9, 6 }
  0x71   :  { %v185_v17 = vrot.slane %v4280_v14, 5  ;;  %v219_v23 = vrot.slane %v4280_v14, 6  ;;  %v252_v31 = vrot.slane %v4273_v9, 7  ;;  %v253_v33 = vrot.slane %v4280_v14, 7 }
  0x72   :  { %v194_v7 = vsel %vm183_vm1, %v181_v12, %v184_v13  ;;  %v228_v22 = vsel %vm217_vm2, %v215_v15, %v218_v3  ;;  %v187_v35 = vrot.slane %v4295_v28, 5  ;;  %v249_v39 = vrot.slane %v4275_v10, 7 }
  0x73   :  { %v186_v24 = vsel %vm183_vm1, %v184_v13, %v185_v17  ;;  %v220_v5 = vsel %vm217_vm2, %v218_v3, %v219_v23  ;;  %v254_v38 = vsel %vm251_vm3, %v252_v31, %v253_v33  ;;  %v304_v50 = vrot.slane %v4273_v9, 1 }
  0x74   :  { %3825 = vset.pattern.permute.xlu1 %v4017_v25  ;;  %v188_v40 = vsel %vm183_vm1, %v185_v17, %v187_v35  ;;  %v262_v48 = vsel %vm251_vm3, %v249_v39, %v252_v31  ;;  %v305_v51 = vrot.slane %v4280_v14, 1  ;;  %v221_v57 = vrot.slane %v4295_v28, 6 }
  0x75   :  { %v307_v61 = vrot.slane %v4295_v28, 1  ;;  %v189_v0 = vsel %vm183_vm1, %v187_v35, %v181_v12  ;;  %v338_v8 = vrot.slane %v4273_v9, 2  ;;  %v339_v6 = vrot.slane %v4280_v14, 2 }
  0x76   :  { %v306_v54 = vsel %vm303_vm4, %v304_v50, %v305_v51  ;;  %v222_v63 = vsel %vm217_vm2, %v219_v23, %v221_v57  ;;  %v255_v13 = vrot.slane %v4295_v28, 7 }
  0x77   :  { %v340_v12 = vsel %vm337_vm5, %v338_v8, %v339_v6 }
  0x78   :  { %v256_v19 = vsel %vm251_vm3, %v253_v33, %v255_v13  ;;  %v372_v33 = vrot.slane %v4273_v9, 3 }
  0x83   :  { %v231_v18 = vpop.permute.xlu1 %230  ;;  %v197_v4 = vpop.permute.xlu0 %196 }
  0x84   :  { %v211_v21 = vmul.f32 %v197_v4, %v194_v7  ;;  %v245_v29 = vmul.f32 %v231_v18, %v228_v22  ;;  %v308_v7 = vsel %vm303_vm4, %v305_v51, %v307_v61  ;;  %v146_v51 = vrot.slane %v4273_v9, 4 }
  0x86   :  { %429 = vrot.lane.b32.xlu1 %v211_v21, %s4022_s26 }
  0x8a   :  { %v235_v26 = vpop.permute.xlu1 %234  ;;  %v201_v27 = vpop.permute.xlu0 %200  ;;  %445 = vrot.lane.b32.xlu1 %v245_v29, %s4023_s27 }
  0x8b   :  { %v212_v30 = vmul.f32 %v201_v27, %v186_v24  ;;  %v246_v36 = vmul.f32 %v235_v26, %v220_v5  ;;  %v223_v26 = vsel %vm217_vm2, %v221_v57, %v215_v15  ;;  %v341_v27 = vrot.slane %v4295_v28, 2  ;;  %v592_v57 = vld [vmem:[%s5302_s1] sm:$0xff] }
  0x8c   :  { %v375_v15 = vrot.slane %v4295_v28, 3 }
  0x8d   :  { %431 = vrot.lane.b32.xlu0 %v212_v30, %s4022_s26  ;;  %v342_v5 = vsel %vm337_vm5, %v339_v6, %v341_v27 }
  0x8e   :  { %v205_v34 = vpop.permute.xlu0 %204 }
  0x8f   :  { %v269_v37 = vpop.permute.xlu1 %268  ;;  %v213_v46 = vmul.f32 %v205_v34, %v188_v40  ;;  %v373_v34 = vrot.slane %v4280_v14, 3 }
  0x90   :  { %v280_v43 = vmul.f32 %v269_v37, %v254_v38  ;;  %v257_v37 = vsel %vm251_vm3, %v255_v13, %v249_v39  ;;  %v343_v13 = vrot.slane %v4275_v10, 2 }
  0x91   :  { %447 = vrot.lane.b32.xlu0 %v246_v36, %s4023_s27  ;;  %v374_v38 = vsel %vm371_vm6, %v372_v33, %v373_v34 }
  0x92   :  { %v209_v41 = vpop.permute.xlu0 %208 }
  0x93   :  { %v214_v17 = vmul.f32 %v209_v41, %v189_v0  ;;  %v376_v41 = vsel %vm371_vm6, %v373_v34, %v375_v15 }
  0x94   :  { %v285_v44 = vpop.permute.xlu1 %284 }
  0x95   :  { %463 = vrot.lane.b32.xlu0 %v280_v43, %s4024_s28  ;;  %v299_v56 = vmul.f32 %v285_v44, %v4273_v9  ;;  %v596_v43 = vld [vmem:[%s5302_s1 + $0x20] sm:$0xf] }
  0x96   :  { %3542 = vmatprep.subr.msk.mxu0 %vm145_vm7, %v596_v43 }
  0x97   :  { %v265_v49 = vpop.permute.xlu0 %264  ;;  %3543 = vmatpush3.msk.msra.mxu0 %vm145_vm7, %v596_v43 }
  0x98   :  { %v279_v52 = vmul.f32 %v265_v49, %v262_v48  ;;  %v289_v53 = vpop.permute.xlu1 %288  ;;  %v595_v48 = vld [vmem:[%s5302_s1 + $0x18] sm:$0xff] }
  0x99   :  { %433 = vrot.lane.b32.xlu0 %v213_v46, %s4022_s26  ;;  %v300_v62 = vmul.f32 %v289_v53, %v4280_v14  ;;  %3544 = vmatprep.subr.mxu0 %v595_v48  ;;  %v594_v53 = vld [vmem:[%s5302_s1 + $0x10] sm:$0xff] }
  0x9a   :  { %461 = vrot.lane.b32.xlu1 %v279_v52, %s4024_s28  ;;  %3545 = vmatpush3.msra.mxu0 %v595_v48  ;;  %v147_v52 = vrot.slane %v4280_v14, 4  ;;  %v309_v14 = vrot.slane %v4275_v10, 1 }
  0x9b   :  { %v273_v55 = vpop.permute.xlu0 %272  ;;  %3546 = vmatprep.subr.mxu0 %v594_v53 }
  0x9c   :  { %v281_v24 = vmul.f32 %v273_v55, %v256_v19  ;;  %v593_v55 = vld [vmem:[%s5302_s1 + $0x8] sm:$0xff]  ;;  %3547 = vmatpush3.msra.mxu0 %v594_v53 }
  0x9d   :  { %v319_v58 = vpop.permute.xlu1 %318  ;;  %3548 = vmatprep.subr.mxu0 %v593_v55 }
  0x9e   :  { %v333_v59 = vmul.f32 %v319_v58, %v306_v54  ;;  %477 = vrot.lane.b32.xlu1 %v299_v56, %s4025_s4  ;;  %v4391_v58 = vsel %vm145_vm7, %v146_v51, %v147_v52  ;;  %3549 = vmatpush3.msra.mxu0 %v593_v55 }
  0x9f   :  { %v277_v60 = vpop.permute.xlu0 %276  ;;  %3550 = vmatprep.subr.mxu0 %v592_v57 }
  0xa0   :  { %493 = vrot.lane.b32.xlu0 %v333_v59, %s4026_s29  ;;  %v282_v44 = vmul.f32 %v277_v60, %v257_v37  ;;  %3551 = vmatpush3.msra.mxu0 %v592_v57 }
  0xa2   :  { %v239_v11 = vpop.permute.xlu1 %238  ;;  %479 = vrot.lane.b32.xlu1 %v300_v62, %s4025_s4  ;;  %v310_v62 = vsel %vm303_vm4, %v307_v61, %v309_v14 }
  0xa3   :  { %v247_v3 = vmul.f32 %v239_v11, %v222_v63  ;;  %v149_v63 = vrot.slane %v4295_v28, 4 }
  0xa4   :  { %v323_v18 = vpop.permute.xlu0 %322 }
  0xa5   :  { %449 = vrot.lane.b32.xlu0 %v247_v3, %s4023_s27  ;;  %v334_v4 = vmul.f32 %v323_v18, %v308_v7  ;;  %v4404_v3 = vsel %vm145_vm7, %v147_v52, %v149_v63  ;;  %v316_v18 = vsel %vm303_vm4, %v309_v14, %v304_v50 }
  0xa6   :  { %435 = vrot.lane.b32.xlu1 %v214_v17, %s4022_s26  ;;  %v344_v17 = vsel %vm337_vm5, %v341_v27, %v343_v13  ;;  %s4031_s26 = smov 96  }
  0xa7   :  { %v353_v21 = vpop.permute.xlu1 %352 }
  0xa8   :  { %v367_v22 = vmul.f32 %v353_v21, %v340_v12  ;;  %v327_v23 = vpop.permute.xlu0 %326  ;;  %v377_v21 = vrot.slane %v4275_v10, 3 }
  0xa9   :  { %v335_v0 = vmul.f32 %v327_v23, %v310_v62 }
  0xaa   :  { %495 = vrot.lane.b32.xlu1 %v334_v4, %s4026_s29  ;;  %509 = vrot.lane.b32.xlu0 %v367_v22, %s4027_s30  ;;  %v350_v22 = vsel %vm337_vm5, %v343_v13, %v338_v8  ;;  %v384_v50 = vsel %vm371_vm6, %v377_v21, %v372_v33  ;;  %v378_v27 = vsel %vm371_vm6, %v375_v15, %v377_v21 }
  0xac   :  { %v243_v29 = vpop.permute.xlu1 %242 }
  0xad   :  { %v248_v30 = vmul.f32 %v243_v29, %v223_v26  ;;  %v361_v31 = vpop.permute.xlu0 %360  ;;  %v140_v29 = vrot.slane %v4275_v10, 4 }
  0xae   :  { %465 = vrot.lane.b32.xlu0 %v281_v24, %s4024_s28  ;;  %v369_v12 = vmul.f32 %v361_v31, %v344_v17 }
  0xaf   :  { %451 = vrot.lane.b32.xlu1 %v248_v30, %s4023_s27  ;;  %v4431_v8 = vsel %vm145_vm7, %v149_v63, %v140_v29  ;;  %v156_v34 = vsel %vm145_vm7, %v140_v29, %v146_v51 }
  0xb1   :  { %v357_v35 = vpop.permute.xlu1 %356 }
  0xb2   :  { %v368_v36 = vmul.f32 %v357_v35, %v342_v5  ;;  %v391_v40 = vpop.permute.xlu0 %390 }
  0xb3   :  { %v402_v49 = vmul.f32 %v391_v40, %v376_v41 }
  0xb4   :  { %511 = vrot.lane.b32.xlu1 %v368_v36, %s4027_s30 }
  0xb6   :  { %v387_v46 = vpop.permute.xlu1 %386  ;;  %v399_v26 = vpop.permute.xlu0 %398 }
  0xb7   :  { %v401_v39 = vmul.f32 %v387_v46, %v374_v38  ;;  %v404_v30 = vmul.f32 %v399_v26, %v384_v50 }
  0xb8   :  { %467 = vrot.lane.b32.xlu1 %v282_v44, %s4024_s28  ;;  %s4029_s28 = smov 32  }
  0xb9   :  { %525 = vrot.lane.b32.xlu0 %v401_v39, %s4028_s23 }
  0xbb   :  { %v293_v54 = vpop.permute.xlu1 %292 }
  0xbc   :  { %v301_v56 = vmul.f32 %v293_v54, %v4295_v28  ;;  %527 = vrot.lane.b32.xlu1 %v402_v49, %s4028_s23 }
  0xbe   :  { %481 = vrot.lane.b32.xlu0 %v301_v56, %s4025_s4 }
  0xc0   :  { %v407_v59 = vpop.permute.xlu1 %406 }
  0xc1   :  { %v421_v60 = vmul.f32 %v407_v59, %v4391_v58 }
  0xc3   :  { %541 = vrot.lane.b32.xlu0 %v421_v60, %s4029_s28 }
  0xc5   :  { %v297_v6 = vpop.permute.xlu1 %296 }
  0xc6   :  { %v302_v11 = vmul.f32 %v297_v6, %v4275_v10  ;;  %v160_v10 = vpop.permute.xlu0 %159 }
  0xc7   :  { %497 = vrot.lane.b32.xlu0 %v335_v0, %s4026_s29  ;;  %v177_v57 = vmul.f32 %v160_v10, %v156_v34 }
  0xc8   :  { %483 = vrot.lane.b32.xlu1 %v302_v11, %s4025_s4 }
  0xca   :  { %v411_v7 = vpop.permute.xlu1 %410  ;;  %v175_v36 = vpop.permute.xlu0 %174 }
  0xcb   :  { %v422_v61 = vmul.f32 %v411_v7, %v4404_v3 }
  0xcd   :  { %543 = vrot.lane.b32.xlu1 %v422_v61, %s4029_s28 }
  0xcf   :  { %v331_v4 = vpop.permute.xlu1 %330 }
  0xd0   :  { %v336_v19 = vmul.f32 %v331_v4, %v316_v18 }
  0xd1   :  { %513 = vrot.lane.b32.xlu1 %v369_v12, %s4027_s30 }
  0xd2   :  { %499 = vrot.lane.b32.xlu0 %v336_v19, %s4026_s29 }
  0xd4   :  { %v365_v23 = vpop.permute.xlu1 %364 }
  0xd5   :  { %v370_v24 = vmul.f32 %v365_v23, %v350_v22 }
  0xd7   :  { %515 = vrot.lane.b32.xlu0 %v370_v24, %s4027_s30 }
  0xd9   :  { %v395_v5 = vpop.permute.xlu1 %394 }
  0xda   :  { %v403_v31 = vmul.f32 %v395_v5, %v378_v27 }
  0xdb   :  { %531 = vrot.lane.b32.xlu0 %v404_v30, %s4028_s23 }
  0xdc   :  { %529 = vrot.lane.b32.xlu1 %v403_v31, %s4028_s23  ;;  %s4030_s23 = smov 64  }
  0xde   :  { %v415_v9 = vpop.permute.xlu1 %414 }
  0xdf   :  { %v423_v33 = vmul.f32 %v415_v9, %v4431_v8 }
  0xe1   :  { %545 = vrot.lane.b32.xlu1 %v423_v33, %s4029_s28 }
  0xe2   :  { %v419_v28 = vpop.permute.xlu1 %418 }
  0xe3   :  { %v424_v35 = vmul.f32 %v419_v28, %v156_v34 }
  0xe5   :  { %547 = vrot.lane.b32.xlu0 %v424_v35, %s4029_s28 }
  0xe7   :  { %v165_v15 = vpop.permute.xlu1 %164 }
  0xe8   :  { %v178_v7 = vmul.f32 %v165_v15, %v4391_v58  ;;  %v180_v15 = vmul.f32 %v175_v36, %v4431_v8 }
  0xeb   :  { %v170_v37 = vpop.permute.xlu1 %169 }
  0xec   :  { %v179_v9 = vmul.f32 %v170_v37, %v4404_v3 }
  0xf8   :  { %v430_v40 = vpop.permute.xlu1 %429 }
  0xf9   :  { %v553_v60 = vsel %vm70_vm0, %v177_v57, %v430_v40  ;;  %v4486_v57 = vld [vmem:[%s5281_s10 + $0x8] sm:$0xff] }
  0xfc   :  { %v446_v43 = vpop.permute.xlu1 %445 }
  0xfd   :  { %v558_v63 = vsel %vm557_vm8, %v553_v60, %v446_v43 }
  0xff   :  { %v432_v38 = vpop.permute.xlu0 %431 }
 0x100   :  { %v554_v21 = vsel %vm70_vm0, %v178_v7, %v432_v38 }
 0x103   :  { %v448_v41 = vpop.permute.xlu0 %447 }
 0x104   :  { %v559_v22 = vsel %vm557_vm8, %v554_v21, %v448_v41 }
 0x107   :  { %v464_v44 = vpop.permute.xlu0 %463 }
 0x108   :  { %v564_v58 = vsel %vm562_vm10, %v559_v22, %v464_v44 }
 0x10b   :  { %v434_v39 = vpop.permute.xlu0 %433 }
 0x10c   :  { %v462_v46 = vpop.permute.xlu1 %461  ;;  %v555_v34 = vsel %vm70_vm0, %v179_v9, %v434_v39  ;;  %v1034_v9 = vld [vmem:[%s5276_s5 + $0x70] sm:$0xff] }
 0x10d   :  { %v563_v0 = vsel %vm562_vm10, %v558_v63, %v462_v46 }
 0x110   :  { %v478_v48 = vpop.permute.xlu1 %477 }
 0x111   :  { %v568_v6 = vsel %vm567_vm9, %v563_v0, %v478_v48 }
 0x112   :  { %v494_v51 = vpop.permute.xlu0 %493 }
 0x113   :  { %v573_v61 = vsel %vm572_vm11, %v568_v6, %v494_v51 }
 0x114   :  { %v480_v49 = vpop.permute.xlu1 %479 }
 0x115   :  { %v569_v24 = vsel %vm567_vm9, %v564_v58, %v480_v49 }
 0x117   :  { %v450_v53 = vpop.permute.xlu0 %449 }
 0x118   :  { %v436_v52 = vpop.permute.xlu1 %435  ;;  %v560_v35 = vsel %vm557_vm8, %v555_v34, %v450_v53  ;;  %v1033_v34 = vld [vmem:[%s5276_s5 + $0x68] sm:$0xff] }
 0x119   :  { %v556_v41 = vsel %vm70_vm0, %v180_v15, %v436_v52  ;;  %v1031_v15 = vld [vmem:[%s5276_s5 + $0x58] sm:$0xff]  ;;  %vm1008_vm0 = vcmask 523264  }
 0x11c   :  { %v496_v54 = vpop.permute.xlu1 %495  ;;  %v510_v55 = vpop.permute.xlu0 %509 }
 0x11d   :  { %v578_v17 = vsel %vm577_vm12, %v573_v61, %v510_v55  ;;  %v574_v26 = vsel %vm572_vm11, %v569_v24, %v496_v54  ;;  %v730_v55 = vld [vmem:[%s5283_s12] sm:$0xff] }
 0x11e   :  { %3566 = vmatprep.mubr.msk.f32.mxu1 %vm587_vm14, %v730_v55 }
 0x120   :  { %v466_v14 = vpop.permute.xlu0 %465 }
 0x121   :  { %v452_v56 = vpop.permute.xlu1 %451  ;;  %v565_v38 = vsel %vm562_vm10, %v560_v35, %v466_v14  ;;  %v1032_v35 = vld [vmem:[%s5276_s5 + $0x60] sm:$0xff] }
 0x122   :  { %v561_v44 = vsel %vm557_vm8, %v556_v41, %v452_v56  ;;  %v813_v56 = vld [vmem:[%s5281_s10] sm:$0xff]  ;;  %v1045_v41 = vld [vmem:[%s5276_s5 + $0xc8] sm:$0xff] }
 0x123   :  { %905 = vperm.xlu1 %3825, %v813_v56   ;;  %844 = vperm.xlu0 %3826, %v813_v56  }
 0x126   :  { %v512_v59 = vpop.permute.xlu1 %511 }
 0x127   :  { %v579_v50 = vsel %vm577_vm12, %v574_v26, %v512_v59  ;;  %3827 = vset.pattern.permute.xlu1 %v4018_v32  ;;  %848 = vperm.xlu0 %3826, %v4486_v57   ;;  %v3296_v59 = vld [vmem:[%s5303_s9] ss:$0 sm:$0xff] }
 0x128   :  { %922 = vperm.xlu1 %3827, %v813_v56  }
 0x12a   :  { %v468_v11 = vpop.permute.xlu1 %467 }
 0x12b   :  { %v526_v62 = vpop.permute.xlu0 %525  ;;  %v566_v37 = vsel %vm562_vm10, %v561_v44, %v468_v11  ;;  %3831 = vset.pattern.permute.xlu0 %v4019_v42  ;;  %v1044_v44 = vld [vmem:[%s5276_s5 + $0xc0] sm:$0xff] }
 0x12c   :  { %v583_v18 = vsel %vm582_vm13, %v578_v17, %v526_v62  ;;  %3828 = vset.pattern.permute.xlu1 %v4013_v1  ;;  %939 = vperm.xlu0 %3831, %v813_v56  }
 0x12d   :  { %861 = vperm.xlu1 %3828, %v813_v56  }
 0x12e   :  { %v528_v4 = vpop.permute.xlu1 %527 }
 0x12f   :  { %v584_v27 = vsel %vm582_vm13, %v579_v50, %v528_v4 }
 0x130   :  { %v482_v13 = vpop.permute.xlu0 %481  ;;  %943 = vperm.xlu0 %3831, %v4486_v57  }
 0x131   :  { %v570_v40 = vsel %vm567_vm9, %v565_v38, %v482_v13  ;;  %3829 = vset.pattern.permute.xlu1 %v4015_v16  ;;  %v1046_v38 = vld [vmem:[%s5276_s5 + $0xd0] sm:$0xff] }
 0x132   :  { %878 = vperm.xlu1 %3829, %v813_v56  }
 0x134   :  { %3836 = vset.pattern.permute.xlu0 %v4020_v45 }
 0x135   :  { %v542_v12 = vpop.permute.xlu0 %541  ;;  %826 = vperm.xlu0 %3836, %v813_v56  }
 0x136   :  { %v588_v19 = vsel %vm587_vm14, %v583_v18, %v542_v12  ;;  %3830 = vset.pattern.permute.xlu1 %v4017_v25 }
 0x137   :  { %3552 = vmatprep.mubr.msk.f32.mxu0 %vm604_vm15, %v588_v19  ;;  %909 = vperm.xlu1 %3830, %v4486_v57  }
 0x139   :  { %v498_v5 = vpop.permute.xlu0 %497  ;;  %3869 = vset.pattern.permute.xlu0 %v4017_v25 }
 0x13a   :  { %v484_v23 = vpop.permute.xlu1 %483  ;;  %v575_v43 = vsel %vm572_vm11, %v570_v40, %v498_v5  ;;  %v1035_v5 = vld [vmem:[%s5276_s5 + $0x78] sm:$0xff]  ;;  %v1030_v40 = vld [vmem:[%s5276_s5 + $0x50] sm:$0xff] }
 0x13b   :  { %v571_v8 = vsel %vm567_vm9, %v566_v37, %v484_v23  ;;  %3832 = vset.pattern.permute.xlu1 %v4018_v32  ;;  %v1043_v37 = vld [vmem:[%s5276_s5 + $0xb8] sm:$0xff] }
 0x13c   :  { %926 = vperm.xlu1 %3832, %v4486_v57  }
 0x13f   :  { %v544_v29 = vpop.permute.xlu1 %543 }
 0x140   :  { %v589_v30 = vsel %vm587_vm14, %v584_v27, %v544_v29  ;;  %3833 = vset.pattern.permute.xlu1 %v4013_v1  ;;  %v731_v29 = vld [vmem:[%s5283_s12 + $0x8] sm:$0xff] }
 0x141   :  { %3553 = vmatmul.mubr.msk.f32.vlgmr.msra.gmra.mxu0 %vm604_vm15, %v589_v30  ;;  %865 = vperm.xlu1 %3833, %v4486_v57   ;;  %v1051_v30 = vld [vmem:[%s5276_s5 + $0xf8] sm:$0xff] }
 0x143   :  { %v514_v33 = vpop.permute.xlu1 %513 }
 0x144   :  { %v500_v31 = vpop.permute.xlu0 %499  ;;  %v580_v3 = vsel %vm577_vm12, %v575_v43, %v514_v33  ;;  %v1049_v33 = vld [vmem:[%s5276_s5 + $0xe8] sm:$0xff] }
 0x145   :  { %v576_v49 = vsel %vm572_vm11, %v571_v8, %v500_v31  ;;  %3834 = vset.pattern.permute.xlu1 %v4015_v16  ;;  %v1050_v31 = vld [vmem:[%s5276_s5 + $0xf0] sm:$0xff]  ;;  %v1029_v43 = vld [vmem:[%s5276_s5 + $0x48] sm:$0xff] }
 0x146   :  { %882 = vperm.xlu1 %3834, %v4486_v57   ;;  %v1041_v8 = vld [vmem:[%s5276_s5 + $0xa8] sm:$0xff] }
 0x149   :  { %v516_v28 = vpop.permute.xlu0 %515 }
 0x14a   :  { %v581_v51 = vsel %vm577_vm12, %v576_v49, %v516_v28  ;;  %3835 = vset.pattern.permute.xlu1 %v4016_v20  ;;  %v1048_v28 = vld [vmem:[%s5276_s5 + $0xe0] sm:$0xff] }
 0x14b   :  { %888 = vperm.xlu1 %3835, %v813_v56   ;;  %v1040_v49 = vld [vmem:[%s5276_s5 + $0xa0] sm:$0xff] }
 0x14d   :  { %v532_v46 = vpop.permute.xlu0 %531 }
 0x14e   :  { %v530_v10 = vpop.permute.xlu1 %529  ;;  %v586_v52 = vsel %vm582_vm13, %v581_v51, %v532_v46  ;;  %v1027_v46 = vld [vmem:[%s5276_s5 + $0x38] sm:$0xff]  ;;  %v1024_v51 = vld [vmem:[%s5276_s5 + $0x20] sm:$0xff] }
 0x14f   :  { %v585_v39 = vsel %vm582_vm13, %v580_v3, %v530_v10  ;;  %892 = vperm.xlu1 %3835, %v4486_v57   ;;  %v1047_v10 = vld [vmem:[%s5276_s5 + $0xd8] sm:$0xff]  ;;  %v1028_v3 = vld [vmem:[%s5276_s5 + $0x40] sm:$0xff] }
 0x153   :  { %v546_v48 = vpop.permute.xlu1 %545  ;;  %3837 = vset.pattern.permute.xlu1 %v4020_v45 }
 0x154   :  { %v590_v36 = vsel %vm587_vm14, %v585_v39, %v546_v48  ;;  %831 = vperm.xlu1 %3837, %v4486_v57   ;;  %v1042_v39 = vld [vmem:[%s5276_s5 + $0xb0] sm:$0xff] }
 0x155   :  { %3555 = vmatprep.mubr.msk.f32.mxu0 %vm604_vm15, %v590_v36  ;;  %v1026_v48 = vld [vmem:[%s5276_s5 + $0x30] sm:$0xff]  ;;  %v1025_v36 = vld [vmem:[%s5276_s5 + $0x28] sm:$0xff] }
 0x157   :  { %v548_v53 = vpop.permute.xlu0 %547 }
 0x158   :  { %v591_v54 = vsel %vm587_vm14, %v586_v52, %v548_v53  ;;  %3838 = vset.pattern.permute.xlu1 %v4021_v47 }
 0x159   :  { %3556 = vmatmul.mubr.msk.f32.gmra.mxu0 %vm604_vm15, %v591_v54  ;;  %949 = vperm.xlu1 %3838, %v813_v56  }
 0x19e   :  { %v906_v52 = vpop.permute.xlu1 %905 }
 0x1a3   :  { %v923_v53 = vpop.permute.xlu1 %922 }
 0x1a8   :  { %v862_v54 = vpop.permute.xlu1 %861 }
 0x1ad   :  { %v879_v55 = vpop.permute.xlu1 %878 }
 0x1b2   :  { %v4592_v56 = vpop.permute.xlu1 %909 }
 0x201   :  { %v3554_v25 = vpop.f32.mrf.mxu0 }
 0x202   :  { %v692_v62 = vadd.f32 %v3554_v25, %v3296_v59  ;;  %v4594_v25 = vpop.permute.xlu1 %926 }
 0x203   :  { %v686_v14 = vpop.f32.mrf.mxu0 }
 0x204   :  { %v687_v60 = vadd.f32 %v3296_v59, %v686_v14  ;;  %v706_v13 = vmax.f32 %v692_v62, 0.0 }
 0x206   :  { %v705_v0 = vmax.f32 %v687_v60, 0.0  ;;  %v714_v4 = vrot.slane %v706_v13, 1  ;;  %v4596_v14 = vpop.permute.xlu1 %865 }
 0x208   :  { %v713_v17 = vrot.slane %v705_v0, 1 }
 0x20a   :  { %v715_v26 = vsel %vm303_vm4, %v713_v17, %v714_v4 }
 0x20b   :  { %v726_v27 = vmax.f32 %v705_v0, %v715_v26 }
 0x219   :  { %v3557_v63 = vpop.f32.mrf.mxu0 }
 0x21a   :  { %v702_v6 = vadd.f32 %v3557_v63, %v3296_v59  ;;  %v845_v63 = vpop.permute.xlu0 %844 }
 0x21b   :  { %v696_v11 = vpop.f32.mrf.mxu0 }
 0x21c   :  { %v708_v7 = vmax.f32 %v702_v6, 0.0  ;;  %v697_v61 = vadd.f32 %v3296_v59, %v696_v11  ;;  %v4598_v59 = vpop.permute.xlu1 %882 }
 0x21e   :  { %v718_v18 = vrot.slane %v708_v7, 1  ;;  %v707_v12 = vmax.f32 %v697_v61, 0.0  ;;  %v4606_v6 = vpop.permute.xlu0 %848  ;;  %v1023_v61 = vld [vmem:[%s5276_s5 + $0x18] sm:$0xff] }
 0x220   :  { %v716_v19 = vrot.slane %v707_v12, 1  ;;  %v725_v21 = vsel %vm303_vm4, %v718_v18, %v713_v17  ;;  %v4600_v60 = vpop.permute.xlu1 %888 }
 0x221   :  { %v729_v22 = vmax.f32 %v708_v7, %v725_v21  ;;  %v1039_v7 = vld [vmem:[%s5276_s5 + $0x98] sm:$0xff]  ;;  %v1038_v21 = vld [vmem:[%s5276_s5 + $0x90] sm:$0xff] }
 0x222   :  { %v719_v23 = vsel %vm303_vm4, %v716_v19, %v718_v18  ;;  %v717_v58 = vsel %vm303_vm4, %v714_v4, %v716_v19 }
 0x223   :  { %v728_v24 = vmax.f32 %v707_v12, %v719_v23  ;;  %3558 = vmatprep.subr.mxu1 %v729_v22  ;;  %v727_v50 = vmax.f32 %v706_v13, %v717_v58 }
 0x224   :  { %3559 = vmatpush3.msra.mxu1 %v729_v22  ;;  %v4602_v62 = vpop.permute.xlu1 %892  ;;  %v1022_v22 = vld [vmem:[%s5276_s5 + $0x10] sm:$0xff] }
 0x225   :  { %3560 = vmatprep.subr.mxu1 %v728_v24 }
 0x226   :  { %3561 = vmatpush3.msra.mxu1 %v728_v24 }
 0x227   :  { %3562 = vmatprep.subr.mxu1 %v727_v50 }
 0x228   :  { %3563 = vmatpush3.msra.mxu1 %v727_v50  ;;  %v4604_v0 = vpop.permute.xlu1 %831 }
 0x229   :  { %3564 = vmatprep.subr.mxu1 %v726_v27 }
 0x22a   :  { %3565 = vmatpush3.msra.mxu1 %v726_v27  ;;  %v1037_v27 = vld [vmem:[%s5276_s5 + $0x88] sm:$0xff] }
 0x22b   :  { %3567 = vmatmul.mubr.msk.f32.vlgmr.msra.gmra.mxu1 %vm587_vm14, %v731_v29  ;;  %3373 = vmatprep.subr.mxu1 %v1051_v30 }
 0x22c   :  { %3374 = vmatpush3.msra.mxu1 %v1035_v5  ;;  %v950_v23 = vpop.permute.xlu1 %949 }
 0x22d   :  { %3375 = vmatprep.subr.mxu1 %v1050_v31 }
 0x22e   :  { %3376 = vmatpush3.msra.mxu1 %v1034_v9  ;;  %v1021_v9 = vld [vmem:[%s5276_s5 + $0x8] sm:$0xff] }
 0x22f   :  { %3377 = vmatprep.subr.mxu1 %v1049_v33 }
 0x230   :  { %3378 = vmatpush3.msra.mxu1 %v1033_v34 }
 0x231   :  { %3379 = vmatprep.subr.mxu1 %v1048_v28 }
 0x232   :  { %3380 = vmatpush3.msra.mxu1 %v1032_v35 }
 0x233   :  { %3381 = vmatprep.subr.mxu1 %v1047_v10  ;;  %v940_v10 = vpop.permute.xlu0 %939 }
 0x234   :  { %3382 = vmatpush3.msra.mxu1 %v1031_v15 }
 0x235   :  { %3383 = vmatprep.subr.mxu1 %v1046_v38 }
 0x236   :  { %3384 = vmatpush3.msra.mxu1 %v1030_v40 }
 0x237   :  { %3385 = vmatprep.subr.mxu1 %v1045_v41  ;;  %v1036_v41 = vld [vmem:[%s5276_s5 + $0x80] sm:$0xff] }
 0x238   :  { %3386 = vmatpush3.msra.mxu1 %v1029_v43 }
 0x239   :  { %3387 = vmatprep.subr.mxu1 %v1044_v44 }
 0x23a   :  { %3388 = vmatpush3.msra.mxu1 %v1028_v3 }
 0x23b   :  { %3389 = vmatprep.subr.mxu1 %v1043_v37 }
 0x23c   :  { %3390 = vmatpush3.msra.mxu1 %v1027_v46  ;;  %v1020_v46 = vld [vmem:[%s5276_s5] sm:$0xff] }
 0x23d   :  { %3391 = vmatprep.subr.mxu1 %v1042_v39 }
 0x23e   :  { %3392 = vmatpush3.msra.mxu1 %v1026_v48 }
 0x23f   :  { %3393 = vmatprep.subr.mxu1 %v1041_v8 }
 0x240   :  { %3394 = vmatpush3.msra.mxu1 %v1025_v36 }
 0x241   :  { %3395 = vmatprep.subr.mxu1 %v1040_v49 }
 0x242   :  { %3396 = vmatpush3.msra.mxu1 %v1024_v51 }
 0x243   :  { %3397 = vmatprep.subr.mxu1 %v1039_v7  ;;  %v1055_v7 = vld [vmem:[%s5276_s5 + $0x118] sm:$0xff] }
 0x244   :  { %3398 = vmatpush3.msra.mxu1 %v1023_v61  ;;  %v1054_v61 = vld [vmem:[%s5276_s5 + $0x110] sm:$0xff]  ;;  %3569 = vmatprep.subr.mxu0 %v1055_v7 }
 0x245   :  { %3399 = vmatprep.subr.mxu1 %v1038_v21  ;;  %3570 = vmatpush3.msra.mxu0 %v1055_v7 }
 0x246   :  { %3400 = vmatpush3.msra.mxu1 %v1022_v22  ;;  %3571 = vmatprep.subr.mxu0 %v1054_v61 }
 0x247   :  { %3401 = vmatprep.subr.mxu1 %v1037_v27  ;;  %3572 = vmatpush3.msra.mxu0 %v1054_v61 }
 0x248   :  { %3402 = vmatpush3.msra.mxu1 %v1021_v9 }
 0x249   :  { %3403 = vmatprep.subr.mxu1 %v1036_v41 }
 0x24a   :  { %3404 = vmatpush3.msra.mxu1 %v1020_v46 }
 0x2eb   :  { %v4608_v11 = vpop.f32.mrf.mxu1 }
 0x2ec   :  { %v816_v13 = vrot.slane %v4608_v11, 4  ;;  %v853_v18 = vrot.slane %v4608_v11, 6  ;;  %v915_v12 = vrot.slane %v4608_v11, 2  ;;  %v836_v4 = vrot.slane %v4608_v11, 5 }
 0x2ed   :  { %v4617_v17 = vpop.f32.mrf.mxu1  ;;  %v898_v19 = vrot.slane %v4608_v11, 1  ;;  %v870_v30 = vrot.slane %v4608_v11, 7  ;;  %v932_v40 = vrot.slane %v4608_v11, 3 }
 0x2ee   :  { %v819_v58 = vrot.slane %v4617_v17, 4  ;;  %v855_v24 = vrot.slane %v4617_v17, 6  ;;  %v914_v26 = vrot.slane %v4617_v17, 2  ;;  %v838_v50 = vrot.slane %v4617_v17, 5 }
 0x2ef   :  { %v897_v29 = vrot.slane %v4617_v17, 1  ;;  %v872_v5 = vrot.slane %v4617_v17, 7  ;;  %v931_v31 = vrot.slane %v4617_v17, 3 }
 0x2f0   :  { %v4644_v33 = vsel %vm145_vm7, %v819_v58, %v816_v13  ;;  %v4647_v34 = vsel %vm145_vm7, %v816_v13, %v819_v58  ;;  %v859_v28 = vsel %vm217_vm2, %v853_v18, %v855_v24  ;;  %v916_v35 = vsel %vm337_vm5, %v914_v26, %v915_v12 }
 0x2f1   :  { %v956_v15 = vmul.f32 %v950_v23, %v4644_v33  ;;  %v868_v38 = vmul.f32 %v862_v54, %v859_v28  ;;  %v929_v43 = vmul.f32 %v923_v53, %v916_v35  ;;  %v842_v44 = vsel %vm183_vm1, %v836_v4, %v838_v50 }
 0x2f2   :  { %v899_v3 = vsel %vm303_vm4, %v897_v29, %v898_v19  ;;  %v876_v37 = vsel %vm251_vm3, %v870_v30, %v872_v5  ;;  %v851_v39 = vmul.f32 %v845_v63, %v842_v44  ;;  %v933_v8 = vsel %vm371_vm6, %v931_v31, %v932_v40 }
 0x2f3   :  { %3577 = vmatprep.mubr.msk.f32.mxu0 %vm587_vm14, %v956_v15  ;;  %v912_v48 = vmul.f32 %v906_v52, %v899_v3  ;;  %v3844_v36 = vpack.i.bf16 %v868_v38, %v929_v43  ;;  %v885_v49 = vmul.f32 %v879_v55, %v876_v37  ;;  %v946_v53 = vmul.f32 %v940_v10, %v933_v8  ;;  %v944_v55 = vpop.permute.xlu0 %943 }
 0x2f4   :  { %v873_v54 = vsel %vm251_vm3, %v872_v5, %v870_v30  ;;  %v937_v13 = vsel %vm371_vm6, %v932_v40, %v931_v31  ;;  %v839_v52 = vsel %vm183_vm1, %v838_v50, %v836_v4  ;;  %v903_v63 = vsel %vm303_vm4, %v898_v19, %v897_v29  ;;  %v1053_v4 = vld [vmem:[%s5276_s5 + $0x108] sm:$0xff] }
 0x2f5   :  { %v3839_v51 = vpack.i.bf16 %v851_v39, %v912_v48  ;;  %3845 = vrot.lane.b32.xlu1 %v3844_v36, %s4030_s23  ;;  %v886_v21 = vmul.f32 %v4598_v59, %v873_v54  ;;  %v947_v22 = vmul.f32 %v944_v55, %v937_v13  ;;  %v3849_v23 = vpack.i.bf16 %v885_v49, %v946_v53 }
 0x2f6   :  { %v852_v58 = vmul.f32 %v4606_v6, %v839_v52  ;;  %v913_v27 = vmul.f32 %v4592_v56, %v903_v63  ;;  %v856_v19 = vsel %vm217_vm2, %v855_v24, %v853_v18  ;;  %v920_v59 = vsel %vm337_vm5, %v915_v12, %v914_v26  ;;  %v1052_v56 = vld [vmem:[%s5276_s5 + $0x100] sm:$0xff]  ;;  %3573 = vmatprep.subr.mxu0 %v1053_v4 }
 0x2f7   :  { %3840 = vrot.lane.b32.xlu0 %v3839_v51, %s4029_s28  ;;  %v3864_v6 = vpack.i.bf16 %v886_v21, %v947_v22  ;;  %v869_v50 = vmul.f32 %v4596_v14, %v856_v19  ;;  %v930_v18 = vmul.f32 %v4594_v25, %v920_v59  ;;  %3574 = vmatpush3.msra.mxu0 %v1053_v4  ;;  %v827_v24 = vpop.permute.xlu0 %826  ;;  %vm1011_vm1 = vcmask 785408  }
 0x2f8   :  { %3575 = vmatprep.subr.mxu0 %v1052_v56  ;;  %v834_v30 = vmul.f32 %v827_v24, %v4647_v34  ;;  %v895_v25 = vmul.f32 %v4600_v60, %v4617_v17  ;;  %v835_v8 = vmul.f32 %v4604_v0, %v4644_v33  ;;  %v896_v36 = vmul.f32 %v4608_v11, %v4602_v62  ;;  %v4731_v62 = vld [vmem:[%s5282_s11] sm:$0xff]  ;;  %v1419_v24 = vld [vmem:[%s5278_s7 + $0x70] sm:$0xff] }
 0x2f9   :  { %953 = vperm.xlu1 %3838, %v4486_v57   ;;  %v3854_v57 = vpack.i.bf16 %v852_v58, %v913_v27  ;;  %3576 = vmatpush3.msra.mxu0 %v1052_v56  ;;  %v3859_v12 = vpack.i.bf16 %v869_v50, %v930_v18  ;;  %v4032_v33 = vmov 0.0   ;;  %vm4033_vm3 = vmmov 0   ;;  %v1436_v50 = vld [vmem:[%s5278_s7 + $0xf8] sm:$0xff] }
 0x2fa   :  { %3580 = vmatprep.subr.mxu0 %v4032_v33  ;;  %3587 = vmatprep.subr.mxu1 %v4032_v33  ;;  %v1420_v18 = vld [vmem:[%s5278_s7 + $0x78] sm:$0xff] }
 0x2fb   :  { %3850 = vrot.lane.b32.xlu0 %v3849_v23, %s4031_s26 }
 0x2fd   :  { %3865 = vrot.lane.b32.xlu1 %v3864_v6, %s4031_s26 }
 0x2fe   :  { %3870 = vset.pattern.permute.xlu1 %v4014_v2 }
 0x2ff   :  { %3855 = vrot.lane.b32.xlu0 %v3854_v57, %s4029_s28  ;;  %v1232_v57 = vld [vmem:[%s5284_s13] sm:$0xff] }
 0x301   :  { %1321 = vperm.xlu1 %3870, %v4731_v62  }
 0x303   :  { %3860 = vrot.lane.b32.xlu0 %v3859_v12, %s4030_s23  ;;  %v1435_v12 = vld [vmem:[%s5278_s7 + $0xf0] sm:$0xff] }
 0x305   :  { %3871 = vset.pattern.permute.xlu1 %v4018_v32 }
 0x306   :  { %1358 = vperm.xlu1 %3871, %v4731_v62  }
 0x307   :  { %1350 = vperm.xlu0 %3869, %v4731_v62  }
 0x30a   :  { %3873 = vset.pattern.permute.xlu1 %v4019_v42 }
 0x30b   :  { %3872 = vset.pattern.permute.xlu0 %v4013_v1  ;;  %1366 = vperm.xlu1 %3873, %v4731_v62  }
 0x30c   :  { %1329 = vperm.xlu0 %3872, %v4731_v62  }
 0x30f   :  { %3874 = vset.pattern.permute.xlu1 %v4015_v16 }
 0x310   :  { %3875 = vset.pattern.permute.xlu0 %v4016_v20  ;;  %1337 = vperm.xlu1 %3874, %v4731_v62   ;;  %v3304_v20 = vld [vmem:[%s5277_s6] ss:$0 sm:$0xff] }
 0x311   :  { %1342 = vperm.xlu0 %3875, %v4731_v62  }
 0x314   :  { %3876 = vset.pattern.permute.xlu1 %v4020_v45 }
 0x315   :  { %3892 = vset.pattern.permute.xlu0 %v4021_v47  ;;  %1313 = vperm.xlu1 %3876, %v4731_v62  }
 0x367   :  { %v3846_v26 = vpop.permute.xlu1 %3845 }
 0x368   :  { %v3848_v31 = vunpack.i.h.bf16 %v3846_v26  ;;  %v3847_v9 = vunpack.i.l.bf16 %v3846_v26  ;;  %v1434_v26 = vld [vmem:[%s5278_s7 + $0xe8] sm:$0xff] }
 0x369   :  { %v3841_v29 = vpop.permute.xlu0 %3840 }
 0x36a   :  { %v3843_v14 = vunpack.i.h.bf16 %v3841_v29  ;;  %v3842_v5 = vunpack.i.l.bf16 %v3841_v29  ;;  %v1418_v29 = vld [vmem:[%s5278_s7 + $0x68] sm:$0xff] }
 0x36c   :  { %v1006_v28 = vsel %vm587_vm14, %v834_v30, %v3843_v14  ;;  %v1014_v2 = vsel %vm587_vm14, %v895_v25, %v3842_v5  ;;  %v1433_v30 = vld [vmem:[%s5278_s7 + $0xe0] sm:$0xff]  ;;  %v1432_v5 = vld [vmem:[%s5278_s7 + $0xd8] sm:$0xff] }
 0x36d   :  { %v3851_v35 = vpop.permute.xlu0 %3850  ;;  %v1016_v38 = vsel %vm1008_vm0, %v1014_v2, %v3847_v9  ;;  %v1009_v40 = vsel %vm1008_vm0, %v1006_v28, %v3848_v31  ;;  %v1417_v14 = vld [vmem:[%s5278_s7 + $0x60] sm:$0xff]  ;;  %v1416_v25 = vld [vmem:[%s5278_s7 + $0x58] sm:$0xff]  ;;  %v1431_v31 = vld [vmem:[%s5278_s7 + $0xd0] sm:$0xff] }
 0x36e   :  { %v3853_v10 = vunpack.i.h.bf16 %v3851_v35  ;;  %v3852_v15 = vunpack.i.l.bf16 %v3851_v35  ;;  %v1415_v9 = vld [vmem:[%s5278_s7 + $0x50] sm:$0xff]  ;;  %v1430_v28 = vld [vmem:[%s5278_s7 + $0xc8] sm:$0xff]  ;;  %v1429_v35 = vld [vmem:[%s5278_s7 + $0xc0] sm:$0xff] }
 0x36f   :  { %v1414_v2 = vld [vmem:[%s5278_s7 + $0x48] sm:$0xff] }
 0x370   :  { %v1018_v41 = vsel %vm1011_vm1, %v1016_v38, %v3852_v15  ;;  %v1012_v43 = vsel %vm1011_vm1, %v1009_v40, %v3853_v10  ;;  %v1413_v10 = vld [vmem:[%s5278_s7 + $0x40] sm:$0xff]  ;;  %v1428_v15 = vld [vmem:[%s5278_s7 + $0xb8] sm:$0xff]  ;;  %v1427_v40 = vld [vmem:[%s5278_s7 + $0xb0] sm:$0xff] }
 0x371   :  { %1133 = vmatprep.mubr.f32.mxu1 %v1018_v41  ;;  %v3856_v60 = vpop.permute.xlu0 %3855  ;;  %v1412_v38 = vld [vmem:[%s5278_s7 + $0x38] sm:$0xff]  ;;  %v1411_v41 = vld [vmem:[%s5278_s7 + $0x30] sm:$0xff] }
 0x372   :  { %1134 = vmatmul.mubr.f32.vlgmr.msra.gmra.mxu1 %v1012_v43  ;;  %v3858_v3 = vunpack.i.h.bf16 %v3856_v60  ;;  %v3857_v37 = vunpack.i.l.bf16 %v3856_v60  ;;  %v1426_v43 = vld [vmem:[%s5278_s7 + $0xa8] sm:$0xff] }
 0x373   :  { %v1410_v60 = vld [vmem:[%s5278_s7 + $0x28] sm:$0xff] }
 0x374   :  { %v954_v44 = vpop.permute.xlu1 %953  ;;  %v1015_v54 = vsel %vm587_vm14, %v896_v36, %v3857_v37  ;;  %v1007_v13 = vsel %vm587_vm14, %v835_v8, %v3858_v3  ;;  %v1423_v8 = vld [vmem:[%s5278_s7 + $0x90] sm:$0xff] }
 0x375   :  { %v3861_v17 = vpop.permute.xlu0 %3860  ;;  %v957_v46 = vmul.f32 %v954_v44, %v4647_v34  ;;  %v1409_v44 = vld [vmem:[%s5278_s7 + $0x20] sm:$0xff]  ;;  %v1407_v36 = vld [vmem:[%s5278_s7 + $0x10] sm:$0xff] }
 0x376   :  { %v3863_v39 = vunpack.i.h.bf16 %v3861_v17  ;;  %v3862_v48 = vunpack.i.l.bf16 %v3861_v17  ;;  %v1425_v17 = vld [vmem:[%s5278_s7 + $0xa0] sm:$0xff] }
 0x377   :  { %3578 = vmatmul.mubr.msk.f32.vlgmr.msra.gmra.mxu0 %vm587_vm14, %v957_v46 }
 0x378   :  { %v3866_v49 = vpop.permute.xlu1 %3865  ;;  %v1017_v7 = vsel %vm1008_vm0, %v1015_v54, %v3862_v48  ;;  %v1010_v34 = vsel %vm1008_vm0, %v1007_v13, %v3863_v39  ;;  %3584 = vmatprep.mubr.msk.f32.mxu0 %vm4033_vm3, %v4032_v33  ;;  %v1424_v39 = vld [vmem:[%s5278_s7 + $0x98] sm:$0xff]  ;;  %v1406_v54 = vld [vmem:[%s5278_s7 + $0x8] sm:$0xff] }
 0x379   :  { %v3868_v51 = vunpack.i.h.bf16 %v3866_v49  ;;  %v3867_v53 = vunpack.i.l.bf16 %v3866_v49  ;;  %v1408_v48 = vld [vmem:[%s5278_s7 + $0x18] sm:$0xff] }
 0x37b   :  { %v1019_v52 = vsel %vm1011_vm1, %v1017_v7, %v3867_v53  ;;  %v1013_v0 = vsel %vm1011_vm1, %v1010_v34, %v3868_v51  ;;  %v1422_v51 = vld [vmem:[%s5278_s7 + $0x88] sm:$0xff] }
 0x37c   :  { %1138 = vmatprep.mubr.f32.mxu1 %v1019_v52  ;;  %v1322_v3 = vpop.permute.xlu1 %1321  ;;  %v1421_v52 = vld [vmem:[%s5278_s7 + $0x80] sm:$0xff] }
 0x37d   :  { %1139 = vmatmul.mubr.f32.gmra.mxu1 %v1013_v0 }
 0x37e   :  { %3595 = vmatprep.mubr.msk.f32.mxu1 %vm4033_vm3, %v4032_v33 }
 0x381   :  { %v1359_v37 = vpop.permute.xlu1 %1358 }
 0x382   :  { %v1351_v46 = vpop.permute.xlu0 %1350 }
 0x386   :  { %v1367_v49 = vpop.permute.xlu1 %1366 }
 0x387   :  { %v1330_v0 = vpop.permute.xlu0 %1329 }
 0x432   :  { %v3405_v1 = vpop.f32.mrf.mxu1 }
 0x434   :  { %v3406_v32 = vpop.f32.mrf.mxu1 }
 0x435   :  { %v3407_v42 = vadd.f32 %v3406_v32, %v3405_v1 }
 0x437   :  { %v3579_v11 = vpop.f32.mrf.mxu0  ;;  %v1136_v61 = vadd.f32 %v3407_v42, %v3304_v20 }
 0x439   :  { %v1210_v63 = vpop.f32.mrf.mxu0 }
 0x43a   :  { %v1211_v21 = vadd.f32 %v1210_v63, %v1136_v61 }
 0x43c   :  { %v1219_v23 = vmax.f32 %v1211_v21, 0.0  ;;  %v1439_v21 = vld [vmem:[%s5278_s7 + $0x110] sm:$0xff] }
 0x43d   :  { %v3408_v55 = vpop.f32.mrf.mxu1 }
 0x43e   :  { %v1223_v27 = vrot.slane %v1219_v23, 1 }
 0x43f   :  { %v3409_v16 = vpop.f32.mrf.mxu1 }
 0x440   :  { %v3410_v47 = vadd.f32 %v3409_v16, %v3408_v55  ;;  %v1440_v16 = vld [vmem:[%s5278_s7 + $0x118] sm:$0xff] }
 0x441   :  { %3588 = vmatpush3.msra.mxu1 %v1440_v16 }
 0x442   :  { %v1141_v22 = vadd.f32 %v3410_v47, %v3304_v20  ;;  %v1405_v20 = vld [vmem:[%s5278_s7] sm:$0xff]  ;;  %3589 = vmatprep.subr.mxu1 %v4032_v33 }
 0x443   :  { %3590 = vmatpush3.msra.mxu1 %v1439_v21 }
 0x444   :  { %v1216_v58 = vadd.f32 %v3579_v11, %v1141_v22  ;;  %v1338_v22 = vpop.permute.xlu1 %1337  ;;  %3591 = vmatprep.subr.mxu1 %v4032_v33 }
 0x446   :  { %v1220_v45 = vmax.f32 %v1216_v58, 0.0  ;;  %v1438_v58 = vld [vmem:[%s5278_s7 + $0x108] sm:$0xff] }
 0x447   :  { %3592 = vmatpush3.msra.mxu1 %v1438_v58 }
 0x448   :  { %v1224_v4 = vrot.slane %v1220_v45, 1  ;;  %3593 = vmatprep.subr.mxu1 %v4032_v33 }
 0x44a   :  { %v1229_v19 = vsel %vm303_vm4, %v1224_v4, %v1223_v27  ;;  %v1225_v59 = vsel %vm303_vm4, %v1223_v27, %v1224_v4 }
 0x44b   :  { %v1231_v56 = vmax.f32 %v1220_v45, %v1229_v19  ;;  %v1230_v6 = vmax.f32 %v1219_v23, %v1225_v59  ;;  %v1437_v19 = vld [vmem:[%s5278_s7 + $0x100] sm:$0xff] }
 0x44c   :  { %3594 = vmatpush3.msra.mxu1 %v1437_v19 }
 0x44d   :  { %3581 = vmatpush3.msra.mxu0 %v1231_v56  ;;  %3598 = vmatprep.subr.mxu1 %v4032_v33  ;;  %v1343_v56 = vpop.permute.xlu0 %1342 }
 0x44e   :  { %3582 = vmatprep.subr.mxu0 %v4032_v33 }
 0x44f   :  { %3583 = vmatpush3.msra.mxu0 %v1230_v6  ;;  %v1314_v6 = vpop.permute.xlu1 %1313 }
 0x450   :  { %3585 = vmatmul.mubr.msk.f32.vlgmr.msra.gmra.mxu0 %vm567_vm9, %v1232_v57  ;;  %3420 = vmatprep.subr.mxu0 %v1436_v50 }
 0x451   :  { %3421 = vmatpush3.msra.mxu0 %v1420_v18 }
 0x452   :  { %3422 = vmatprep.subr.mxu0 %v1435_v12 }
 0x453   :  { %3423 = vmatpush3.msra.mxu0 %v1419_v24 }
 0x454   :  { %3424 = vmatprep.subr.mxu0 %v1434_v26 }
 0x455   :  { %3425 = vmatpush3.msra.mxu0 %v1418_v29 }
 0x456   :  { %3426 = vmatprep.subr.mxu0 %v1433_v30 }
 0x457   :  { %3427 = vmatpush3.msra.mxu0 %v1417_v14 }
 0x458   :  { %3428 = vmatprep.subr.mxu0 %v1432_v5 }
 0x459   :  { %3429 = vmatpush3.msra.mxu0 %v1416_v25 }
 0x45a   :  { %3430 = vmatprep.subr.mxu0 %v1431_v31 }
 0x45b   :  { %3431 = vmatpush3.msra.mxu0 %v1415_v9 }
 0x45c   :  { %3432 = vmatprep.subr.mxu0 %v1430_v28 }
 0x45d   :  { %3433 = vmatpush3.msra.mxu0 %v1414_v2 }
 0x45e   :  { %3434 = vmatprep.subr.mxu0 %v1429_v35 }
 0x45f   :  { %3435 = vmatpush3.msra.mxu0 %v1413_v10 }
 0x460   :  { %3436 = vmatprep.subr.mxu0 %v1428_v15 }
 0x461   :  { %3437 = vmatpush3.msra.mxu0 %v1412_v38 }
 0x462   :  { %3438 = vmatprep.subr.mxu0 %v1427_v40  ;;  %v4901_v40 = vld [vmem:[%s5287_s16 + $0x18] sm:$0xff] }
 0x463   :  { %3439 = vmatpush3.msra.mxu0 %v1411_v41  ;;  %v4908_v41 = vld [vmem:[%s5287_s16 + $0x10] sm:$0xff] }
 0x464   :  { %3440 = vmatprep.subr.mxu0 %v1426_v43 }
 0x465   :  { %3441 = vmatpush3.msra.mxu0 %v1410_v60 }
 0x466   :  { %3442 = vmatprep.subr.mxu0 %v1425_v17  ;;  %v3308_v17 = vld [vmem:[%s5279_s8] ss:$0 sm:$0xff] }
 0x467   :  { %3443 = vmatpush3.msra.mxu0 %v1409_v44 }
 0x468   :  { %3444 = vmatprep.subr.mxu0 %v1424_v39  ;;  %v1591_v39 = vld [vmem:[%s5285_s14] sm:$0xff] }
 0x469   :  { %3445 = vmatpush3.msra.mxu0 %v1408_v48 }
 0x46a   :  { %3446 = vmatprep.subr.mxu0 %v1423_v8  ;;  %v1668_v8 = vld [vmem:[%s5286_s15 + $0x18] sm:$0xff] }
 0x46b   :  { %3447 = vmatpush3.msra.mxu0 %v1407_v36  ;;  %v1667_v36 = vld [vmem:[%s5286_s15 + $0x10] sm:$0xff] }
 0x46c   :  { %3448 = vmatprep.subr.mxu0 %v1422_v51  ;;  %v1665_v51 = vld [vmem:[%s5286_s15] sm:$0xff] }
 0x46d   :  { %3449 = vmatpush3.msra.mxu0 %v1406_v54  ;;  %v4946_v54 = vld [vmem:[%s5287_s16] sm:$0xff] }
 0x46e   :  { %3450 = vmatprep.subr.mxu0 %v1421_v52 }
 0x46f   :  { %3451 = vmatpush3.msra.mxu0 %v1405_v20 }
 0x470   :  { %3614 = vmatprep.subr.mxu0 %v4032_v33 }
 0x510   :  { %v4847_v53 = vpop.f32.mrf.mxu0 }
 0x511   :  { %v1325_v13 = vrot.slane %v4847_v53, 6  ;;  %v1354_v7 = vrot.slane %v4847_v53, 2  ;;  %v1317_v34 = vrot.slane %v4847_v53, 5  ;;  %v1346_v32 = vrot.slane %v4847_v53, 1 }
 0x512   :  { %v3586_v1 = vpop.f32.mrf.mxu0  ;;  %v1333_v11 = vrot.slane %v4847_v53, 7  ;;  %v1362_v42 = vrot.slane %v4847_v53, 3  ;;  %v1308_v57 = vrot.slane %v4847_v53, 4  ;;  %v1345_v29 = vmul.f32 %v1343_v56, %v4847_v53  ;;  %v4940_v53 = vld [vmem:[%s5287_s16 + $0x8] sm:$0xff] }
 0x513   :  { %v1332_v63 = vmul.f32 %v1330_v0, %v1325_v13  ;;  %v1361_v55 = vmul.f32 %v1359_v37, %v1354_v7  ;;  %v1324_v61 = vmul.f32 %v1322_v3, %v1317_v34  ;;  %v1353_v47 = vmul.f32 %v1351_v46, %v1346_v32  ;;  %v3311_v0 = vld [vmem:[%s5288_s17] ss:$0 sm:$0xff] }
 0x514   :  { %v1340_v27 = vmul.f32 %v1338_v22, %v1333_v11  ;;  %v1369_v4 = vmul.f32 %v1367_v49, %v1362_v42  ;;  %v1316_v12 = vmul.f32 %v1314_v6, %v1308_v57  ;;  %v1666_v49 = vld [vmem:[%s5286_s15 + $0x8] sm:$0xff] }
 0x515   :  { %v3882_v23 = vpack.i.bf16 %v1332_v63, %v1361_v55  ;;  %v3877_v45 = vpack.i.bf16 %v1324_v61, %v1353_v47 }
 0x516   :  { %v3887_v59 = vpack.i.bf16 %v1340_v27, %v1369_v4 }
 0x517   :  { %3883 = vrot.lane.b32.xlu0 %v3882_v23, %s4030_s23  ;;  %3878 = vrot.lane.b32.xlu1 %v3877_v45, %s4029_s28 }
 0x51b   :  { %1371 = vperm.xlu0 %3892, %v4731_v62   ;;  %3888 = vrot.lane.b32.xlu1 %v3887_v59, %s4031_s26 }
 0x589   :  { %v3884_v50 = vpop.permute.xlu0 %3883  ;;  %v3879_v18 = vpop.permute.xlu1 %3878 }
 0x58a   :  { %v3881_v24 = vunpack.i.h.bf16 %v3879_v18  ;;  %v3880_v26 = vunpack.i.l.bf16 %v3879_v18  ;;  %v3886_v30 = vunpack.i.h.bf16 %v3884_v50  ;;  %v3885_v14 = vunpack.i.l.bf16 %v3884_v50 }
 0x58c   :  { %v1399_v5 = vsel %vm587_vm14, %v1316_v12, %v3881_v24  ;;  %v1402_v62 = vsel %vm587_vm14, %v1345_v29, %v3880_v26 }
 0x58d   :  { %v3889_v25 = vpop.permute.xlu1 %3888  ;;  %v1403_v28 = vsel %vm1008_vm0, %v1402_v62, %v3885_v14  ;;  %v1400_v2 = vsel %vm1008_vm0, %v1399_v5, %v3886_v30 }
 0x58e   :  { %v3891_v31 = vunpack.i.h.bf16 %v3889_v25  ;;  %v3890_v9 = vunpack.i.l.bf16 %v3889_v25 }
 0x590   :  { %v1404_v35 = vsel %vm1011_vm1, %v1403_v28, %v3890_v9  ;;  %v1401_v10 = vsel %vm1011_vm1, %v1400_v2, %v3891_v31 }
 0x591   :  { %1515 = vmatprep.mubr.f32.mxu0 %v1404_v35 }
 0x592   :  { %1516 = vmatmul.mubr.f32.vlgmr.msra.gmra.mxu0 %v1401_v10 }
 0x593   :  { %3622 = vmatprep.mubr.msk.f32.mxu0 %vm4033_vm3, %v4032_v33  ;;  %3615 = vmatpush3.msra.mxu0 %v4901_v40 }
 0x594   :  { %3616 = vmatprep.subr.mxu0 %v4032_v33 }
 0x595   :  { %3617 = vmatpush3.msra.mxu0 %v4908_v41 }
 0x596   :  { %v1372_v15 = vpop.permute.xlu0 %1371  ;;  %3618 = vmatprep.subr.mxu0 %v4032_v33 }
 0x597   :  { %v1374_v38 = vmul.f32 %v1372_v15, %v1308_v57  ;;  %3619 = vmatpush3.msra.mxu0 %v4940_v53 }
 0x598   :  { %3620 = vmatprep.subr.mxu0 %v4032_v33 }
 0x599   :  { %3596 = vmatmul.mubr.msk.f32.vlgmr.msra.gmra.mxu1 %vm587_vm14, %v1374_v38  ;;  %3621 = vmatpush3.msra.mxu0 %v4946_v54 }
 0x59a   :  { %3600 = vmatprep.mubr.msk.f32.mxu1 %vm4033_vm3, %v4032_v33  ;;  %3623 = vmatmul.mubr.f32.vlgmr.msra.gmra.mxu0 %v4032_v33 }
 0x59b   :  { %3636 = vmatprep.subr.mxu0 %v4032_v33  ;;  %3644 = vmatprep.mubr.msk.f32.mxu0 %vm4033_vm3, %v4032_v33 }
 0x59c   :  { %3637 = vmatpush3.msra.mxu0 %v4901_v40 }
 0x59d   :  { %3638 = vmatprep.subr.mxu0 %v4032_v33 }
 0x59e   :  { %3639 = vmatpush3.msra.mxu0 %v4908_v41 }
 0x59f   :  { %3640 = vmatprep.subr.mxu0 %v4032_v33 }
 0x5a0   :  { %3641 = vmatpush3.msra.mxu0 %v4940_v53 }
 0x5a1   :  { %3642 = vmatprep.subr.mxu0 %v4032_v33 }
 0x5a2   :  { %3643 = vmatpush3.msra.mxu0 %v4946_v54 }
 0x5a3   :  { %3658 = vmatprep.subr.mxu0 %v4032_v33 }
 0x652   :  { %v3452_v43 = vpop.f32.mrf.mxu0 }
 0x654   :  { %v3453_v60 = vpop.f32.mrf.mxu0 }
 0x655   :  { %v3454_v44 = vadd.f32 %v3453_v60, %v3452_v43 }
 0x657   :  { %v1518_v3 = vadd.f32 %v3454_v44, %v3308_v17 }
 0x659   :  { %v1587_v37 = vpop.f32.mrf.mxu1 }
 0x65a   :  { %v1588_v46 = vadd.f32 %v1587_v37, %v1518_v3  ;;  %v1822_v34 = vpop.f32.mrf.mxu0 }
 0x65b   :  { %v3597_v48 = vpop.f32.mrf.mxu1 }
 0x65c   :  { %3599 = vmatpush3.msra.mxu1 %v1588_v46  ;;  %v3624_v52 = vpop.f32.mrf.mxu0 }
 0x65d   :  { %3601 = vmatmul.mubr.msk.f32.vlgmr.msra.gmra.mxu1 %vm557_vm8, %v1591_v39  ;;  %3603 = vmatprep.subr.mxu1 %v4032_v33 }
 0x65e   :  { %3604 = vmatpush3.msra.mxu1 %v1668_v8  ;;  %3611 = vmatprep.mubr.msk.f32.mxu1 %vm4033_vm3, %v4032_v33 }
 0x65f   :  { %3605 = vmatprep.subr.mxu1 %v4032_v33 }
 0x660   :  { %3606 = vmatpush3.msra.mxu1 %v1667_v36 }
 0x661   :  { %3607 = vmatprep.subr.mxu1 %v4032_v33 }
 0x662   :  { %3608 = vmatpush3.msra.mxu1 %v1666_v49 }
 0x663   :  { %3609 = vmatprep.subr.mxu1 %v4032_v33 }
 0x664   :  { %3610 = vmatpush3.msra.mxu1 %v1665_v51 }
 0x665   :  { %3625 = vmatprep.subr.mxu1 %v4032_v33 }
 0x71d   :  { %v1661_v13 = vpop.f32.mrf.mxu1 }
 0x71e   :  { %3612 = vmatmul.mubr.msk.f32.vlgmr.msra.gmra.mxu1 %vm587_vm14, %v1661_v13 }
 0x71f   :  { %v3602_v7 = vpop.f32.mrf.mxu1  ;;  %3626 = vmatpush3.msra.mxu1 %v4901_v40  ;;  %3633 = vmatprep.mubr.msk.f32.mxu1 %vm4033_vm3, %v4032_v33 }
 0x720   :  { %3627 = vmatprep.subr.mxu1 %v4032_v33 }
 0x721   :  { %3628 = vmatpush3.msra.mxu1 %v4908_v41 }
 0x722   :  { %3629 = vmatprep.subr.mxu1 %v4032_v33 }
 0x723   :  { %3630 = vmatpush3.msra.mxu1 %v4940_v53 }
 0x724   :  { %3631 = vmatprep.subr.mxu1 %v4032_v33 }
 0x725   :  { %3632 = vmatpush3.msra.mxu1 %v4946_v54 }
 0x726   :  { %3647 = vmatprep.subr.mxu1 %v4032_v33 }
 0x7de   :  { %v1745_v1 = vpop.f32.mrf.mxu1 }
 0x7df   :  { %v4977_v32 = vadd.f32 %v3311_v0, %v1745_v1 }
 0x7e0   :  { %v3613_v11 = vpop.f32.mrf.mxu1 }
 0x7e1   :  { %v1826_v42 = vadd.f32 %v1822_v34, %v4977_v32 }
 0x7e3   :  { %3895 = vtanh.f32 %v1826_v42  ;;  %v3313_v63 = vmul.f32 -1.442695, %v1826_v42 }
 0x7e5   :  { %3897 = vpow2.f32 %v3313_v63 }
 0x7f0   :  { %v3896_v20 = vpop.eup %3895 }
 0x7f1   :  { %1836 = vrot.lane.b32.xlu1 %v3896_v20, %s4030_s23 }
 0x7f2   :  { %v3898_v55 = vpop.eup %3897 }
 0x7f3   :  { %v1830_v61 = vadd.f32 1.0, %v3898_v55 }
 0x7f5   :  { %3899 = vrcp.f32 %v1830_v61 }
 0x802   :  { %v3900_v16 = vpop.eup %3899 }
 0x803   :  { %v1834_v22 = vmul.f32 0.0, %v3900_v16 }
 0x863   :  { %v1837_v21 = vpop.permute.xlu1 %1836 }
 0x864   :  { %v1839_v47 = vmul.f32 %v3900_v16, %v1837_v21 }
 0x866   :  { %1841 = vrot.lane.b32.xlu1 %v1839_v47, %s4029_s28 }
 0x8d8   :  { %v1842_v23 = vpop.permute.xlu1 %1841 }
 0x8d9   :  { %v1844_v58 = vadd.f32 %v1842_v23, %v1834_v22 }
 0x8db   :  { %3901 = vtanh.f32 %v1844_v58  ;;  %v1938_v14 = vrot.slane %v1844_v58, 6  ;;  %v3322_v58 = vld [vmem:[%s5286_s15 + $0x30] sm:$0xff] }
 0x8e8   :  { %v3902_v45 = vpop.eup %3901 }
 0x8e9   :  { %1847 = vrot.lane.b32.xlu0 %v3902_v45, %s4030_s23  ;;  %v5031_v45 = vld [vmem:[%s5287_s16 + $0x38] sm:$0xff] }
 0x95b   :  { %v1848_v27 = vpop.permute.xlu0 %1847 }
 0x95c   :  { %v4983_v4 = vmul.f32 %v3900_v16, %v1848_v27  ;;  %v5037_v27 = vld [vmem:[%s5287_s16 + $0x30] sm:$0xff] }
 0x95e   :  { %1852 = vrot.lane.b32.xlu1 %v4983_v4, %s4029_s28 }
 0x9d0   :  { %v1853_v19 = vpop.permute.xlu1 %1852 }
 0x9d1   :  { %3634 = vmatmul.mubr.msk.f32.vlgmr.msra.gmra.mxu1 %vm587_vm14, %v1853_v19  ;;  %v5047_v19 = vld [vmem:[%s5287_s16 + $0x28] sm:$0xff] }
 0x9d2   :  { %3648 = vmatpush3.msra.mxu1 %v4901_v40  ;;  %3655 = vmatprep.mubr.msk.f32.mxu1 %vm4033_vm3, %v4032_v33 }
 0x9d3   :  { %3649 = vmatprep.subr.mxu1 %v4032_v33 }
 0x9d4   :  { %3650 = vmatpush3.msra.mxu1 %v4908_v41 }
 0x9d5   :  { %3651 = vmatprep.subr.mxu1 %v4032_v33 }
 0x9d6   :  { %3652 = vmatpush3.msra.mxu1 %v4940_v53 }
 0x9d7   :  { %3653 = vmatprep.subr.mxu1 %v4032_v33 }
 0x9d8   :  { %3654 = vmatpush3.msra.mxu1 %v4946_v54 }
 0x9d9   :  { %3669 = vmatprep.subr.mxu1 %v4032_v33 }
 0xa91   :  { %v1922_v59 = vpop.f32.mrf.mxu1 }
 0xa92   :  { %v1927_v56 = vrot.slane %v1922_v59, 6  ;;  %v3320_v59 = vld [vmem:[%s5286_s15 + $0x20] sm:$0xff] }
 0xa93   :  { %v3635_v6 = vpop.f32.mrf.mxu1 }
 0xa94   :  { %v1929_v57 = vadd.f32 %v1927_v56, %v4977_v32  ;;  %v5063_v6 = vld [vmem:[%s5287_s16 + $0x20] sm:$0xff] }
 0xa96   :  { %3903 = vtanh.f32 %v1929_v57  ;;  %v3315_v18 = vmul.f32 -1.442695, %v1929_v57 }
 0xa98   :  { %3905 = vpow2.f32 %v3315_v18 }
 0xaa3   :  { %v3904_v50 = vpop.eup %3903 }
 0xaa4   :  { %1942 = vrot.lane.b32.xlu0 %v3904_v50, %s4030_s23 }
 0xaa5   :  { %v3906_v12 = vpop.eup %3905 }
 0xaa6   :  { %v1933_v24 = vadd.f32 1.0, %v3906_v12 }
 0xaa8   :  { %3907 = vrcp.f32 %v1933_v24 }
 0xab5   :  { %v3908_v26 = vpop.eup %3907 }
 0xab6   :  { %v1940_v5 = vmul.f32 %v3908_v26, %v1938_v14 }
 0xb16   :  { %v1943_v29 = vpop.permute.xlu0 %1942 }
 0xb17   :  { %v1945_v30 = vmul.f32 %v3908_v26, %v1943_v29  ;;  %v3325_v29 = vld [vmem:[%s5288_s17 + $0x1] ss:$0 sm:$0xff] }
 0xb19   :  { %1947 = vrot.lane.b32.xlu1 %v1945_v30, %s4029_s28 }
 0xb8b   :  { %v1948_v62 = vpop.permute.xlu1 %1947 }
 0xb8c   :  { %v1950_v25 = vadd.f32 %v1948_v62, %v1940_v5 }
 0xb8e   :  { %3909 = vtanh.f32 %v1950_v25  ;;  %v2045_v46 = vrot.slane %v1950_v25, 6 }
 0xb9b   :  { %v3910_v31 = vpop.eup %3909 }
 0xb9c   :  { %1953 = vrot.lane.b32.xlu0 %v3910_v31, %s4030_s23 }
 0xc0e   :  { %v1954_v9 = vpop.permute.xlu0 %1953 }
 0xc0f   :  { %v1956_v28 = vmul.f32 %v3908_v26, %v1954_v9 }
 0xc11   :  { %v1958_v2 = vrot.slane %v1956_v28, 2  ;;  %v2171_v53 = vsel %vm217_vm2, %v4983_v4, %v1956_v28  ;;  %v3321_v4 = vld [vmem:[%s5286_s15 + $0x28] sm:$0xff] }
 0xc13   :  { %1959 = vrot.lane.b32.xlu1 %v1958_v2, %s4029_s28 }
 0xc85   :  { %v1960_v35 = vpop.permute.xlu1 %1959 }
 0xc86   :  { %3645 = vmatmul.mubr.msk.f32.vlgmr.msra.gmra.mxu0 %vm587_vm14, %v1960_v35 }
 0xc87   :  { %3666 = vmatprep.mubr.msk.f32.mxu0 %vm4033_vm3, %v4032_v33 }
 0xd46   :  { %v2029_v10 = vpop.f32.mrf.mxu0 }
 0xd47   :  { %v2034_v15 = vrot.slane %v2029_v10, 4 }
 0xd48   :  { %v3646_v38 = vpop.f32.mrf.mxu0 }
 0xd49   :  { %v2036_v40 = vadd.f32 %v2034_v15, %v4977_v32 }
 0xd4b   :  { %3911 = vtanh.f32 %v2036_v40  ;;  %v3317_v43 = vmul.f32 -1.442695, %v2036_v40 }
 0xd4d   :  { %3913 = vpow2.f32 %v3317_v43 }
 0xd58   :  { %v3912_v41 = vpop.eup %3911 }
 0xd59   :  { %2049 = vrot.lane.b32.xlu0 %v3912_v41, %s4030_s23 }
 0xd5a   :  { %v3914_v60 = vpop.eup %3913 }
 0xd5b   :  { %v2040_v17 = vadd.f32 1.0, %v3914_v60 }
 0xd5d   :  { %3915 = vrcp.f32 %v2040_v17 }
 0xd6a   :  { %v3916_v44 = vpop.eup %3915 }
 0xd6b   :  { %v2047_v39 = vmul.f32 %v3916_v44, %v2045_v46 }
 0xdcb   :  { %v2050_v3 = vpop.permute.xlu0 %2049 }
 0xdcc   :  { %v2052_v37 = vmul.f32 %v3916_v44, %v2050_v3 }
 0xdce   :  { %2054 = vrot.lane.b32.xlu1 %v2052_v37, %s4029_s28 }
 0xe40   :  { %v2055_v48 = vpop.permute.xlu1 %2054 }
 0xe41   :  { %v2057_v8 = vadd.f32 %v2055_v48, %v2047_v39 }
 0xe43   :  { %3917 = vtanh.f32 %v2057_v8  ;;  %v2152_v21 = vrot.slane %v2057_v8, 6 }
 0xe50   :  { %v3918_v36 = vpop.eup %3917 }
 0xe51   :  { %2060 = vrot.lane.b32.xlu0 %v3918_v36, %s4030_s23 }
 0xec3   :  { %v2061_v49 = vpop.permute.xlu0 %2060 }
 0xec4   :  { %v2063_v51 = vmul.f32 %v3916_v44, %v2061_v49 }
 0xec6   :  { %v2065_v54 = vrot.slane %v2063_v51, 4  ;;  %v5013_v13 = vsel %vm145_vm7, %v2171_v53, %v2063_v51 }
 0xec8   :  { %2066 = vrot.lane.b32.xlu1 %v2065_v54, %s4029_s28 }
 0xf3a   :  { %v2067_v7 = vpop.permute.xlu1 %2066 }
 0xf3b   :  { %3656 = vmatmul.mubr.msk.f32.vlgmr.msra.gmra.mxu1 %vm587_vm14, %v2067_v7 }
 0xf3c   :  { %3677 = vmatprep.mubr.msk.f32.mxu1 %vm4033_vm3, %v4032_v33  ;;  %3670 = vmatpush3.msra.mxu1 %v5031_v45 }
 0xf3d   :  { %3671 = vmatprep.subr.mxu1 %v4032_v33 }
 0xf3e   :  { %3672 = vmatpush3.msra.mxu1 %v5037_v27 }
 0xf3f   :  { %3673 = vmatprep.subr.mxu1 %v4032_v33 }
 0xf40   :  { %3674 = vmatpush3.msra.mxu1 %v5047_v19 }
 0xf41   :  { %3675 = vmatprep.subr.mxu1 %v4032_v33 }
 0xf42   :  { %3676 = vmatpush3.msra.mxu1 %v5063_v6 }
 0xf43   :  { %3678 = vmatmul.mubr.f32.vlgmr.msra.gmra.mxu1 %v4032_v33  ;;  %3691 = vmatprep.subr.mxu1 %v4032_v33 }
 0xf44   :  { %3692 = vmatpush3.msra.mxu1 %v5031_v45  ;;  %3699 = vmatprep.mubr.msk.f32.mxu1 %vm4033_vm3, %v4032_v33 }
 0xf45   :  { %3693 = vmatprep.subr.mxu1 %v4032_v33 }
 0xf46   :  { %3694 = vmatpush3.msra.mxu1 %v5037_v27 }
 0xf47   :  { %3695 = vmatprep.subr.mxu1 %v4032_v33 }
 0xf48   :  { %3696 = vmatpush3.msra.mxu1 %v5047_v19 }
 0xf49   :  { %3697 = vmatprep.subr.mxu1 %v4032_v33 }
 0xf4a   :  { %3698 = vmatpush3.msra.mxu1 %v5063_v6 }
 0xf4b   :  { %3713 = vmatprep.subr.mxu1 %v4032_v33 }
 0xffb   :  { %v2136_v34 = vpop.f32.mrf.mxu1 }
 0xffc   :  { %v2141_v52 = vrot.slane %v2136_v34, 2 }
 0xffd   :  { %v3657_v0 = vpop.f32.mrf.mxu1 }
 0xffe   :  { %v2143_v1 = vadd.f32 %v2141_v52, %v4977_v32  ;;  %v3323_v32 = vld [vmem:[%s5286_s15 + $0x38] sm:$0xff] }
 0xfff   :  { %3659 = vmatpush3.msra.mxu0 %v3323_v32 }
0x1000   :  { %3919 = vtanh.f32 %v2143_v1  ;;  %v3319_v42 = vmul.f32 -1.442695, %v2143_v1  ;;  %3660 = vmatprep.subr.mxu0 %v4032_v33 }
0x1001   :  { %3661 = vmatpush3.msra.mxu0 %v3322_v58 }
0x1002   :  { %3921 = vpow2.f32 %v3319_v42  ;;  %3662 = vmatprep.subr.mxu0 %v4032_v33 }
0x1003   :  { %3663 = vmatpush3.msra.mxu0 %v3321_v4  ;;  %v2333_v24 = vpop.f32.mrf.mxu1 }
0x1004   :  { %3664 = vmatprep.subr.mxu0 %v4032_v33 }
0x1005   :  { %3665 = vmatpush3.msra.mxu0 %v3320_v59  ;;  %v3679_v26 = vpop.f32.mrf.mxu1 }
0x1006   :  { %3680 = vmatprep.subr.mxu0 %v4032_v33 }
0x100d   :  { %v3920_v11 = vpop.eup %3919 }
0x100e   :  { %2156 = vrot.lane.b32.xlu0 %v3920_v11, %s4030_s23 }
0x100f   :  { %v3922_v20 = vpop.eup %3921 }
0x1010   :  { %v2147_v63 = vadd.f32 1.0, %v3922_v20 }
0x1012   :  { %3923 = vrcp.f32 %v2147_v63 }
0x101f   :  { %v3924_v55 = vpop.eup %3923 }
0x1020   :  { %v2154_v47 = vmul.f32 %v3924_v55, %v2152_v21 }
0x1080   :  { %v2157_v61 = vpop.permute.xlu0 %2156 }
0x1081   :  { %v2159_v16 = vmul.f32 %v3924_v55, %v2157_v61 }
0x1083   :  { %2161 = vrot.lane.b32.xlu1 %v2159_v16, %s4029_s28 }
0x10f5   :  { %v2162_v22 = vpop.permute.xlu1 %2161 }
0x10f6   :  { %v2164_v23 = vadd.f32 %v2162_v22, %v2154_v47 }
0x10f8   :  { %3925 = vtanh.f32 %v2164_v23 }
0x1105   :  { %v3926_v56 = vpop.eup %3925 }
0x1106   :  { %2167 = vrot.lane.b32.xlu0 %v3926_v56, %s4030_s23 }
0x1178   :  { %v2168_v57 = vpop.permute.xlu0 %2167 }
0x1179   :  { %v2170_v50 = vmul.f32 %v3924_v55, %v2168_v57 }
0x117b   :  { %v2173_v18 = vsel %vm337_vm5, %v5013_v13, %v2170_v50 }
0x117c   :  { %2188 = vrot.lane.b32.xlu1 %v2173_v18, %s4029_s28 }
0x11ee   :  { %v2189_v12 = vpop.permute.xlu1 %2188 }
0x11ef   :  { %3667 = vmatmul.mubr.msk.f32.vlgmr.msra.gmra.mxu0 %vm587_vm14, %v2189_v12 }
0x11f0   :  { %3681 = vmatpush3.msra.mxu0 %v5031_v45  ;;  %3688 = vmatprep.mubr.msk.f32.mxu0 %vm4033_vm3, %v4032_v33 }
0x11f1   :  { %3682 = vmatprep.subr.mxu0 %v4032_v33 }
0x11f2   :  { %3683 = vmatpush3.msra.mxu0 %v5037_v27 }
0x11f3   :  { %3684 = vmatprep.subr.mxu0 %v4032_v33 }
0x11f4   :  { %3685 = vmatpush3.msra.mxu0 %v5047_v19 }
0x11f5   :  { %3686 = vmatprep.subr.mxu0 %v4032_v33 }
0x11f6   :  { %3687 = vmatpush3.msra.mxu0 %v5063_v6 }
0x11f7   :  { %3702 = vmatprep.subr.mxu0 %v4032_v33 }
0x12af   :  { %v2258_v30 = vpop.f32.mrf.mxu0 }
0x12b0   :  { %v5095_v14 = vadd.f32 %v3325_v29, %v2258_v30 }
0x12b1   :  { %v3668_v5 = vpop.f32.mrf.mxu0 }
0x12b2   :  { %v2337_v62 = vadd.f32 %v2333_v24, %v5095_v14 }
0x12b4   :  { %3927 = vtanh.f32 %v2337_v62  ;;  %v3331_v31 = vmul.f32 -1.442695, %v2337_v62 }
0x12b6   :  { %3929 = vpow2.f32 %v3331_v31 }
0x12c1   :  { %v3928_v25 = vpop.eup %3927 }
0x12c2   :  { %2347 = vrot.lane.b32.xlu0 %v3928_v25, %s4030_s23 }
0x12c3   :  { %v3930_v9 = vpop.eup %3929 }
0x12c4   :  { %v2341_v28 = vadd.f32 1.0, %v3930_v9 }
0x12c6   :  { %3931 = vrcp.f32 %v2341_v28 }
0x12d3   :  { %v3932_v2 = vpop.eup %3931 }
0x12d4   :  { %v2345_v15 = vmul.f32 0.0, %v3932_v2 }
0x1334   :  { %v2348_v35 = vpop.permute.xlu0 %2347 }
0x1335   :  { %v2350_v10 = vmul.f32 %v3932_v2, %v2348_v35 }
0x1337   :  { %2352 = vrot.lane.b32.xlu1 %v2350_v10, %s4029_s28 }
0x13a9   :  { %v2353_v38 = vpop.permute.xlu1 %2352 }
0x13aa   :  { %v2355_v40 = vadd.f32 %v2353_v38, %v2345_v15 }
0x13ac   :  { %3933 = vtanh.f32 %v2355_v40  ;;  %v2449_v54 = vrot.slane %v2355_v40, 6  ;;  %v3340_v40 = vld [vmem:[%s5286_s15 + $0x50] sm:$0xff] }
0x13b9   :  { %v3934_v41 = vpop.eup %3933 }
0x13ba   :  { %2358 = vrot.lane.b32.xlu0 %v3934_v41, %s4030_s23  ;;  %v5149_v41 = vld [vmem:[%s5287_s16 + $0x58] sm:$0xff] }
0x142c   :  { %v2359_v43 = vpop.permute.xlu0 %2358 }
0x142d   :  { %v5101_v60 = vmul.f32 %v3932_v2, %v2359_v43  ;;  %v5155_v43 = vld [vmem:[%s5287_s16 + $0x50] sm:$0xff] }
0x142f   :  { %2363 = vrot.lane.b32.xlu1 %v5101_v60, %s4029_s28 }
0x14a1   :  { %v2364_v17 = vpop.permute.xlu1 %2363 }
0x14a2   :  { %3689 = vmatmul.mubr.msk.f32.vlgmr.msra.gmra.mxu0 %vm587_vm14, %v2364_v17  ;;  %v5165_v17 = vld [vmem:[%s5287_s16 + $0x48] sm:$0xff] }
0x14a3   :  { %3703 = vmatpush3.msra.mxu0 %v5031_v45  ;;  %3710 = vmatprep.mubr.msk.f32.mxu0 %vm4033_vm3, %v4032_v33 }
0x14a4   :  { %3704 = vmatprep.subr.mxu0 %v4032_v33 }
0x14a5   :  { %3705 = vmatpush3.msra.mxu0 %v5037_v27 }
0x14a6   :  { %3706 = vmatprep.subr.mxu0 %v4032_v33 }
0x14a7   :  { %3707 = vmatpush3.msra.mxu0 %v5047_v19 }
0x14a8   :  { %3708 = vmatprep.subr.mxu0 %v4032_v33 }
0x14a9   :  { %3709 = vmatpush3.msra.mxu0 %v5063_v6 }
0x14aa   :  { %3724 = vmatprep.subr.mxu0 %v4032_v33 }
0x1562   :  { %v2433_v44 = vpop.f32.mrf.mxu0 }
0x1563   :  { %v2438_v3 = vrot.slane %v2433_v44, 6  ;;  %v3338_v44 = vld [vmem:[%s5286_s15 + $0x40] sm:$0xff] }
0x1564   :  { %v3690_v37 = vpop.f32.mrf.mxu0 }
0x1565   :  { %v2440_v46 = vadd.f32 %v2438_v3, %v5095_v14  ;;  %v5181_v37 = vld [vmem:[%s5287_s16 + $0x40] sm:$0xff] }
0x1567   :  { %3935 = vtanh.f32 %v2440_v46  ;;  %v3333_v48 = vmul.f32 -1.442695, %v2440_v46 }
0x1569   :  { %3937 = vpow2.f32 %v3333_v48 }
0x1574   :  { %v3936_v39 = vpop.eup %3935 }
0x1575   :  { %2453 = vrot.lane.b32.xlu0 %v3936_v39, %s4030_s23 }
0x1576   :  { %v3938_v8 = vpop.eup %3937 }
0x1577   :  { %v2444_v36 = vadd.f32 1.0, %v3938_v8 }
0x1579   :  { %3939 = vrcp.f32 %v2444_v36 }
0x1586   :  { %v3940_v49 = vpop.eup %3939 }
0x1587   :  { %v2451_v13 = vmul.f32 %v3940_v49, %v2449_v54 }
0x15e7   :  { %v2454_v51 = vpop.permute.xlu0 %2453 }
0x15e8   :  { %v2456_v53 = vmul.f32 %v3940_v49, %v2454_v51  ;;  %v3343_v51 = vld [vmem:[%s5288_s17 + $0x2] ss:$0 sm:$0xff] }
0x15ea   :  { %2458 = vrot.lane.b32.xlu1 %v2456_v53, %s4029_s28 }
0x165c   :  { %v2459_v7 = vpop.permute.xlu1 %2458 }
0x165d   :  { %v2461_v34 = vadd.f32 %v2459_v7, %v2451_v13 }
0x165f   :  { %3941 = vtanh.f32 %v2461_v34  ;;  %v2556_v45 = vrot.slane %v2461_v34, 6 }
0x166c   :  { %v3942_v52 = vpop.eup %3941 }
0x166d   :  { %2464 = vrot.lane.b32.xlu0 %v3942_v52, %s4030_s23 }
0x16df   :  { %v2465_v0 = vpop.permute.xlu0 %2464 }
0x16e0   :  { %v2467_v1 = vmul.f32 %v3940_v49, %v2465_v0 }
0x16e2   :  { %v2469_v11 = vrot.slane %v2467_v1, 2  ;;  %v2682_v57 = vsel %vm217_vm2, %v5101_v60, %v2467_v1  ;;  %v3339_v60 = vld [vmem:[%s5286_s15 + $0x48] sm:$0xff]  ;;  %vm3280_vm2 = vcmask 33792  }
0x16e4   :  { %2470 = vrot.lane.b32.xlu1 %v2469_v11, %s4029_s28 }
0x1756   :  { %v2471_v42 = vpop.permute.xlu1 %2470 }
0x1757   :  { %3700 = vmatmul.mubr.msk.f32.vlgmr.msra.gmra.mxu1 %vm587_vm14, %v2471_v42 }
0x1758   :  { %3721 = vmatprep.mubr.msk.f32.mxu1 %vm4033_vm3, %v4032_v33 }
0x1817   :  { %v2540_v20 = vpop.f32.mrf.mxu1 }
0x1818   :  { %v2545_v63 = vrot.slane %v2540_v20, 4 }
0x1819   :  { %v3701_v55 = vpop.f32.mrf.mxu1 }
0x181a   :  { %v2547_v61 = vadd.f32 %v2545_v63, %v5095_v14 }
0x181c   :  { %3943 = vtanh.f32 %v2547_v61  ;;  %v3335_v21 = vmul.f32 -1.442695, %v2547_v61 }
0x181e   :  { %3945 = vpow2.f32 %v3335_v21 }
0x1829   :  { %v3944_v16 = vpop.eup %3943 }
0x182a   :  { %2560 = vrot.lane.b32.xlu0 %v3944_v16, %s4030_s23 }
0x182b   :  { %v3946_v47 = vpop.eup %3945 }
0x182c   :  { %v2551_v22 = vadd.f32 1.0, %v3946_v47 }
0x182e   :  { %3947 = vrcp.f32 %v2551_v22 }
0x183b   :  { %v3948_v23 = vpop.eup %3947 }
0x183c   :  { %v2558_v27 = vmul.f32 %v3948_v23, %v2556_v45 }
0x189c   :  { %v2561_v32 = vpop.permute.xlu0 %2560 }
0x189d   :  { %v2563_v58 = vmul.f32 %v3948_v23, %v2561_v32 }
0x189f   :  { %2565 = vrot.lane.b32.xlu1 %v2563_v58, %s4029_s28 }
0x1911   :  { %v2566_v4 = vpop.permute.xlu1 %2565 }
0x1912   :  { %v2568_v19 = vadd.f32 %v2566_v4, %v2558_v27 }
0x1914   :  { %3949 = vtanh.f32 %v2568_v19  ;;  %v2663_v35 = vrot.slane %v2568_v19, 6 }
0x1921   :  { %v3950_v59 = vpop.eup %3949 }
0x1922   :  { %2571 = vrot.lane.b32.xlu0 %v3950_v59, %s4030_s23 }
0x1994   :  { %v2572_v56 = vpop.permute.xlu0 %2571 }
0x1995   :  { %v2574_v6 = vmul.f32 %v3948_v23, %v2572_v56 }
0x1997   :  { %v2576_v50 = vrot.slane %v2574_v6, 4  ;;  %v5131_v18 = vsel %vm145_vm7, %v2682_v57, %v2574_v6 }
0x1999   :  { %2577 = vrot.lane.b32.xlu1 %v2576_v50, %s4029_s28 }
0x1a0b   :  { %v2578_v12 = vpop.permute.xlu1 %2577 }
0x1a0c   :  { %3711 = vmatmul.mubr.msk.f32.vlgmr.msra.gmra.mxu0 %vm587_vm14, %v2578_v12 }
0x1a0d   :  { %3732 = vmatprep.mubr.msk.f32.mxu0 %vm4033_vm3, %v4032_v33  ;;  %3725 = vmatpush3.msra.mxu0 %v5149_v41 }
0x1a0e   :  { %3726 = vmatprep.subr.mxu0 %v4032_v33 }
0x1a0f   :  { %3727 = vmatpush3.msra.mxu0 %v5155_v43 }
0x1a10   :  { %3728 = vmatprep.subr.mxu0 %v4032_v33 }
0x1a11   :  { %3729 = vmatpush3.msra.mxu0 %v5165_v17 }
0x1a12   :  { %3730 = vmatprep.subr.mxu0 %v4032_v33 }
0x1a13   :  { %3731 = vmatpush3.msra.mxu0 %v5181_v37 }
0x1a14   :  { %3733 = vmatmul.mubr.f32.vlgmr.msra.gmra.mxu0 %v4032_v33  ;;  %3746 = vmatprep.subr.mxu0 %v4032_v33 }
0x1a15   :  { %3747 = vmatpush3.msra.mxu0 %v5149_v41  ;;  %3754 = vmatprep.mubr.msk.f32.mxu0 %vm4033_vm3, %v4032_v33 }
0x1a16   :  { %3748 = vmatprep.subr.mxu0 %v4032_v33 }
0x1a17   :  { %3749 = vmatpush3.msra.mxu0 %v5155_v43 }
0x1a18   :  { %3750 = vmatprep.subr.mxu0 %v4032_v33 }
0x1a19   :  { %3751 = vmatpush3.msra.mxu0 %v5165_v17 }
0x1a1a   :  { %3752 = vmatprep.subr.mxu0 %v4032_v33 }
0x1a1b   :  { %3753 = vmatpush3.msra.mxu0 %v5181_v37 }
0x1a1c   :  { %3768 = vmatprep.subr.mxu0 %v4032_v33 }
0x1acc   :  { %v2647_v24 = vpop.f32.mrf.mxu0 }
0x1acd   :  { %v2652_v26 = vrot.slane %v2647_v24, 2 }
0x1ace   :  { %v3712_v29 = vpop.f32.mrf.mxu0 }
0x1acf   :  { %v2654_v30 = vadd.f32 %v2652_v26, %v5095_v14  ;;  %v3341_v14 = vld [vmem:[%s5286_s15 + $0x58] sm:$0xff] }
0x1ad0   :  { %3714 = vmatpush3.msra.mxu1 %v3341_v14 }
0x1ad1   :  { %3951 = vtanh.f32 %v2654_v30  ;;  %v3337_v62 = vmul.f32 -1.442695, %v2654_v30  ;;  %3715 = vmatprep.subr.mxu1 %v4032_v33 }
0x1ad2   :  { %3716 = vmatpush3.msra.mxu1 %v3340_v40 }
0x1ad3   :  { %3953 = vpow2.f32 %v3337_v62  ;;  %3717 = vmatprep.subr.mxu1 %v4032_v33 }
0x1ad4   :  { %3718 = vmatpush3.msra.mxu1 %v3339_v60  ;;  %v2844_v36 = vpop.f32.mrf.mxu0 }
0x1ad5   :  { %3719 = vmatprep.subr.mxu1 %v4032_v33 }
0x1ad6   :  { %3720 = vmatpush3.msra.mxu1 %v3338_v44  ;;  %v3734_v49 = vpop.f32.mrf.mxu0 }
0x1ad7   :  { %3735 = vmatprep.subr.mxu1 %v4032_v33 }
0x1ade   :  { %v3952_v5 = vpop.eup %3951 }
0x1adf   :  { %2667 = vrot.lane.b32.xlu0 %v3952_v5, %s4030_s23 }
0x1ae0   :  { %v3954_v25 = vpop.eup %3953 }
0x1ae1   :  { %v2658_v31 = vadd.f32 1.0, %v3954_v25 }
0x1ae3   :  { %3955 = vrcp.f32 %v2658_v31 }
0x1af0   :  { %v3956_v9 = vpop.eup %3955 }
0x1af1   :  { %v2665_v10 = vmul.f32 %v3956_v9, %v2663_v35 }
0x1b51   :  { %v2668_v28 = vpop.permute.xlu0 %2667 }
0x1b52   :  { %v2670_v2 = vmul.f32 %v3956_v9, %v2668_v28 }
0x1b54   :  { %2672 = vrot.lane.b32.xlu1 %v2670_v2, %s4029_s28 }
0x1bc6   :  { %v2673_v15 = vpop.permute.xlu1 %2672 }
0x1bc7   :  { %v2675_v38 = vadd.f32 %v2673_v15, %v2665_v10 }
0x1bc9   :  { %3957 = vtanh.f32 %v2675_v38 }
0x1bd6   :  { %v3958_v3 = vpop.eup %3957 }
0x1bd7   :  { %2678 = vrot.lane.b32.xlu0 %v3958_v3, %s4030_s23 }
0x1c49   :  { %v2679_v46 = vpop.permute.xlu0 %2678 }
0x1c4a   :  { %v2681_v39 = vmul.f32 %v3956_v9, %v2679_v46 }
0x1c4c   :  { %v2684_v48 = vsel %vm337_vm5, %v5131_v18, %v2681_v39 }
0x1c4d   :  { %2699 = vrot.lane.b32.xlu1 %v2684_v48, %s4029_s28 }
0x1cbf   :  { %v2700_v8 = vpop.permute.xlu1 %2699 }
0x1cc0   :  { %3722 = vmatmul.mubr.msk.f32.vlgmr.msra.gmra.mxu1 %vm587_vm14, %v2700_v8 }
0x1cc1   :  { %3736 = vmatpush3.msra.mxu1 %v5149_v41  ;;  %3743 = vmatprep.mubr.msk.f32.mxu1 %vm4033_vm3, %v4032_v33 }
0x1cc2   :  { %3737 = vmatprep.subr.mxu1 %v4032_v33 }
0x1cc3   :  { %3738 = vmatpush3.msra.mxu1 %v5155_v43 }
0x1cc4   :  { %3739 = vmatprep.subr.mxu1 %v4032_v33 }
0x1cc5   :  { %3740 = vmatpush3.msra.mxu1 %v5165_v17 }
0x1cc6   :  { %3741 = vmatprep.subr.mxu1 %v4032_v33 }
0x1cc7   :  { %3742 = vmatpush3.msra.mxu1 %v5181_v37 }
0x1cc8   :  { %3757 = vmatprep.subr.mxu1 %v4032_v33 }
0x1d80   :  { %v2769_v53 = vpop.f32.mrf.mxu1 }
0x1d81   :  { %v5213_v54 = vadd.f32 %v3343_v51, %v2769_v53 }
0x1d82   :  { %v3723_v13 = vpop.f32.mrf.mxu1 }
0x1d83   :  { %v2848_v7 = vadd.f32 %v2844_v36, %v5213_v54 }
0x1d85   :  { %3959 = vtanh.f32 %v2848_v7  ;;  %v3349_v52 = vmul.f32 -1.442695, %v2848_v7 }
0x1d87   :  { %3961 = vpow2.f32 %v3349_v52 }
0x1d92   :  { %v3960_v34 = vpop.eup %3959 }
0x1d93   :  { %2858 = vrot.lane.b32.xlu0 %v3960_v34, %s4030_s23 }
0x1d94   :  { %v3962_v0 = vpop.eup %3961 }
0x1d95   :  { %v2852_v1 = vadd.f32 1.0, %v3962_v0 }
0x1d97   :  { %3963 = vrcp.f32 %v2852_v1 }
0x1da4   :  { %v3964_v11 = vpop.eup %3963 }
0x1da5   :  { %v2856_v63 = vmul.f32 0.0, %v3964_v11 }
0x1e05   :  { %v2859_v42 = vpop.permute.xlu0 %2858 }
0x1e06   :  { %v2861_v20 = vmul.f32 %v3964_v11, %v2859_v42 }
0x1e08   :  { %2863 = vrot.lane.b32.xlu1 %v2861_v20, %s4029_s28 }
0x1e7a   :  { %v2864_v55 = vpop.permute.xlu1 %2863 }
0x1e7b   :  { %v2866_v61 = vadd.f32 %v2864_v55, %v2856_v63  ;;  %v3195_v63 = vld [vmem:[%s5289_s18 + $0x10] sm:$0xff]  ;;  %v3194_v55 = vld [vmem:[%s5289_s18 + $0x8] sm:$0xff] }
0x1e7d   :  { %3965 = vtanh.f32 %v2866_v61  ;;  %v2960_v50 = vrot.slane %v2866_v61, 6  ;;  %v3193_v61 = vld [vmem:[%s5289_s18] sm:$0xff] }
0x1e8a   :  { %v3966_v16 = vpop.eup %3965 }
0x1e8b   :  { %2869 = vrot.lane.b32.xlu0 %v3966_v16, %s4030_s23 }
0x1efd   :  { %v2870_v21 = vpop.permute.xlu0 %2869 }
0x1efe   :  { %v2872_v47 = vmul.f32 %v3964_v11, %v2870_v21 }
0x1f00   :  { %2874 = vrot.lane.b32.xlu1 %v2872_v47, %s4029_s28 }
0x1f72   :  { %v2875_v22 = vpop.permute.xlu1 %2874 }
0x1f73   :  { %3744 = vmatmul.mubr.msk.f32.vlgmr.msra.gmra.mxu1 %vm587_vm14, %v2875_v22 }
0x1f74   :  { %3758 = vmatpush3.msra.mxu1 %v5149_v41  ;;  %3765 = vmatprep.mubr.msk.f32.mxu1 %vm4033_vm3, %v4032_v33 }
0x1f75   :  { %3759 = vmatprep.subr.mxu1 %v4032_v33 }
0x1f76   :  { %3760 = vmatpush3.msra.mxu1 %v5155_v43 }
0x1f77   :  { %3761 = vmatprep.subr.mxu1 %v4032_v33 }
0x1f78   :  { %3762 = vmatpush3.msra.mxu1 %v5165_v17 }
0x1f79   :  { %3763 = vmatprep.subr.mxu1 %v4032_v33 }
0x1f7a   :  { %3764 = vmatpush3.msra.mxu1 %v5181_v37 }
0x2033   :  { %v2944_v23 = vpop.f32.mrf.mxu1 }
0x2034   :  { %v2949_v32 = vrot.slane %v2944_v23, 6 }
0x2035   :  { %v3745_v58 = vpop.f32.mrf.mxu1 }
0x2036   :  { %v2951_v45 = vadd.f32 %v2949_v32, %v5213_v54  ;;  %v3356_v32 = vld [vmem:[%s5290_s19] ss:$0 sm:$0xff] }
0x2038   :  { %3967 = vtanh.f32 %v2951_v45  ;;  %v3351_v4 = vmul.f32 -1.442695, %v2951_v45 }
0x203a   :  { %3969 = vpow2.f32 %v3351_v4 }
0x2045   :  { %v3968_v27 = vpop.eup %3967 }
0x2046   :  { %2964 = vrot.lane.b32.xlu0 %v3968_v27, %s4030_s23 }
0x2047   :  { %v3970_v19 = vpop.eup %3969 }
0x2048   :  { %v2955_v59 = vadd.f32 1.0, %v3970_v19 }
0x204a   :  { %3971 = vrcp.f32 %v2955_v59 }
0x2057   :  { %v3972_v56 = vpop.eup %3971 }
0x2058   :  { %v2962_v18 = vmul.f32 %v3972_v56, %v2960_v50 }
0x20b8   :  { %v2965_v6 = vpop.permute.xlu0 %2964 }
0x20b9   :  { %v2967_v57 = vmul.f32 %v3972_v56, %v2965_v6 }
0x20bb   :  { %2969 = vrot.lane.b32.xlu1 %v2967_v57, %s4029_s28 }
0x212d   :  { %v2970_v12 = vpop.permute.xlu1 %2969 }
0x212e   :  { %v2972_v24 = vadd.f32 %v2970_v12, %v2962_v18 }
0x2130   :  { %3973 = vtanh.f32 %v2972_v24  ;;  %v3067_v41 = vrot.slane %v2972_v24, 6 }
0x213d   :  { %v3974_v26 = vpop.eup %3973 }
0x213e   :  { %2975 = vrot.lane.b32.xlu0 %v3974_v26, %s4030_s23 }
0x21b0   :  { %v2976_v29 = vpop.permute.xlu0 %2975 }
0x21b1   :  { %v2978_v30 = vmul.f32 %v3972_v56, %v2976_v29 }
0x21b3   :  { %v2980_v5 = vrot.slane %v2978_v30, 2 }
0x21b5   :  { %2981 = vrot.lane.b32.xlu1 %v2980_v5, %s4029_s28 }
0x2227   :  { %v2982_v62 = vpop.permute.xlu1 %2981 }
0x2228   :  { %3755 = vmatmul.mubr.msk.f32.vlgmr.msra.gmra.mxu0 %vm587_vm14, %v2982_v62 }
0x2229   :  { %3776 = vmatprep.mubr.msk.f32.mxu0 %vm4033_vm3, %v4032_v33 }
0x22e8   :  { %v3051_v25 = vpop.f32.mrf.mxu0 }
0x22e9   :  { %v3056_v31 = vrot.slane %v3051_v25, 4 }
0x22ea   :  { %v3756_v9 = vpop.f32.mrf.mxu0 }
0x22eb   :  { %v3058_v28 = vadd.f32 %v3056_v31, %v5213_v54 }
0x22ed   :  { %3975 = vtanh.f32 %v3058_v28  ;;  %v3353_v35 = vmul.f32 -1.442695, %v3058_v28 }
0x22ef   :  { %3977 = vpow2.f32 %v3353_v35 }
0x22fa   :  { %v3976_v2 = vpop.eup %3975 }
0x22fb   :  { %3071 = vrot.lane.b32.xlu0 %v3976_v2, %s4030_s23 }
0x22fc   :  { %v3978_v10 = vpop.eup %3977 }
0x22fd   :  { %v3062_v15 = vadd.f32 1.0, %v3978_v10 }
0x22ff   :  { %3979 = vrcp.f32 %v3062_v15 }
0x230c   :  { %v3980_v38 = vpop.eup %3979 }
0x230d   :  { %v3069_v43 = vmul.f32 %v3980_v38, %v3067_v41 }
0x236d   :  { %v3072_v14 = vpop.permute.xlu0 %3071 }
0x236e   :  { %v3074_v40 = vmul.f32 %v3980_v38, %v3072_v14 }
0x2370   :  { %3076 = vrot.lane.b32.xlu1 %v3074_v40, %s4029_s28 }
0x23e2   :  { %v3077_v60 = vpop.permute.xlu1 %3076 }
0x23e3   :  { %v3079_v17 = vadd.f32 %v3077_v60, %v3069_v43 }
0x23e5   :  { %3981 = vtanh.f32 %v3079_v17  ;;  %v3174_v1 = vrot.slane %v3079_v17, 6 }
0x23f2   :  { %v3982_v44 = vpop.eup %3981 }
0x23f3   :  { %3082 = vrot.lane.b32.xlu0 %v3982_v44, %s4030_s23 }
0x2465   :  { %v3083_v3 = vpop.permute.xlu0 %3082 }
0x2466   :  { %v3085_v37 = vmul.f32 %v3980_v38, %v3083_v3 }
0x2468   :  { %v3087_v46 = vrot.slane %v3085_v37, 4 }
0x246a   :  { %3088 = vrot.lane.b32.xlu1 %v3087_v46, %s4029_s28 }
0x24dc   :  { %v3089_v39 = vpop.permute.xlu1 %3088 }
0x24dd   :  { %3766 = vmatmul.mubr.msk.f32.vlgmr.msra.gmra.mxu1 %vm587_vm14, %v3089_v39 }
0x259d   :  { %v3158_v48 = vpop.f32.mrf.mxu1 }
0x259e   :  { %v3163_v8 = vrot.slane %v3158_v48, 2 }
0x259f   :  { %v3767_v36 = vpop.f32.mrf.mxu1 }
0x25a0   :  { %v3165_v49 = vadd.f32 %v3163_v8, %v5213_v54  ;;  %v3196_v54 = vld [vmem:[%s5289_s18 + $0x18] sm:$0xff]  ;;  %s4034_s18 = smov [#allocation2]  }
0x25a1   :  { %3769 = vmatpush3.msra.mxu0 %v3196_v54  ;;  %s3288_s27 = sshll.u32 %s4034_s18, 4  ;;  %s3289_s27 = int_to_ptr.vmem [resolvable:$true] %s3288_s27 }
0x25a2   :  { %3983 = vtanh.f32 %v3165_v49  ;;  %v3355_v53 = vmul.f32 -1.442695, %v3165_v49  ;;  %3770 = vmatprep.subr.mxu0 %v4032_v33  ;;  %p3996_p1 = scmp.lt.s32.totalorder %s3289_s27, %s3289_s27 }
0x25a3   :  { %3771 = vmatpush3.msra.mxu0 %v3195_v63 }
0x25a4   :  { %3985 = vpow2.f32 %v3355_v53  ;;  %3772 = vmatprep.subr.mxu0 %v4032_v33 }
0x25a5   :  { %3773 = vmatpush3.msra.mxu0 %v3194_v55 }
0x25a6   :  { %3774 = vmatprep.subr.mxu0 %v4032_v33 }
0x25a7   :  { %3775 = vmatpush3.msra.mxu0 %v3193_v61 }
0x25af   :  { %v3984_v51 = vpop.eup %3983 }
0x25b0   :  { %3178 = vrot.lane.b32.xlu0 %v3984_v51, %s4030_s23 }
0x25b1   :  { %v3986_v13 = vpop.eup %3985 }
0x25b2   :  { %v3169_v7 = vadd.f32 1.0, %v3986_v13 }
0x25b4   :  { %3987 = vrcp.f32 %v3169_v7 }
0x25c1   :  { %v3988_v34 = vpop.eup %3987 }
0x25c2   :  { %v3176_v11 = vmul.f32 %v3988_v34, %v3174_v1 }
0x2622   :  { %v3179_v52 = vpop.permute.xlu0 %3178 }
0x2623   :  { %v3181_v0 = vmul.f32 %v3988_v34, %v3179_v52 }
0x2625   :  { %3183 = vrot.lane.b32.xlu1 %v3181_v0, %s4029_s28 }
0x2697   :  { %v3184_v42 = vpop.permute.xlu1 %3183 }
0x2698   :  { %v3186_v20 = vadd.f32 %v3184_v42, %v3176_v11 }
0x269a   :  { %3989 = vtanh.f32 %v3186_v20 }
0x26a7   :  { %v3990_v16 = vpop.eup %3989 }
0x26a8   :  { %3189 = vrot.lane.b32.xlu0 %v3990_v16, %s4030_s23  ;;  %s3991_s23 = scalar_lea.vmem %s3289_s27, 32 }
0x26a9   :  { %p3992_p0 = scmp.ne.s32.totalorder %s3289_s27, %s3991_s23  ;;  %p3997_p2 = scmp.lt.s32.totalorder %s3991_s23, %s3991_s23 }
0x26ab   :  { %p3998_p3 = por %p3997_p2, %p3996_p1 }
0x26ad   :  { %p3999_p4 = pnand %p3998_p3, %p3992_p0 }
0x271a   :  { %v3190_v21 = vpop.permute.xlu0 %3189 }
0x271b   :  { %v3192_v47 = vmul.f32 %v3988_v34, %v3190_v21 }
0x271d   :  { %v3205_v22 = vrot.slane %v3192_v47, 6 }
0x271f   :  { %3206 = vrot.lane.b32.xlu1 %v3205_v22, %s4029_s28 }
0x2791   :  { %v3207_v23 = vpop.permute.xlu1 %3206 }
0x2792   :  { %3777 = vmatmul.mubr.msk.f32.vlgmr.msra.gmra.mxu0 %vm587_vm14, %v3207_v23 }
0x2852   :  { %v3276_v58 = vpop.f32.mrf.mxu0 }
0x2853   :  { %v3277_v33 = vadd.f32 %v3356_v32, %v3276_v58 }
0x2854   :  { %v3778_v45 = vpop.f32.mrf.mxu0 }
0x2855   :  { %3281 = vst.msk [vmem:[#allocation2] sm:$0x3] %vm3280_vm2, %v3277_v33 }
0x2856   :  { %4002 = shalt.err (!%p3999_p4)
}
0x2857   :  { %3291 = dma.vmem_to_hbm [thread:$0]  %s3289_s27, 32, %s5291_s20, [#allocation3]  }
0x2858   :  { %4011 = dma.done.wait [#allocation3], 32  }
0x2859   :  { %4012 = vsyncadd [#allocation3], 4294967264 }
0x285a   :  { %3295 = vsyncpa [#allocation3], 1 }

</bundles_post_ra>
